<compile_context>
chip_gen: v6e
topology: v6e:2x2x1
jax: 0.10.0
libtpu: 0.0.40
codegen_flags: <defaults>
</compile_context>

<pallas_src>
import numpy as np
import jax
import jax.numpy as jnp
from jax import lax
from jax.experimental import pallas as pl
from jax.experimental.pallas import tpu as pltpu

LATENT_DIM = 32
IMG_SHAPE = (1, 16, 16)          # (C, H, W); prod = 256
IMG_FLAT = int(np.prod(IMG_SHAPE))
BATCH = 8
BN_EPS = 0.8                     # BatchNorm1d(out_feat, 0.8) -> eps = 0.8
NEG_SLOPE = 0.2

D1, D2, D3, D4 = 128, 256, 512, 1024

# Packed per-feature vector layout: [b1 | g2 | be2 | g3 | be3 | g4 | be4 | b5]
# (all offsets and sizes are multiples of 128 lanes -> aligned static slices)
_VEC_SIZES = (D1, D2, D2, D3, D3, D4, D4, IMG_FLAT)
_VEC_OFFS = tuple(int(o) for o in np.cumsum((0,) + _VEC_SIZES[:-1]))
(OFF_B1, OFF_G2, OFF_BE2, OFF_G3, OFF_BE3, OFF_G4, OFF_BE4, OFF_B5) = _VEC_OFFS
VEC_TOTAL = int(sum(_VEC_SIZES))


def _leaky_relu(x):
    return jnp.where(x > 0, x, NEG_SLOPE * x)


def _batchnorm(x, gamma, beta):
    # training-mode BatchNorm1d: biased batch statistics over the batch axis,
    # folded into a single per-feature scale/shift applied to the wide tensor.
    mean = jnp.mean(x, axis=0, keepdims=True)
    var = jnp.maximum(jnp.mean((x - mean) ** 2, axis=0, keepdims=True), 0.0)
    scale = gamma * lax.rsqrt(var + BN_EPS)
    shift = beta - mean * scale
    return x * scale + shift


def gan_kernel(z_ref, w1_ref, w2_ref, w3_ref, w4_hbm, w5_hbm, vec_ref,
               out_ref, w4_buf, w5_buf, sem):
    # Start streaming the two dominant weights (w4, w5) from HBM; their
    # transfer overlaps with the layer 1-3 compute below.
    cp4 = pltpu.make_async_copy(w4_hbm, w4_buf, sem.at[0])
    cp5 = pltpu.make_async_copy(w5_hbm, w5_buf, sem.at[1])
    cp4.start()
    cp5.start()

    # Static, lane-aligned slices of the packed per-feature parameter row.
    b1 = vec_ref[:, OFF_B1:OFF_B1 + D1]
    g2 = vec_ref[:, OFF_G2:OFF_G2 + D2]
    be2 = vec_ref[:, OFF_BE2:OFF_BE2 + D2]
    g3 = vec_ref[:, OFF_G3:OFF_G3 + D3]
    be3 = vec_ref[:, OFF_BE3:OFF_BE3 + D3]
    g4 = vec_ref[:, OFF_G4:OFF_G4 + D4]
    be4 = vec_ref[:, OFF_BE4:OFF_BE4 + D4]
    b5 = vec_ref[:, OFF_B5:OFF_B5 + IMG_FLAT]

    # block(latent, 128, normalize=False)
    h = jnp.dot(z_ref[...].astype(jnp.bfloat16), w1_ref[...],
                preferred_element_type=jnp.float32) + b1
    h = _leaky_relu(h)

    # block(128, 256)   (Linear bias dropped: cancelled exactly by BN mean-sub)
    h = jnp.dot(h.astype(jnp.bfloat16), w2_ref[...],
                preferred_element_type=jnp.float32)
    h = _leaky_relu(_batchnorm(h, g2, be2))

    # block(256, 512)
    h = jnp.dot(h.astype(jnp.bfloat16), w3_ref[...],
                preferred_element_type=jnp.float32)
    h = _leaky_relu(_batchnorm(h, g3, be3))

    # block(512, 1024)
    cp4.wait()
    h = jnp.dot(h.astype(jnp.bfloat16), w4_buf[...],
                preferred_element_type=jnp.float32)
    h = _leaky_relu(_batchnorm(h, g4, be4))

    # Linear(1024, prod(img_shape)) + Tanh
    cp5.wait()
    h = jnp.dot(h.astype(jnp.bfloat16), w5_buf[...],
                preferred_element_type=jnp.float32) + b5
    out_ref[...] = jnp.tanh(h)


def init_params(key, latent_dim, img_flat):
    """PyTorch-style Linear init: U(-1/sqrt(fan_in), 1/sqrt(fan_in)).
    Weights stored pre-transposed as (in_feat, out_feat); biases/BN params as (1, out_feat)."""
    dims = [(latent_dim, D1), (D1, D2), (D2, D3), (D3, D4), (D4, img_flat)]
    ws, bs = [], []
    for (fi, fo) in dims:
        key, kw, kb = jax.random.split(key, 3)
        bound = 1.0 / np.sqrt(fi)
        ws.append(jax.random.uniform(kw, (fi, fo), jnp.float32, -bound, bound))
        bs.append(jax.random.uniform(kb, (1, fo), jnp.float32, -bound, bound))
    # BatchNorm affine params (PyTorch default: gamma=1, beta=0) for layers 2..4
    bn = [(jnp.ones((1, fo), jnp.float32), jnp.zeros((1, fo), jnp.float32))
          for fo in (D2, D3, D4)]
    return ws, bs, bn


def prepare_params(ws, bs, bn):
    """One-time parameter preprocessing (outside the jitted hot path):
    cast weights to bf16 and pack all per-feature vectors into one f32 row."""
    w1, w2, w3, w4, w5 = [w.astype(jnp.bfloat16) for w in ws]
    b1, _b2, _b3, _b4, b5 = bs   # b2..b4 cancelled by train-mode BN -> dropped
    (g2, be2), (g3, be3), (g4, be4) = bn
    vec = jnp.concatenate([b1, g2, be2, g3, be3, g4, be4, b5], axis=1)
    assert vec.shape == (1, VEC_TOTAL)
    return (w1, w2, w3, w4, w5, vec)


@jax.jit
def simple_gan_forward(z, w1, w2, w3, w4, w5, vec):
    B = z.shape[0]

    vmem = pl.BlockSpec(memory_space=pltpu.MemorySpace.VMEM)
    hbm = pl.BlockSpec(memory_space=pl.ANY)   # raw HBM refs, DMA'd manually

    img_flat = pl.pallas_call(
        gan_kernel,
        out_shape=jax.ShapeDtypeStruct((B, IMG_FLAT), jnp.float32),
        in_specs=[vmem, vmem, vmem, vmem, hbm, hbm, vmem],
        out_specs=vmem,
        scratch_shapes=[
            pltpu.VMEM((D3, D4), jnp.bfloat16),        # w4 streaming buffer
            pltpu.VMEM((D4, IMG_FLAT), jnp.bfloat16),  # w5 streaming buffer
            pltpu.SemaphoreType.DMA((2,)),
        ],
        compiler_params=pltpu.CompilerParams(vmem_limit_bytes=32 << 20),
    )(z, w1, w2, w3, w4, w5, vec)

    # reshape to PyTorch NCHW image layout (B, C, H, W)
    return img_flat.reshape(B, *IMG_SHAPE)


def reference_forward(z, params):
    """Pure-JAX reference with the same bf16 weight / f32 accumulation math."""
    w1, w2, w3, w4, w5, vec = params
    b1 = vec[:, OFF_B1:OFF_B1 + D1]
    g2, be2 = vec[:, OFF_G2:OFF_G2 + D2], vec[:, OFF_BE2:OFF_BE2 + D2]
    g3, be3 = vec[:, OFF_G3:OFF_G3 + D3], vec[:, OFF_BE3:OFF_BE3 + D3]
    g4, be4 = vec[:, OFF_G4:OFF_G4 + D4], vec[:, OFF_BE4:OFF_BE4 + D4]
    b5 = vec[:, OFF_B5:OFF_B5 + IMG_FLAT]

    def mm(x, w):
        return jnp.dot(x.astype(jnp.bfloat16), w, preferred_element_type=jnp.float32)

    h = _leaky_relu(mm(z, w1) + b1)
    h = _leaky_relu(_batchnorm(mm(h, w2), g2, be2))
    h = _leaky_relu(_batchnorm(mm(h, w3), g3, be3))
    h = _leaky_relu(_batchnorm(mm(h, w4), g4, be4))
    h = jnp.tanh(mm(h, w5) + b5)
    return h.reshape(z.shape[0], *IMG_SHAPE)


if __name__ == "__main__":
    key = jax.random.PRNGKey(0)
    key, kz, kp = jax.random.split(key, 3)
    z = jax.random.normal(kz, (BATCH, LATENT_DIM), jnp.float32)
    ws, bs, bn = init_params(kp, LATENT_DIM, IMG_FLAT)
    params = prepare_params(ws, bs, bn)

    img = simple_gan_forward(z, *params)
    img = jax.block_until_ready(img)

    assert img.shape == (BATCH, *IMG_SHAPE), img.shape
    assert img.dtype == jnp.float32
    assert bool(jnp.all(jnp.isfinite(img)))
    assert bool(jnp.all(jnp.abs(img) <= 1.0))  # tanh output range

    ref = reference_forward(z, params)
    assert bool(jnp.all(jnp.abs(img - ref) < 1e-2)), float(jnp.max(jnp.abs(img - ref)))

    print("KERNEL_OK")
</pallas_src>

<mosaic_0001>
module attributes {stable_mosaic.version = 11 : i64} {
  func.func @gan_kernel(%arg0: memref<8x32xf32, #tpu.memory_space<vmem>>, %arg1: memref<32x128xbf16, #tpu.memory_space<vmem>>, %arg2: memref<128x256xbf16, #tpu.memory_space<vmem>>, %arg3: memref<256x512xbf16, #tpu.memory_space<vmem>>, %arg4: memref<512x1024xbf16, #tpu.memory_space<any>>, %arg5: memref<1024x256xbf16, #tpu.memory_space<any>>, %arg6: memref<1x3968xf32, #tpu.memory_space<vmem>>, %arg7: memref<8x256xf32, #tpu.memory_space<vmem>>, %arg8: memref<512x1024xbf16, #tpu.memory_space<vmem>>, %arg9: memref<1024x256xbf16, #tpu.memory_space<vmem>>, %arg10: memref<2x!tpu.dma_semaphore, #tpu.memory_space<semaphore_mem>>) attributes {dimension_semantics = [], scalar_prefetch = 0 : i64, scratch_operands = 3 : i64, tpu.core_type = #tpu.core_type<tc>} {
    %c0_i32 = arith.constant 0 : i32
    %0 = tpu.memref_slice %arg10[%c0_i32] : memref<2x!tpu.dma_semaphore, #tpu.memory_space<semaphore_mem>> -> memref<1x!tpu.dma_semaphore, #tpu.memory_space<semaphore_mem>>
    %1 = tpu.memref_squeeze %0 : memref<1x!tpu.dma_semaphore, #tpu.memory_space<semaphore_mem>> -> memref<!tpu.dma_semaphore, #tpu.memory_space<semaphore_mem>>
    tpu.enqueue_dma source(%arg4 : memref<512x1024xbf16, #tpu.memory_space<any>>) target(%arg8 : memref<512x1024xbf16, #tpu.memory_space<vmem>>) target_semaphore(%1 : memref<!tpu.dma_semaphore, #tpu.memory_space<semaphore_mem>>)
    %c1_i32 = arith.constant 1 : i32
    %2 = tpu.memref_slice %arg10[%c1_i32] : memref<2x!tpu.dma_semaphore, #tpu.memory_space<semaphore_mem>> -> memref<1x!tpu.dma_semaphore, #tpu.memory_space<semaphore_mem>>
    %3 = tpu.memref_squeeze %2 : memref<1x!tpu.dma_semaphore, #tpu.memory_space<semaphore_mem>> -> memref<!tpu.dma_semaphore, #tpu.memory_space<semaphore_mem>>
    tpu.enqueue_dma source(%arg5 : memref<1024x256xbf16, #tpu.memory_space<any>>) target(%arg9 : memref<1024x256xbf16, #tpu.memory_space<vmem>>) target_semaphore(%3 : memref<!tpu.dma_semaphore, #tpu.memory_space<semaphore_mem>>)
    %c0 = arith.constant 0 : index
    %c0_0 = arith.constant 0 : index
    %4 = vector.load %arg6[%c0, %c0_0] : memref<1x3968xf32, #tpu.memory_space<vmem>>, vector<1x128xf32>
    %c0_1 = arith.constant 0 : index
    %c128 = arith.constant 128 : index
    %5 = vector.load %arg6[%c0_1, %c128] : memref<1x3968xf32, #tpu.memory_space<vmem>>, vector<1x256xf32>
    %c0_2 = arith.constant 0 : index
    %c384 = arith.constant 384 : index
    %6 = vector.load %arg6[%c0_2, %c384] : memref<1x3968xf32, #tpu.memory_space<vmem>>, vector<1x256xf32>
    %c0_3 = arith.constant 0 : index
    %c640 = arith.constant 640 : index
    %7 = vector.load %arg6[%c0_3, %c640] : memref<1x3968xf32, #tpu.memory_space<vmem>>, vector<1x512xf32>
    %c0_4 = arith.constant 0 : index
    %c1152 = arith.constant 1152 : index
    %8 = vector.load %arg6[%c0_4, %c1152] : memref<1x3968xf32, #tpu.memory_space<vmem>>, vector<1x512xf32>
    %c0_5 = arith.constant 0 : index
    %c1664 = arith.constant 1664 : index
    %9 = vector.load %arg6[%c0_5, %c1664] : memref<1x3968xf32, #tpu.memory_space<vmem>>, vector<1x1024xf32>
    %c0_6 = arith.constant 0 : index
    %c2688 = arith.constant 2688 : index
    %10 = vector.load %arg6[%c0_6, %c2688] : memref<1x3968xf32, #tpu.memory_space<vmem>>, vector<1x1024xf32>
    %c0_7 = arith.constant 0 : index
    %c3712 = arith.constant 3712 : index
    %11 = vector.load %arg6[%c0_7, %c3712] : memref<1x3968xf32, #tpu.memory_space<vmem>>, vector<1x256xf32>
    %c0_8 = arith.constant 0 : index
    %c0_9 = arith.constant 0 : index
    %12 = vector.load %arg0[%c0_8, %c0_9] : memref<8x32xf32, #tpu.memory_space<vmem>>, vector<8x32xf32>
    %13 = arith.truncf %12 : vector<8x32xf32> to vector<8x32xbf16>
    %c0_10 = arith.constant 0 : index
    %c0_11 = arith.constant 0 : index
    %14 = vector.load %arg1[%c0_10, %c0_11] : memref<32x128xbf16, #tpu.memory_space<vmem>>, vector<32x128xbf16>
    %cst = arith.constant dense<0.000000e+00> : vector<8x128xf32>
    %15 = tpu.matmul %13, %14, %cst {dimension_numbers = #tpu.dot_dimension_numbers<[1], [0], [0], [1], [0, 0, 1, 1], [], []>} : vector<8x32xbf16>, vector<32x128xbf16>, vector<8x128xf32> -> vector<8x128xf32>
    %16 = vector.broadcast %4 : vector<1x128xf32> to vector<8x128xf32>
    %17 = arith.addf %15, %16 : vector<8x128xf32>
    %cst_12 = arith.constant 0.000000e+00 : f32
    %18 = vector.broadcast %cst_12 : f32 to vector<8x128xf32>
    %19 = arith.cmpf ogt, %17, %18 : vector<8x128xf32>
    %cst_13 = arith.constant 2.000000e-01 : f32
    %20 = vector.broadcast %cst_13 : f32 to vector<8x128xf32>
    %21 = arith.mulf %20, %17 : vector<8x128xf32>
    %22 = arith.select %19, %17, %21 : vector<8x128xi1>, vector<8x128xf32>
    %23 = arith.truncf %22 : vector<8x128xf32> to vector<8x128xbf16>
    %c0_14 = arith.constant 0 : index
    %c0_15 = arith.constant 0 : index
    %24 = vector.load %arg2[%c0_14, %c0_15] : memref<128x256xbf16, #tpu.memory_space<vmem>>, vector<128x256xbf16>
    %cst_16 = arith.constant dense<0.000000e+00> : vector<8x256xf32>
    %25 = tpu.matmul %23, %24, %cst_16 {dimension_numbers = #tpu.dot_dimension_numbers<[1], [0], [0], [1], [0, 0, 1, 1], [], []>} : vector<8x128xbf16>, vector<128x256xbf16>, vector<8x256xf32> -> vector<8x256xf32>
    %cst_17 = arith.constant dense<0.000000e+00> : vector<256xf32>
    %26 = vector.multi_reduction <add>, %25, %cst_17 [0] : vector<8x256xf32> to vector<256xf32>
    %27 = vector.shape_cast %26 : vector<256xf32> to vector<1x256xf32>
    %cst_18 = arith.constant 8.000000e+00 : f32
    %28 = vector.broadcast %cst_18 : f32 to vector<1x256xf32>
    %29 = arith.divf %27, %28 : vector<1x256xf32>
    %30 = vector.broadcast %29 : vector<1x256xf32> to vector<8x256xf32>
    %31 = arith.subf %25, %30 : vector<8x256xf32>
    %32 = arith.mulf %31, %31 : vector<8x256xf32>
    %cst_19 = arith.constant dense<0.000000e+00> : vector<256xf32>
    %33 = vector.multi_reduction <add>, %32, %cst_19 [0] : vector<8x256xf32> to vector<256xf32>
    %34 = vector.shape_cast %33 : vector<256xf32> to vector<1x256xf32>
    %cst_20 = arith.constant 8.000000e+00 : f32
    %35 = vector.broadcast %cst_20 : f32 to vector<1x256xf32>
    %36 = arith.divf %34, %35 : vector<1x256xf32>
    %cst_21 = arith.constant 0.000000e+00 : f32
    %37 = vector.broadcast %cst_21 : f32 to vector<1x256xf32>
    %38 = arith.maximumf %36, %37 : vector<1x256xf32>
    %cst_22 = arith.constant 8.000000e-01 : f32
    %39 = vector.broadcast %cst_22 : f32 to vector<1x256xf32>
    %40 = arith.addf %38, %39 : vector<1x256xf32>
    %41 = math.rsqrt %40 : vector<1x256xf32>
    %42 = arith.mulf %5, %41 : vector<1x256xf32>
    %43 = arith.mulf %29, %42 : vector<1x256xf32>
    %44 = arith.subf %6, %43 : vector<1x256xf32>
    %45 = vector.broadcast %42 : vector<1x256xf32> to vector<8x256xf32>
    %46 = arith.mulf %25, %45 : vector<8x256xf32>
    %47 = vector.broadcast %44 : vector<1x256xf32> to vector<8x256xf32>
    %48 = arith.addf %46, %47 : vector<8x256xf32>
    %cst_23 = arith.constant 0.000000e+00 : f32
    %49 = vector.broadcast %cst_23 : f32 to vector<8x256xf32>
    %50 = arith.cmpf ogt, %48, %49 : vector<8x256xf32>
    %cst_24 = arith.constant 2.000000e-01 : f32
    %51 = vector.broadcast %cst_24 : f32 to vector<8x256xf32>
    %52 = arith.mulf %51, %48 : vector<8x256xf32>
    %53 = arith.select %50, %48, %52 : vector<8x256xi1>, vector<8x256xf32>
    %54 = arith.truncf %53 : vector<8x256xf32> to vector<8x256xbf16>
    %c0_25 = arith.constant 0 : index
    %c0_26 = arith.constant 0 : index
    %55 = vector.load %arg3[%c0_25, %c0_26] : memref<256x512xbf16, #tpu.memory_space<vmem>>, vector<256x512xbf16>
    %cst_27 = arith.constant dense<0.000000e+00> : vector<8x512xf32>
    %56 = tpu.matmul %54, %55, %cst_27 {dimension_numbers = #tpu.dot_dimension_numbers<[1], [0], [0], [1], [0, 0, 1, 1], [], []>} : vector<8x256xbf16>, vector<256x512xbf16>, vector<8x512xf32> -> vector<8x512xf32>
    %cst_28 = arith.constant dense<0.000000e+00> : vector<512xf32>
    %57 = vector.multi_reduction <add>, %56, %cst_28 [0] : vector<8x512xf32> to vector<512xf32>
    %58 = vector.shape_cast %57 : vector<512xf32> to vector<1x512xf32>
    %cst_29 = arith.constant 8.000000e+00 : f32
    %59 = vector.broadcast %cst_29 : f32 to vector<1x512xf32>
    %60 = arith.divf %58, %59 : vector<1x512xf32>
    %61 = vector.broadcast %60 : vector<1x512xf32> to vector<8x512xf32>
    %62 = arith.subf %56, %61 : vector<8x512xf32>
    %63 = arith.mulf %62, %62 : vector<8x512xf32>
    %cst_30 = arith.constant dense<0.000000e+00> : vector<512xf32>
    %64 = vector.multi_reduction <add>, %63, %cst_30 [0] : vector<8x512xf32> to vector<512xf32>
    %65 = vector.shape_cast %64 : vector<512xf32> to vector<1x512xf32>
    %cst_31 = arith.constant 8.000000e+00 : f32
    %66 = vector.broadcast %cst_31 : f32 to vector<1x512xf32>
    %67 = arith.divf %65, %66 : vector<1x512xf32>
    %cst_32 = arith.constant 0.000000e+00 : f32
    %68 = vector.broadcast %cst_32 : f32 to vector<1x512xf32>
    %69 = arith.maximumf %67, %68 : vector<1x512xf32>
    %cst_33 = arith.constant 8.000000e-01 : f32
    %70 = vector.broadcast %cst_33 : f32 to vector<1x512xf32>
    %71 = arith.addf %69, %70 : vector<1x512xf32>
    %72 = math.rsqrt %71 : vector<1x512xf32>
    %73 = arith.mulf %7, %72 : vector<1x512xf32>
    %74 = arith.mulf %60, %73 : vector<1x512xf32>
    %75 = arith.subf %8, %74 : vector<1x512xf32>
    %76 = vector.broadcast %73 : vector<1x512xf32> to vector<8x512xf32>
    %77 = arith.mulf %56, %76 : vector<8x512xf32>
    %78 = vector.broadcast %75 : vector<1x512xf32> to vector<8x512xf32>
    %79 = arith.addf %77, %78 : vector<8x512xf32>
    %cst_34 = arith.constant 0.000000e+00 : f32
    %80 = vector.broadcast %cst_34 : f32 to vector<8x512xf32>
    %81 = arith.cmpf ogt, %79, %80 : vector<8x512xf32>
    %cst_35 = arith.constant 2.000000e-01 : f32
    %82 = vector.broadcast %cst_35 : f32 to vector<8x512xf32>
    %83 = arith.mulf %82, %79 : vector<8x512xf32>
    %84 = arith.select %81, %79, %83 : vector<8x512xi1>, vector<8x512xf32>
    %c0_i32_36 = arith.constant 0 : i32
    %85 = tpu.memref_slice %arg10[%c0_i32_36] : memref<2x!tpu.dma_semaphore, #tpu.memory_space<semaphore_mem>> -> memref<1x!tpu.dma_semaphore, #tpu.memory_space<semaphore_mem>>
    %86 = tpu.memref_squeeze %85 : memref<1x!tpu.dma_semaphore, #tpu.memory_space<semaphore_mem>> -> memref<!tpu.dma_semaphore, #tpu.memory_space<semaphore_mem>>
    tpu.wait_dma2 semaphore(%86 : memref<!tpu.dma_semaphore, #tpu.memory_space<semaphore_mem>>) src(%arg4 : memref<512x1024xbf16, #tpu.memory_space<any>>) dst(%arg8 : memref<512x1024xbf16, #tpu.memory_space<vmem>>)
    %87 = arith.truncf %84 : vector<8x512xf32> to vector<8x512xbf16>
    %c0_37 = arith.constant 0 : index
    %c0_38 = arith.constant 0 : index
    %88 = vector.load %arg8[%c0_37, %c0_38] : memref<512x1024xbf16, #tpu.memory_space<vmem>>, vector<512x1024xbf16>
    %cst_39 = arith.constant dense<0.000000e+00> : vector<8x1024xf32>
    %89 = tpu.matmul %87, %88, %cst_39 {dimension_numbers = #tpu.dot_dimension_numbers<[1], [0], [0], [1], [0, 0, 1, 1], [], []>} : vector<8x512xbf16>, vector<512x1024xbf16>, vector<8x1024xf32> -> vector<8x1024xf32>
    %cst_40 = arith.constant dense<0.000000e+00> : vector<1024xf32>
    %90 = vector.multi_reduction <add>, %89, %cst_40 [0] : vector<8x1024xf32> to vector<1024xf32>
    %91 = vector.shape_cast %90 : vector<1024xf32> to vector<1x1024xf32>
    %cst_41 = arith.constant 8.000000e+00 : f32
    %92 = vector.broadcast %cst_41 : f32 to vector<1x1024xf32>
    %93 = arith.divf %91, %92 : vector<1x1024xf32>
    %94 = vector.broadcast %93 : vector<1x1024xf32> to vector<8x1024xf32>
    %95 = arith.subf %89, %94 : vector<8x1024xf32>
    %96 = arith.mulf %95, %95 : vector<8x1024xf32>
    %cst_42 = arith.constant dense<0.000000e+00> : vector<1024xf32>
    %97 = vector.multi_reduction <add>, %96, %cst_42 [0] : vector<8x1024xf32> to vector<1024xf32>
    %98 = vector.shape_cast %97 : vector<1024xf32> to vector<1x1024xf32>
    %cst_43 = arith.constant 8.000000e+00 : f32
    %99 = vector.broadcast %cst_43 : f32 to vector<1x1024xf32>
    %100 = arith.divf %98, %99 : vector<1x1024xf32>
    %cst_44 = arith.constant 0.000000e+00 : f32
    %101 = vector.broadcast %cst_44 : f32 to vector<1x1024xf32>
    %102 = arith.maximumf %100, %101 : vector<1x1024xf32>
    %cst_45 = arith.constant 8.000000e-01 : f32
    %103 = vector.broadcast %cst_45 : f32 to vector<1x1024xf32>
    %104 = arith.addf %102, %103 : vector<1x1024xf32>
    %105 = math.rsqrt %104 : vector<1x1024xf32>
    %106 = arith.mulf %9, %105 : vector<1x1024xf32>
    %107 = arith.mulf %93, %106 : vector<1x1024xf32>
    %108 = arith.subf %10, %107 : vector<1x1024xf32>
    %109 = vector.broadcast %106 : vector<1x1024xf32> to vector<8x1024xf32>
    %110 = arith.mulf %89, %109 : vector<8x1024xf32>
    %111 = vector.broadcast %108 : vector<1x1024xf32> to vector<8x1024xf32>
    %112 = arith.addf %110, %111 : vector<8x1024xf32>
    %cst_46 = arith.constant 0.000000e+00 : f32
    %113 = vector.broadcast %cst_46 : f32 to vector<8x1024xf32>
    %114 = arith.cmpf ogt, %112, %113 : vector<8x1024xf32>
    %cst_47 = arith.constant 2.000000e-01 : f32
    %115 = vector.broadcast %cst_47 : f32 to vector<8x1024xf32>
    %116 = arith.mulf %115, %112 : vector<8x1024xf32>
    %117 = arith.select %114, %112, %116 : vector<8x1024xi1>, vector<8x1024xf32>
    %c1_i32_48 = arith.constant 1 : i32
    %118 = tpu.memref_slice %arg10[%c1_i32_48] : memref<2x!tpu.dma_semaphore, #tpu.memory_space<semaphore_mem>> -> memref<1x!tpu.dma_semaphore, #tpu.memory_space<semaphore_mem>>
    %119 = tpu.memref_squeeze %118 : memref<1x!tpu.dma_semaphore, #tpu.memory_space<semaphore_mem>> -> memref<!tpu.dma_semaphore, #tpu.memory_space<semaphore_mem>>
    tpu.wait_dma2 semaphore(%119 : memref<!tpu.dma_semaphore, #tpu.memory_space<semaphore_mem>>) src(%arg5 : memref<1024x256xbf16, #tpu.memory_space<any>>) dst(%arg9 : memref<1024x256xbf16, #tpu.memory_space<vmem>>)
    %120 = arith.truncf %117 : vector<8x1024xf32> to vector<8x1024xbf16>
    %c0_49 = arith.constant 0 : index
    %c0_50 = arith.constant 0 : index
    %121 = vector.load %arg9[%c0_49, %c0_50] : memref<1024x256xbf16, #tpu.memory_space<vmem>>, vector<1024x256xbf16>
    %cst_51 = arith.constant dense<0.000000e+00> : vector<8x256xf32>
    %122 = tpu.matmul %120, %121, %cst_51 {dimension_numbers = #tpu.dot_dimension_numbers<[1], [0], [0], [1], [0, 0, 1, 1], [], []>} : vector<8x1024xbf16>, vector<1024x256xbf16>, vector<8x256xf32> -> vector<8x256xf32>
    %123 = vector.broadcast %11 : vector<1x256xf32> to vector<8x256xf32>
    %124 = arith.addf %122, %123 : vector<8x256xf32>
    %125 = math.tanh %124 : vector<8x256xf32>
    %c0_52 = arith.constant 0 : index
    %c0_53 = arith.constant 0 : index
    %126 = vector.load %arg7[%c0_52, %c0_53] : memref<8x256xf32, #tpu.memory_space<vmem>>, vector<8x256xf32>
    tpu.vector_store %arg7[%c0_52, %c0_53], %125 {strides = array<i32>} : memref<8x256xf32, #tpu.memory_space<vmem>>, vector<8x256xf32>,
    return
  }
}

</mosaic_0001>

<bundles_post_ra>
// kernel: simple_gan_forward.1
= control target key start
LH: loop header
LB: loop body
LE: loop exit
PB: predicated region body
PF: predicated region fallthrough
CT: control target
= control target key end

     0   :  { %12 = vsyncpa [#allocation6], 0  ;;  %s5708_s0 = inlined_call_operand.hbm [shape: f32[8,32], index: 0, kind: input, shape index: {}]   ;;  %s5709_s1 = inlined_call_operand.hbm [shape: bf16[32,128], index: 1, kind: input, shape index: {}]   ;;  %s5710_s2 = inlined_call_operand.hbm [shape: bf16[128,256], index: 2, kind: input, shape index: {}]   ;;  %s5711_s3 = inlined_call_operand.hbm [shape: bf16[256,512], index: 3, kind: input, shape index: {}]   ;;  %s5712_s4 = inlined_call_operand.hbm [shape: bf16[512,1024], index: 4, kind: input, shape index: {}]   ;;  %s5713_s5 = inlined_call_operand.hbm [shape: bf16[1024,256], index: 5, kind: input, shape index: {}]   ;;  %s5714_s6 = inlined_call_operand.hbm [shape: f32[1,3968], index: 6, kind: input, shape index: {}]   ;;  %s5715_s7 = inlined_call_operand.vmem [shape: f32[8,256], index: 7, kind: output, shape index: {}]  }
   0x1   :  { %13 = vsyncpa [#allocation8], 0 }
   0x2   :  { %14 = vsyncpa [#allocation11], 0  ;;  %s5353_s24 = smov [#allocation7]  }
   0x3   :  { %s30_s25 = sshll.u32 %s5353_s24, 4  ;;  %s31_s25 = int_to_ptr.vmem [resolvable:$true] %s30_s25 }
   0x4   :  { %s5211_s26 = scalar_lea.vmem %s31_s25, 256  ;;  %p5216_p1 = scmp.lt.s32.totalorder %s31_s25, %s31_s25 }
   0x5   :  { %p5212_p0 = scmp.ne.s32.totalorder %s31_s25, %s5211_s26  ;;  %p5217_p2 = scmp.lt.s32.totalorder %s5211_s26, %s5211_s26 }
   0x7   :  { %p5218_p3 = por %p5217_p2, %p5216_p1 }
   0x9   :  { %p5219_p4 = pnand %p5218_p3, %p5212_p0 }
   0xb   :  { %5222 = shalt.err (!%p5219_p4)
}
   0xc   :  { %s5354_s27 = smov 64   ;;  %s5355_s28 = smov 4  }
   0xd   :  { %36 = dma.hbm_to_vmem [thread:$0]  %s5709_s1, 256, %s31_s25, [#allocation8], %s5354_s27, %s5354_s27, %s5355_s28  }
   0xe   :  { %s5356_s8 = smov [#allocation10]  }
   0xf   :  { %s54_s9 = sshll.u32 %s5356_s8, 4  ;;  %s55_s9 = int_to_ptr.vmem [resolvable:$true] %s54_s9 }
  0x10   :  { %s5231_s10 = scalar_lea.vmem %s55_s9, 8192  ;;  %p5236_p6 = scmp.lt.s32.totalorder %s55_s9, %s55_s9 }
  0x11   :  { %p5232_p5 = scmp.ne.s32.totalorder %s55_s9, %s5231_s10  ;;  %p5237_p7 = scmp.lt.s32.totalorder %s5231_s10, %s5231_s10 }
  0x13   :  { %p5238_p8 = por %p5237_p7, %p5236_p6 }
  0x15   :  { %p5239_p9 = pnand %p5238_p8, %p5232_p5 }
  0x17   :  { %5242 = shalt.err (!%p5239_p9)
}
  0x18   :  { %s5357_s11 = smov 256   ;;  %s5358_s12 = smov 16  }
  0x19   :  { %60 = dma.hbm_to_vmem [thread:$0]  %s5711_s3, 8192, %s55_s9, [#allocation11], %s5357_s11, %s5357_s11, %s5358_s12  }
  0x1a   :  { %s5359_s15 = smov [#allocation5]   ;;  %s5360_s17 = smov [#allocation9]  }
  0x1b   :  { %s21_s16 = sshll.u32 %s5359_s15, 4  ;;  %s42_s1 = sshll.u32 %s5360_s17, 4  ;;  %s22_s16 = int_to_ptr.vmem [resolvable:$true] %s21_s16  ;;  %s43_s1 = int_to_ptr.vmem [resolvable:$true] %s42_s1 }
  0x1c   :  { %s5251_s18 = scalar_lea.vmem %s22_s16, 128  ;;  %p5256_p11 = scmp.lt.s32.totalorder %s22_s16, %s22_s16 }
  0x1d   :  { %p5252_p10 = scmp.ne.s32.totalorder %s22_s16, %s5251_s18  ;;  %p5257_p12 = scmp.lt.s32.totalorder %s5251_s18, %s5251_s18 }
  0x1f   :  { %p5258_p13 = por %p5257_p12, %p5256_p11 }
  0x21   :  { %p5259_p0 = pnand %p5258_p13, %p5252_p10 }
  0x23   :  { %5262 = shalt.err (!%p5259_p0)
}
  0x24   :  { %24 = dma.hbm_to_vmem [thread:$0]  %s5708_s0, 128, %s22_s16, [#allocation6]  }
  0x25   :  { %s5271_s21 = scalar_lea.vmem %s43_s1, 2048  ;;  %p5276_p2 = scmp.lt.s32.totalorder %s43_s1, %s43_s1 }
  0x26   :  { %p5272_p1 = scmp.ne.s32.totalorder %s43_s1, %s5271_s21  ;;  %p5277_p3 = scmp.lt.s32.totalorder %s5271_s21, %s5271_s21 }
  0x28   :  { %p5278_p4 = por %p5277_p3, %p5276_p2 }
  0x2a   :  { %p5279_p5 = pnand %p5278_p4, %p5272_p1 }
  0x2c   :  { %5282 = shalt.err (!%p5279_p5)
}
  0x2d   :  { %s5361_s3 = smov 128   ;;  %s5362_s22 = smov 8  }
  0x2e   :  { %48 = dma.hbm_to_vmem [thread:$0]  %s5710_s2, 2048, %s43_s1, [#allocation8], %s5361_s3, %s5361_s3, %s5362_s22  }
  0x2f   :  { %s5363_s25 = smov [#allocation12]  }
  0x30   :  { %s67_s26 = sshll.u32 %s5363_s25, 4  ;;  %s68_s26 = int_to_ptr.vmem [resolvable:$true] %s67_s26 }
  0x31   :  { %s5291_s27 = scalar_lea.vmem %s68_s26, 496  ;;  %s5295_s28 = scalar_lea.vmem %s68_s26, 512 }
  0x32   :  { %p5292_p6 = scmp.ne.s32.totalorder %s68_s26, %s5291_s27  ;;  %p5296_p7 = scmp.lt.s32.totalorder %s68_s26, %s68_s26 }
  0x33   :  { %p5297_p8 = scmp.lt.s32.totalorder %s5295_s28, %s5291_s27 }
  0x35   :  { %p5298_p9 = por %p5297_p8, %p5296_p7 }
  0x37   :  { %p5299_p10 = pnand %p5298_p9, %p5292_p6 }
  0x39   :  { %5302 = shalt.err (!%p5299_p10)
}
  0x3a   :  { %70 = dma.hbm_to_vmem [thread:$0]  %s5714_s6, 496, %s68_s26, [#allocation11]  }
  0x3b   :  { %5343 = dma.done.wait [#allocation6], 128  }
  0x3c   :  { %5344 = vsyncadd [#allocation6], 4294967168 }
  0x3d   :  { %5345 = dma.done.wait [#allocation8], 2304  }
  0x3e   :  { %5346 = vsyncadd [#allocation8], 4294964992 }
  0x3f   :  { %5347 = dma.done.wait [#allocation11], 8688  }
  0x40   :  { %5348 = vsyncadd [#allocation11], 4294958608  ;;  %v5364_v0 = vmov 0.0   ;;  %vm5365_vm0 = vmmov 0   ;;  %v5425_v1 = vld [vmem:[#allocation12 + $0xd] sm:$0xff]  ;;  %v5427_v2 = vld [vmem:[#allocation12 + $0x15] sm:$0xff] }
  0x41   :  { %4832 = vmatprep.subr.bf16.mxu0 %v5364_v0  ;;  %4836 = vmatprep.mubr.msk.bf16.mxu0 %vm5365_vm0, %v5364_v0  ;;  %v5429_v3 = vld [vmem:[#allocation12 + $0x1d] sm:$0x3]  ;;  %v4858_v5 = vld [vmem:[#allocation7] sm:$0xff]   ;;  %v118_v6 = vld [vmem:[#allocation5] sm:$0xff]  ;;  %vm142_vm1 = vcmask 261120   ;;  %v5366_v24 = vmov 0  }
  0x42   :  { %v4857_v4 = vld [vmem:[#allocation7 + $0x8] sm:$0xff]   ;;  %v4862_v9 = vld [vmem:[#allocation9 + $0x64] ss:$8 sps:$4 sm:$0xff]   ;;  %v119_v10 = vpack.c.bf16 %v118_v6, %v118_v6  ;;  %v4864_v11 = vld [vmem:[#allocation9 + $0x60] ss:$8 sps:$4 sm:$0xff]   ;;  %318 = vmatprep.mubr.bf16.mxu1 %v5366_v24  ;;  %s5368_s2 = smov [#allocation2]  }
  0x43   :  { %4833 = vmatpush3.bf16.msra.mxu0 %v4857_v4  ;;  %v4859_v7 = vld [vmem:[#allocation9 + $0x74] ss:$8 sps:$4 sm:$0xff]   ;;  %v4861_v8 = vld [vmem:[#allocation9 + $0x70] ss:$8 sps:$4 sm:$0xff]   ;;  %v4868_v14 = vld [vmem:[#allocation9 + $0x44] ss:$8 sps:$4 sm:$0xff]  }
  0x44   :  { %4834 = vmatprep.subr.bf16.mxu0 %v5364_v0  ;;  %286 = vmatprep.subr.bf16.mxu1 %v4859_v7  ;;  %v4865_v12 = vld [vmem:[#allocation9 + $0x54] ss:$8 sps:$4 sm:$0xff]   ;;  %v4867_v13 = vld [vmem:[#allocation9 + $0x50] ss:$8 sps:$4 sm:$0xff]   ;;  %v4870_v15 = vld [vmem:[#allocation9 + $0x40] ss:$8 sps:$4 sm:$0xff]  }
  0x45   :  { %287 = vmatpush1.bf16.msra.mxu1 %v4861_v8  ;;  %v4871_v16 = vld [vmem:[#allocation9 + $0x34] ss:$8 sps:$4 sm:$0xff]   ;;  %v4873_v17 = vld [vmem:[#allocation9 + $0x30] ss:$8 sps:$4 sm:$0xff]   ;;  %v4874_v18 = vld [vmem:[#allocation9 + $0x24] ss:$8 sps:$4 sm:$0xff]  }
  0x46   :  { %288 = vmatprep.subr.bf16.mxu1 %v4862_v9  ;;  %v4876_v19 = vld [vmem:[#allocation9 + $0x20] ss:$8 sps:$4 sm:$0xff]   ;;  %v4877_v20 = vld [vmem:[#allocation9 + $0x14] ss:$8 sps:$4 sm:$0xff]   ;;  %v4879_v21 = vld [vmem:[#allocation9 + $0x10] ss:$8 sps:$4 sm:$0xff]  }
  0x47   :  { %4835 = vmatpush3.bf16.msra.mxu0 %v4858_v5  ;;  %v4880_v22 = vld [vmem:[#allocation9 + $0x4] ss:$8 sps:$4 sm:$0xff]   ;;  %v4882_v23 = vld [vmem:[#allocation9] ss:$8 sps:$4 sm:$0xff]   ;;  %s94_s6 = sshll.u32 %s5368_s2, 4  ;;  %s5369_s30 = smov [#allocation3]   ;;  %s95_s6 = int_to_ptr.vmem [resolvable:$true] %s94_s6 }
  0x48   :  { %v4359_v25 = vld [vmem:[#allocation12] ss:$0 sm:$0xff]  ;;  %v4885_v34 = vld [vmem:[#allocation10 + $0xe4] ss:$16 sps:$4 sm:$0xff]   ;;  %v4888_v35 = vld [vmem:[#allocation10 + $0xec] ss:$16 sps:$4 sm:$0xff]   ;;  %p5316_p12 = scmp.lt.s32.totalorder %s95_s6, %s95_s6 }
  0x49   :  { %289 = vmatpush1.bf16.msra.mxu1 %v4864_v11  ;;  %v4883_v36 = vld [vmem:[#allocation10 + $0xe0] ss:$16 sps:$4 sm:$0xff]   ;;  %v4886_v37 = vld [vmem:[#allocation10 + $0xe8] ss:$16 sps:$4 sm:$0xff]   ;;  %824 = vmatprep.subr.bf16.mxu0 %v4885_v34  ;;  %v4891_v38 = vld [vmem:[#allocation10 + $0xc4] ss:$16 sps:$4 sm:$0xff]  }
  0x4a   :  { %4837 = vmatmul.mubr.msk.bf16.vlgmr.msra.gmra.mxu0 %vm142_vm1, %v119_v10  ;;  %290 = vmatprep.subr.bf16.mxu1 %v4865_v12  ;;  %v4894_v39 = vld [vmem:[#allocation10 + $0xcc] ss:$16 sps:$4 sm:$0xff]   ;;  %v4889_v40 = vld [vmem:[#allocation10 + $0xc0] ss:$16 sps:$4 sm:$0xff]   ;;  %v4892_v41 = vld [vmem:[#allocation10 + $0xc8] ss:$16 sps:$4 sm:$0xff]  }
  0x4b   :  { %825 = vmatpush1.bf16.msra.mxu0 %v4883_v36  ;;  %v4897_v42 = vld [vmem:[#allocation10 + $0xa4] ss:$16 sps:$4 sm:$0xff]   ;;  %v4900_v43 = vld [vmem:[#allocation10 + $0xac] ss:$16 sps:$4 sm:$0xff]   ;;  %v4895_v44 = vld [vmem:[#allocation10 + $0xa0] ss:$16 sps:$4 sm:$0xff]  }
  0x4c   :  { %826 = vmatprep.subr.bf16.mxu0 %v4891_v38  ;;  %v4898_v45 = vld [vmem:[#allocation10 + $0xa8] ss:$16 sps:$4 sm:$0xff]   ;;  %v4903_v46 = vld [vmem:[#allocation10 + $0x84] ss:$16 sps:$4 sm:$0xff]   ;;  %v4906_v47 = vld [vmem:[#allocation10 + $0x8c] ss:$16 sps:$4 sm:$0xff]  }
  0x4d   :  { %291 = vmatpush1.bf16.msra.mxu1 %v4867_v13  ;;  %v4901_v48 = vld [vmem:[#allocation10 + $0x80] ss:$16 sps:$4 sm:$0xff]   ;;  %v4904_v49 = vld [vmem:[#allocation10 + $0x88] ss:$16 sps:$4 sm:$0xff]   ;;  %v4909_v50 = vld [vmem:[#allocation10 + $0x64] ss:$16 sps:$4 sm:$0xff]  }
  0x4e   :  { %292 = vmatprep.subr.bf16.mxu1 %v4868_v14  ;;  %v4912_v51 = vld [vmem:[#allocation10 + $0x6c] ss:$16 sps:$4 sm:$0xff]   ;;  %v4907_v52 = vld [vmem:[#allocation10 + $0x60] ss:$16 sps:$4 sm:$0xff]   ;;  %v4910_v53 = vld [vmem:[#allocation10 + $0x68] ss:$16 sps:$4 sm:$0xff]  }
  0x4f   :  { %827 = vmatpush1.bf16.msra.mxu0 %v4889_v40  ;;  %v4915_v54 = vld [vmem:[#allocation10 + $0x44] ss:$16 sps:$4 sm:$0xff]   ;;  %v4913_v55 = vld [vmem:[#allocation10 + $0x40] ss:$16 sps:$4 sm:$0xff]   ;;  %v4916_v56 = vld [vmem:[#allocation10 + $0x48] ss:$16 sps:$4 sm:$0xff]  }
  0x50   :  { %828 = vmatprep.subr.bf16.mxu0 %v4897_v42  ;;  %v4918_v57 = vld [vmem:[#allocation10 + $0x4c] ss:$16 sps:$4 sm:$0xff]   ;;  %v4921_v58 = vld [vmem:[#allocation10 + $0x24] ss:$16 sps:$4 sm:$0xff]   ;;  %v4919_v60 = vld [vmem:[#allocation10 + $0x20] ss:$16 sps:$4 sm:$0xff]  }
  0x51   :  { %293 = vmatpush1.bf16.msra.mxu1 %v4870_v15  ;;  %v4924_v59 = vld [vmem:[#allocation10 + $0x2c] ss:$16 sps:$4 sm:$0xff]   ;;  %v4922_v61 = vld [vmem:[#allocation10 + $0x28] ss:$16 sps:$4 sm:$0xff]   ;;  %v4927_v62 = vld [vmem:[#allocation10 + $0x4] ss:$16 sps:$4 sm:$0xff]  }
  0x52   :  { %294 = vmatprep.subr.bf16.mxu1 %v4871_v16  ;;  %v4930_v63 = vld [vmem:[#allocation10 + $0xc] ss:$16 sps:$4 sm:$0xff]   ;;  %v4925_v0 = vld [vmem:[#allocation10] ss:$16 sps:$4 sm:$0xff]   ;;  %v4928_v4 = vld [vmem:[#allocation10 + $0x8] ss:$16 sps:$4 sm:$0xff]  }
  0x53   :  { %829 = vmatpush1.bf16.msra.mxu0 %v4895_v44  ;;  %v4933_v5 = vld [vmem:[#allocation10 + $0x1e4] ss:$16 sps:$4 sm:$0xff]   ;;  %v4936_v6 = vld [vmem:[#allocation10 + $0x1ec] ss:$16 sps:$4 sm:$0xff]   ;;  %v4931_v7 = vld [vmem:[#allocation10 + $0x1e0] ss:$16 sps:$4 sm:$0xff]  }
  0x54   :  { %830 = vmatprep.subr.bf16.mxu0 %v4903_v46  ;;  %v4934_v8 = vld [vmem:[#allocation10 + $0x1e8] ss:$16 sps:$4 sm:$0xff]   ;;  %v4939_v9 = vld [vmem:[#allocation10 + $0x1c4] ss:$16 sps:$4 sm:$0xff]   ;;  %v4942_v10 = vld [vmem:[#allocation10 + $0x1cc] ss:$16 sps:$4 sm:$0xff]  }
  0x55   :  { %295 = vmatpush1.bf16.msra.mxu1 %v4873_v17  ;;  %v4937_v11 = vld [vmem:[#allocation10 + $0x1c0] ss:$16 sps:$4 sm:$0xff]   ;;  %v4940_v12 = vld [vmem:[#allocation10 + $0x1c8] ss:$16 sps:$4 sm:$0xff]   ;;  %v4945_v13 = vld [vmem:[#allocation10 + $0x1a4] ss:$16 sps:$4 sm:$0xff]  }
  0x56   :  { %296 = vmatprep.subr.bf16.mxu1 %v4874_v18  ;;  %v4948_v14 = vld [vmem:[#allocation10 + $0x1ac] ss:$16 sps:$4 sm:$0xff]   ;;  %v4943_v15 = vld [vmem:[#allocation10 + $0x1a0] ss:$16 sps:$4 sm:$0xff]   ;;  %v4946_v16 = vld [vmem:[#allocation10 + $0x1a8] ss:$16 sps:$4 sm:$0xff]  }
  0x57   :  { %831 = vmatpush1.bf16.msra.mxu0 %v4901_v48  ;;  %v4951_v17 = vld [vmem:[#allocation10 + $0x184] ss:$16 sps:$4 sm:$0xff]   ;;  %v4954_v18 = vld [vmem:[#allocation10 + $0x18c] ss:$16 sps:$4 sm:$0xff]   ;;  %v4958_v24 = vld [vmem:[#allocation10 + $0x168] ss:$16 sps:$4 sm:$0xff]  }
  0x58   :  { %832 = vmatprep.subr.bf16.mxu0 %v4909_v50  ;;  %v4973_v34 = vld [vmem:[#allocation10 + $0x100] ss:$16 sps:$4 sm:$0xff]   ;;  %v4976_v36 = vld [vmem:[#allocation10 + $0x108] ss:$16 sps:$4 sm:$0xff]   ;;  %s106_s8 = sshll.u32 %s5369_s30, 4  ;;  %s5311_s9 = scalar_lea.vmem %s95_s6, 32768  ;;  %s107_s8 = int_to_ptr.vmem [resolvable:$true] %s106_s8 }
  0x59   :  { %297 = vmatpush1.bf16.msra.mxu1 %v4876_v19  ;;  %v4949_v19 = vld [vmem:[#allocation10 + $0x180] ss:$16 sps:$4 sm:$0xff]   ;;  %p5312_p11 = scmp.ne.s32.totalorder %s95_s6, %s5311_s9  ;;  %p5317_p13 = scmp.lt.s32.totalorder %s5311_s9, %s5311_s9 }
  0x5a   :  { %298 = vmatprep.subr.bf16.mxu1 %v4877_v20  ;;  %v4952_v20 = vld [vmem:[#allocation10 + $0x188] ss:$16 sps:$4 sm:$0xff]  }
  0x5b   :  { %833 = vmatpush1.bf16.msra.mxu0 %v4907_v52  ;;  %p5318_p0 = por %p5317_p13, %p5316_p12 }
  0x5c   :  { %834 = vmatprep.subr.bf16.mxu0 %v4915_v54 }
  0x5d   :  { %299 = vmatpush1.bf16.msra.mxu1 %v4879_v21  ;;  %v4957_v21 = vld [vmem:[#allocation10 + $0x164] ss:$16 sps:$4 sm:$0xff]   ;;  %p5319_p1 = pnand %p5318_p0, %p5312_p11 }
  0x5e   :  { %300 = vmatprep.subr.bf16.mxu1 %v4880_v22  ;;  %v4960_v22 = vld [vmem:[#allocation10 + $0x16c] ss:$16 sps:$4 sm:$0xff]  }
  0x5f   :  { %835 = vmatpush1.bf16.msra.mxu0 %v4913_v55 }
  0x60   :  { %836 = vmatprep.subr.bf16.mxu0 %v4921_v58 }
  0x61   :  { %301 = vmatpush1.bf16.msra.mxu1 %v4882_v23  ;;  %v4955_v23 = vld [vmem:[#allocation10 + $0x160] ss:$16 sps:$4 sm:$0xff]  }
  0x62   :  { %865 = vmatprep.subr.bf16.mxu1 %v4888_v35  ;;  %v4978_v35 = vld [vmem:[#allocation10 + $0x10c] ss:$16 sps:$4 sm:$0xff]  }
  0x63   :  { %837 = vmatpush1.bf16.msra.mxu0 %v4919_v60 }
  0x64   :  { %838 = vmatprep.subr.bf16.mxu0 %v4927_v62 }
  0x67   :  { %839 = vmatpush1.bf16.msra.mxu0 %v4925_v0 }
  0x68   :  { %840 = vmatprep.subr.bf16.mxu0 %v4933_v5 }
  0x6b   :  { %841 = vmatpush2.bf16.msra.mxu0 %v4931_v7 }
  0x6c   :  { %842 = vmatprep.subr.bf16.mxu0 %v4939_v9 }
  0x6f   :  { %843 = vmatpush2.bf16.msra.mxu0 %v4937_v11 }
  0x70   :  { %844 = vmatprep.subr.bf16.mxu0 %v4945_v13 }
  0x73   :  { %845 = vmatpush2.bf16.msra.mxu0 %v4943_v15 }
  0x74   :  { %846 = vmatprep.subr.bf16.mxu0 %v4951_v17 }
  0x77   :  { %847 = vmatpush2.bf16.msra.mxu0 %v4949_v19 }
  0x78   :  { %848 = vmatprep.subr.bf16.mxu0 %v4957_v21 }
  0x7b   :  { %849 = vmatpush2.bf16.msra.mxu0 %v4955_v23 }
 0x10a   :  { %v180_v26 = vpop.f32.mrf.mxu0 }
 0x10b   :  { %v181_v27 = vadd.f32 %v4359_v25, %v180_v26  ;;  %v4963_v25 = vld [vmem:[#allocation10 + $0x144] ss:$16 sps:$4 sm:$0xff]   ;;  %v4966_v26 = vld [vmem:[#allocation10 + $0x14c] ss:$16 sps:$4 sm:$0xff]  }
 0x10c   :  { %v4838_v28 = vpop.f32.mrf.mxu0  ;;  %850 = vmatprep.subr.bf16.mxu0 %v4963_v25 }
 0x10d   :  { %vm186_vm2 = vcmp.gt.f32.partialorder %v181_v27, 0.0  ;;  %v187_v29 = vmul.f32 0.2, %v181_v27  ;;  %v4964_v28 = vld [vmem:[#allocation10 + $0x148] ss:$16 sps:$4 sm:$0xff]  }
 0x10e   :  { %v183_v30 = vpop.f32.mrf.mxu0 }
 0x10f   :  { %v188_v31 = vsel %vm186_vm2, %v181_v27, %v187_v29  ;;  %v4961_v27 = vld [vmem:[#allocation10 + $0x140] ss:$16 sps:$4 sm:$0xff]   ;;  %v4969_v29 = vld [vmem:[#allocation10 + $0x124] ss:$16 sps:$4 sm:$0xff]   ;;  %v4972_v30 = vld [vmem:[#allocation10 + $0x12c] ss:$16 sps:$4 sm:$0xff]  }
 0x110   :  { %v4839_v32 = vpop.f32.mrf.mxu0  ;;  %v189_v33 = vpack.c.bf16 %v188_v31, %v188_v31  ;;  %851 = vmatpush2.bf16.msra.mxu0 %v4961_v27  ;;  %v4967_v31 = vld [vmem:[#allocation10 + $0x120] ss:$16 sps:$4 sm:$0xff]  }
 0x111   :  { %v4970_v32 = vld [vmem:[#allocation10 + $0x128] ss:$16 sps:$4 sm:$0xff]   ;;  %852 = vmatprep.subr.bf16.mxu0 %v4969_v29 }
 0x112   :  { %319 = vmatmul.mubr.bf16.vlgmr.msra.gmra.mxu1 %v189_v33  ;;  %v4975_v33 = vld [vmem:[#allocation10 + $0x104] ss:$16 sps:$4 sm:$0xff]  }
 0x113   :  { %866 = vmatpush1.bf16.msra.mxu1 %v4886_v37 }
 0x114   :  { %867 = vmatprep.subr.bf16.mxu1 %v4894_v39  ;;  %853 = vmatpush2.bf16.msra.mxu0 %v4967_v31 }
 0x115   :  { %854 = vmatprep.subr.bf16.mxu0 %v4975_v33 }
 0x117   :  { %868 = vmatpush1.bf16.msra.mxu1 %v4892_v41 }
 0x118   :  { %869 = vmatprep.subr.bf16.mxu1 %v4900_v43  ;;  %855 = vmatpush2.bf16.msra.mxu0 %v4973_v34 }
 0x11b   :  { %870 = vmatpush1.bf16.msra.mxu1 %v4898_v45 }
 0x11c   :  { %871 = vmatprep.subr.bf16.mxu1 %v4906_v47 }
 0x11f   :  { %872 = vmatpush1.bf16.msra.mxu1 %v4904_v49 }
 0x120   :  { %873 = vmatprep.subr.bf16.mxu1 %v4912_v51 }
 0x123   :  { %874 = vmatpush1.bf16.msra.mxu1 %v4910_v53 }
 0x124   :  { %875 = vmatprep.subr.bf16.mxu1 %v4918_v57 }
 0x127   :  { %876 = vmatpush1.bf16.msra.mxu1 %v4916_v56 }
 0x128   :  { %877 = vmatprep.subr.bf16.mxu1 %v4924_v59 }
 0x12b   :  { %878 = vmatpush1.bf16.msra.mxu1 %v4922_v61 }
 0x12c   :  { %879 = vmatprep.subr.bf16.mxu1 %v4930_v63 }
 0x12f   :  { %880 = vmatpush1.bf16.msra.mxu1 %v4928_v4 }
 0x130   :  { %881 = vmatprep.subr.bf16.mxu1 %v4936_v6 }
 0x133   :  { %882 = vmatpush2.bf16.msra.mxu1 %v4934_v8 }
 0x134   :  { %883 = vmatprep.subr.bf16.mxu1 %v4942_v10 }
 0x137   :  { %884 = vmatpush2.bf16.msra.mxu1 %v4940_v12 }
 0x138   :  { %885 = vmatprep.subr.bf16.mxu1 %v4948_v14 }
 0x13b   :  { %886 = vmatpush2.bf16.msra.mxu1 %v4946_v16  ;;  %v5367_v16 = vmov 1966171168  }
 0x13c   :  { %887 = vmatprep.subr.bf16.mxu1 %v4954_v18  ;;  %v370_v17 = vunpack.c.l.s4 %v5367_v16  ;;  %v372_v18 = vlaneseq }
 0x13e   :  { %v371_v19 = vunpack.c.0.s8 %v370_v17 }
 0x13f   :  { %888 = vmatpush2.bf16.msra.mxu1 %v4952_v20  ;;  %v5441_v20 = vshrl.u32 %v372_v18, 7 }
 0x140   :  { %889 = vmatprep.subr.bf16.mxu1 %v4960_v22 }
 0x141   :  { %v5444_v22 = vsub.s32 %v371_v19, %v5441_v20  ;;  %v5452_v29 = vsub.s32 1, %v5441_v20 }
 0x143   :  { %890 = vmatpush2.bf16.msra.mxu1 %v4958_v24 }
 0x144   :  { %891 = vmatprep.subr.bf16.mxu1 %v4966_v26  ;;  %v111_v26 = vld [vmem:[#allocation12 + $0x1] sm:$0x3] }
 0x147   :  { %892 = vmatpush2.bf16.msra.mxu1 %v4964_v28  ;;  %v5449_v28 = vsub.s32 0, %v5441_v20 }
 0x148   :  { %893 = vmatprep.subr.bf16.mxu1 %v4972_v30 }
 0x14b   :  { %894 = vmatpush2.bf16.msra.mxu1 %v4970_v32 }
 0x14c   :  { %895 = vmatprep.subr.bf16.mxu1 %v4978_v35 }
 0x14f   :  { %896 = vmatpush2.bf16.msra.mxu1 %v4976_v36 }
 0x1d2   :  { %v5431_v37 = vpop.f32.mrf.mxu1 }
 0x1d3   :  { %v327_v38 = vrot.slane %v5431_v37, 4 }
 0x1d4   :  { %v5434_v39 = vpop.f32.mrf.mxu1 }
 0x1d5   :  { %v328_v40 = vadd.f32 %v327_v38, %v5431_v37  ;;  %v333_v41 = vrot.slane %v5434_v39, 4  ;;  %v112_v38 = vld [vmem:[#allocation12 + $0x3] sm:$0x3] }
 0x1d6   :  { %v324_v42 = vpop.f32.mrf.mxu1 }
 0x1d7   :  { %v329_v43 = vrot.slane %v328_v40, 2  ;;  %v334_v44 = vadd.f32 %v333_v41, %v5434_v39 }
 0x1d8   :  { %v325_v45 = vpop.f32.mrf.mxu1 }
 0x1d9   :  { %v330_v46 = vadd.f32 %v329_v43, %v328_v40  ;;  %v335_v47 = vrot.slane %v334_v44, 2 }
 0x1db   :  { %v331_v48 = vrot.slane %v330_v46, 1  ;;  %v336_v49 = vadd.f32 %v335_v47, %v334_v44 }
 0x1dd   :  { %v332_v50 = vadd.f32 %v331_v48, %v330_v46  ;;  %v337_v51 = vrot.slane %v336_v49, 1 }
 0x1df   :  { %v340_v52 = vmul.f32 0.125, %v332_v50  ;;  %v338_v53 = vadd.f32 %v337_v51, %v336_v49 }
 0x1e1   :  { %v342_v54 = vsub.f32 %v5431_v37, %v340_v52  ;;  %v341_v55 = vmul.f32 0.125, %v338_v53 }
 0x1e3   :  { %v344_v56 = vmul.f32 %v342_v54, %v342_v54  ;;  %v343_v57 = vsub.f32 %v5434_v39, %v341_v55 }
 0x1e5   :  { %v346_v58 = vrot.slane %v344_v56, 4  ;;  %v345_v59 = vmul.f32 %v343_v57, %v343_v57 }
 0x1e7   :  { %v347_v60 = vadd.f32 %v346_v58, %v344_v56  ;;  %v352_v61 = vrot.slane %v345_v59, 4 }
 0x1e9   :  { %v348_v62 = vrot.slane %v347_v60, 2  ;;  %v353_v63 = vadd.f32 %v352_v61, %v345_v59 }
 0x1eb   :  { %v349_v0 = vadd.f32 %v348_v62, %v347_v60  ;;  %v354_v4 = vrot.slane %v353_v63, 2 }
 0x1ed   :  { %v350_v5 = vrot.slane %v349_v0, 1  ;;  %v355_v6 = vadd.f32 %v354_v4, %v353_v63 }
 0x1ef   :  { %v351_v7 = vadd.f32 %v350_v5, %v349_v0  ;;  %v356_v8 = vrot.slane %v355_v6, 1 }
 0x1f1   :  { %v358_v9 = vmul.f32 0.125, %v351_v7  ;;  %v357_v10 = vadd.f32 %v356_v8, %v355_v6 }
 0x1f3   :  { %v360_v11 = vmax.f32 %v358_v9, 0.0  ;;  %v359_v12 = vmul.f32 0.125, %v357_v10 }
 0x1f5   :  { %v362_v13 = vadd.f32 0.8, %v360_v11  ;;  %v361_v14 = vmax.f32 %v359_v12, 0.0 }
 0x1f7   :  { %v363_v15 = vadd.f32 0.8, %v361_v14  ;;  %4979 = vrsqrt.f32 %v362_v13 }
 0x1f9   :  { %4981 = vrsqrt.f32 %v363_v15 }
 0x204   :  { %v4980_v21 = vpop.eup %4979 }
 0x206   :  { %v4982_v23 = vpop.eup %4981 }
 0x207   :  { %v368_v24 = vcombine.low %v4980_v21, %v4982_v23 }
 0x209   :  { %v375_v25 = vrot.slane %v368_v24, %v5444_v22 }
 0x20b   :  { %v382_v27 = vrot.slane %v375_v25, %v5444_v22 }
 0x20d   :  { %v384_v30 = vmul.f32 %v382_v27, %v111_v26 }
 0x20f   :  { %v389_v31 = vrot.slane %v384_v30, %v5449_v28  ;;  %v393_v32 = vrot.slane %v384_v30, %v5452_v29 }
 0x211   :  { %v396_v33 = vmul.f32 %v389_v31, %v340_v52  ;;  %v397_v34 = vmul.f32 %v393_v32, %v341_v55  ;;  %v417_v42 = vmul.f32 %v389_v31, %v5431_v37  ;;  %v418_v43 = vmul.f32 %v393_v32, %v5434_v39 }
 0x213   :  { %v400_v35 = vcombine.low %v396_v33, %v397_v34 }
 0x215   :  { %v407_v36 = vrot.slane %v400_v35, %v5444_v22 }
 0x217   :  { %v414_v40 = vrot.slane %v407_v36, %v5444_v22 }
 0x219   :  { %v416_v41 = vsub.f32 %v112_v38, %v414_v40 }
 0x21b   :  { %v423_v44 = vrot.slane %v416_v41, %v5449_v28  ;;  %v427_v45 = vrot.slane %v416_v41, %v5452_v29 }
 0x21d   :  { %v431_v46 = vadd.f32 %v427_v45, %v418_v43  ;;  %v430_v47 = vadd.f32 %v423_v44, %v417_v42 }
 0x21f   :  { %vm433_vm3 = vcmp.gt.f32.partialorder %v431_v46, 0.0  ;;  %v435_v48 = vmul.f32 0.2, %v431_v46  ;;  %vm432_vm4 = vcmp.gt.f32.partialorder %v430_v47, 0.0  ;;  %v434_v49 = vmul.f32 0.2, %v430_v47 }
 0x221   :  { %v437_v50 = vsel %vm433_vm3, %v431_v46, %v435_v48  ;;  %v436_v51 = vsel %vm432_vm4, %v430_v47, %v434_v49 }
 0x222   :  { %v439_v52 = vpack.c.bf16 %v437_v50, %v437_v50  ;;  %v438_v53 = vpack.c.bf16 %v436_v51, %v436_v51 }
 0x224   :  { %856 = vmatprep.mubr.bf16.mxu0 %v439_v52  ;;  %897 = vmatprep.mubr.bf16.mxu1 %v439_v52 }
 0x225   :  { %857 = vmatmul.mubr.bf16.vlgmr.msra.gmra.mxu0 %v438_v53  ;;  %898 = vmatmul.mubr.bf16.vlgmr.msra.gmra.mxu1 %v438_v53 }
 0x226   :  { %5322 = shalt.err (!%p5319_p1)  }
 0x227   :  { %97 = dma.hbm_to_vmem [thread:$0]  %s5712_s4, 32768, %s95_s6, [#allocation4] }
 0x228   :  { %s5331_s12 = scalar_lea.vmem %s107_s8, 16384  ;;  %p5336_p3 = scmp.lt.s32.totalorder %s107_s8, %s107_s8 }
 0x229   :  { %p5332_p2 = scmp.ne.s32.totalorder %s107_s8, %s5331_s12  ;;  %p5337_p4 = scmp.lt.s32.totalorder %s5331_s12, %s5331_s12 }
 0x22b   :  { %p5338_p5 = por %p5337_p4, %p5336_p3 }
 0x22d   :  { %p5339_p6 = pnand %p5338_p5, %p5332_p2 }
 0x22f   :  { %5342 = shalt.err (!%p5339_p6)  }
 0x230   :  { %109 = dma.hbm_to_vmem [thread:$0]  %s5713_s5, 16384, %s107_s8, [#allocation4 + $0x1] }
 0x2e5   :  { %v5468_v37 = vpop.f32.mrf.mxu0  ;;  %v5470_v39 = vpop.f32.mrf.mxu1 }
 0x2e6   :  { %v906_v54 = vrot.slane %v5468_v37, 4  ;;  %v918_v55 = vrot.slane %v5470_v39, 4 }
 0x2e7   :  { %v5474_v56 = vpop.f32.mrf.mxu0  ;;  %v5476_v57 = vpop.f32.mrf.mxu1 }
 0x2e8   :  { %v907_v58 = vadd.f32 %v906_v54, %v5468_v37  ;;  %v919_v59 = vadd.f32 %v918_v55, %v5470_v39  ;;  %v912_v60 = vrot.slane %v5474_v56, 4  ;;  %v924_v61 = vrot.slane %v5476_v57, 4 }
 0x2e9   :  { %v862_v62 = vpop.f32.mrf.mxu0  ;;  %v903_v63 = vpop.f32.mrf.mxu1 }
 0x2ea   :  { %v908_v0 = vrot.slane %v907_v58, 2  ;;  %v920_v4 = vrot.slane %v919_v59, 2  ;;  %v913_v5 = vadd.f32 %v912_v60, %v5474_v56  ;;  %v925_v6 = vadd.f32 %v924_v61, %v5476_v57 }
 0x2eb   :  { %v863_v7 = vpop.f32.mrf.mxu0  ;;  %v904_v8 = vpop.f32.mrf.mxu1 }
 0x2ec   :  { %v909_v9 = vadd.f32 %v908_v0, %v907_v58  ;;  %v921_v10 = vadd.f32 %v920_v4, %v919_v59  ;;  %v914_v11 = vrot.slane %v913_v5, 2  ;;  %v926_v12 = vrot.slane %v925_v6, 2 }
 0x2ee   :  { %v910_v13 = vrot.slane %v909_v9, 1  ;;  %v922_v14 = vrot.slane %v921_v10, 1  ;;  %v915_v15 = vadd.f32 %v914_v11, %v913_v5  ;;  %v927_v16 = vadd.f32 %v926_v12, %v925_v6 }
 0x2f0   :  { %v911_v17 = vadd.f32 %v910_v13, %v909_v9  ;;  %v923_v18 = vadd.f32 %v922_v14, %v921_v10  ;;  %v916_v19 = vrot.slane %v915_v15, 1  ;;  %v928_v21 = vrot.slane %v927_v16, 1 }
 0x2f2   :  { %v5484_v23 = vmul.f32 0.125, %v911_v17  ;;  %v5486_v24 = vmul.f32 0.125, %v923_v18  ;;  %v917_v25 = vadd.f32 %v916_v19, %v915_v15  ;;  %v929_v26 = vadd.f32 %v928_v21, %v927_v16 }
 0x2f4   :  { %v934_v27 = vsub.f32 %v5468_v37, %v5484_v23  ;;  %v936_v30 = vsub.f32 %v5470_v39, %v5486_v24  ;;  %v5492_v31 = vmul.f32 0.125, %v917_v25  ;;  %v5494_v32 = vmul.f32 0.125, %v929_v26 }
 0x2f6   :  { %v938_v33 = vmul.f32 %v934_v27, %v934_v27  ;;  %v940_v34 = vmul.f32 %v936_v30, %v936_v30  ;;  %v935_v35 = vsub.f32 %v5474_v56, %v5492_v31  ;;  %v937_v36 = vsub.f32 %v5476_v57, %v5494_v32 }
 0x2f8   :  { %v942_v38 = vrot.slane %v938_v33, 4  ;;  %v954_v40 = vrot.slane %v940_v34, 4  ;;  %v939_v41 = vmul.f32 %v935_v35, %v935_v35  ;;  %v941_v42 = vmul.f32 %v937_v36, %v937_v36  ;;  %v113_v35 = vld [vmem:[#allocation12 + $0x5] sm:$0xf] }
 0x2fa   :  { %v943_v43 = vadd.f32 %v942_v38, %v938_v33  ;;  %v955_v44 = vadd.f32 %v954_v40, %v940_v34  ;;  %v948_v45 = vrot.slane %v939_v41, 4  ;;  %v960_v46 = vrot.slane %v941_v42, 4 }
 0x2fb   :  { %v5504_v38 = vsub.s32 2, %v5441_v20  ;;  %v5507_v40 = vsub.s32 3, %v5441_v20 }
 0x2fc   :  { %v944_v47 = vrot.slane %v943_v43, 2  ;;  %v956_v48 = vrot.slane %v955_v44, 2  ;;  %v949_v49 = vadd.f32 %v948_v45, %v939_v41  ;;  %v961_v50 = vadd.f32 %v960_v46, %v941_v42 }
 0x2fe   :  { %v945_v51 = vadd.f32 %v944_v47, %v943_v43  ;;  %v957_v52 = vadd.f32 %v956_v48, %v955_v44  ;;  %v950_v53 = vrot.slane %v949_v49, 2  ;;  %v962_v54 = vrot.slane %v961_v50, 2 }
 0x300   :  { %v946_v55 = vrot.slane %v945_v51, 1  ;;  %v958_v58 = vrot.slane %v957_v52, 1  ;;  %v951_v59 = vadd.f32 %v950_v53, %v949_v49  ;;  %v963_v60 = vadd.f32 %v962_v54, %v961_v50 }
 0x302   :  { %v947_v61 = vadd.f32 %v946_v55, %v945_v51  ;;  %v959_v62 = vadd.f32 %v958_v58, %v957_v52  ;;  %v952_v63 = vrot.slane %v951_v59, 1  ;;  %v964_v0 = vrot.slane %v963_v60, 1  ;;  %v114_v55 = vld [vmem:[#allocation12 + $0x9] sm:$0xf] }
 0x304   :  { %v966_v4 = vmul.f32 0.125, %v947_v61  ;;  %v968_v5 = vmul.f32 0.125, %v959_v62  ;;  %v953_v6 = vadd.f32 %v952_v63, %v951_v59  ;;  %v965_v7 = vadd.f32 %v964_v0, %v963_v60 }
 0x306   :  { %v970_v8 = vmax.f32 %v966_v4, 0.0  ;;  %v972_v9 = vmax.f32 %v968_v5, 0.0  ;;  %v967_v10 = vmul.f32 0.125, %v953_v6  ;;  %v969_v11 = vmul.f32 0.125, %v965_v7 }
 0x308   :  { %v974_v12 = vadd.f32 0.8, %v970_v8  ;;  %v976_v13 = vadd.f32 0.8, %v972_v9  ;;  %v971_v14 = vmax.f32 %v967_v10, 0.0  ;;  %v973_v15 = vmax.f32 %v969_v11, 0.0 }
 0x30a   :  { %4983 = vrsqrt.f32 %v974_v12  ;;  %v975_v16 = vadd.f32 0.8, %v971_v14  ;;  %v977_v17 = vadd.f32 0.8, %v973_v15 }
 0x30b   :  { %4985 = vrsqrt.f32 %v976_v13 }
 0x30c   :  { %4987 = vrsqrt.f32 %v975_v16 }
 0x30d   :  { %4989 = vrsqrt.f32 %v977_v17 }
 0x317   :  { %v4984_v18 = vpop.eup %4983 }
 0x318   :  { %v4986_v19 = vpop.eup %4985 }
 0x319   :  { %v4988_v21 = vpop.eup %4987 }
 0x31a   :  { %v4990_v25 = vpop.eup %4989  ;;  %v986_v26 = vcombine.low %v4984_v18, %v4988_v21 }
 0x31b   :  { %v987_v27 = vcombine.low %v4986_v19, %v4990_v25 }
 0x31c   :  { %v994_v30 = vrot.slane %v986_v26, %v5444_v22 }
 0x31d   :  { %v1001_v33 = vrot.slane %v987_v27, %v5444_v22 }
 0x31f   :  { %v1002_v34 = vcombine.low %v994_v30, %v1001_v33 }
 0x321   :  { %v1009_v36 = vrot.slane %v1002_v34, %v5444_v22 }
 0x323   :  { %v1011_v41 = vmul.f32 %v1009_v36, %v113_v35 }
 0x325   :  { %v1016_v42 = vrot.slane %v1011_v41, %v5449_v28  ;;  %v1020_v43 = vrot.slane %v1011_v41, %v5452_v29  ;;  %v1024_v44 = vrot.slane %v1011_v41, %v5504_v38  ;;  %v1028_v45 = vrot.slane %v1011_v41, %v5507_v40 }
 0x327   :  { %v1033_v46 = vmul.f32 %v1016_v42, %v5484_v23  ;;  %v1034_v47 = vmul.f32 %v1020_v43, %v5492_v31  ;;  %v1035_v48 = vmul.f32 %v1024_v44, %v5486_v24  ;;  %v1036_v49 = vmul.f32 %v1028_v45, %v5494_v32 }
 0x328   :  { %v1067_v60 = vmul.f32 %v1016_v42, %v5468_v37  ;;  %v1068_v23 = vmul.f32 %v1020_v43, %v5474_v56  ;;  %v1069_v31 = vmul.f32 %v1024_v44, %v5470_v39  ;;  %v1070_v24 = vmul.f32 %v1028_v45, %v5476_v57 }
 0x329   :  { %v1041_v50 = vcombine.low %v1033_v46, %v1034_v47  ;;  %v1042_v51 = vcombine.low %v1035_v48, %v1036_v49 }
 0x32b   :  { %v1049_v52 = vrot.slane %v1041_v50, %v5444_v22  ;;  %v1056_v53 = vrot.slane %v1042_v51, %v5444_v22 }
 0x32d   :  { %v1057_v54 = vcombine.low %v1049_v52, %v1056_v53 }
 0x32f   :  { %v1064_v58 = vrot.slane %v1057_v54, %v5444_v22 }
 0x331   :  { %v1066_v59 = vsub.f32 %v114_v55, %v1064_v58 }
 0x333   :  { %v1075_v32 = vrot.slane %v1066_v59, %v5449_v28  ;;  %v1079_v61 = vrot.slane %v1066_v59, %v5452_v29  ;;  %v1083_v62 = vrot.slane %v1066_v59, %v5504_v38  ;;  %v1087_v63 = vrot.slane %v1066_v59, %v5507_v40 }
 0x335   :  { %v1092_v0 = vadd.f32 %v1075_v32, %v1067_v60  ;;  %v1093_v4 = vadd.f32 %v1079_v61, %v1068_v23  ;;  %v1094_v5 = vadd.f32 %v1083_v62, %v1069_v31  ;;  %v1095_v6 = vadd.f32 %v1087_v63, %v1070_v24 }
 0x337   :  { %vm1096_vm5 = vcmp.gt.f32.partialorder %v1092_v0, 0.0  ;;  %vm1097_vm6 = vcmp.gt.f32.partialorder %v1093_v4, 0.0  ;;  %vm1098_vm7 = vcmp.gt.f32.partialorder %v1094_v5, 0.0  ;;  %vm1099_vm8 = vcmp.gt.f32.partialorder %v1095_v6, 0.0 }
 0x338   :  { %v1100_v37 = vmul.f32 0.2, %v1092_v0  ;;  %v1101_v39 = vmul.f32 0.2, %v1093_v4  ;;  %v1102_v56 = vmul.f32 0.2, %v1094_v5 }
 0x339   :  { %v1103_v57 = vmul.f32 0.2, %v1095_v6 }
 0x33a   :  { %v5528_v7 = vsel %vm1096_vm5, %v1092_v0, %v1100_v37  ;;  %v1105_v8 = vsel %vm1097_vm6, %v1093_v4, %v1101_v39  ;;  %v5530_v9 = vsel %vm1098_vm7, %v1094_v5, %v1102_v56 }
 0x33b   :  { %v1107_v10 = vsel %vm1099_vm8, %v1095_v6, %v1103_v57 }
 0x33c   :  { %5349 = dma.done.wait [#allocation4], 32768 }
 0x33d   :  { %5350 = vsyncadd [#allocation4], 4294934528  ;;  %v5532_v11 = vpack.c.bf16 %v1105_v8, %v1105_v8  ;;  %v5534_v12 = vpack.c.bf16 %v1107_v10, %v1107_v10  ;;  %v1172_v13 = vld [vmem:[#allocation2 + $0x1c0] sm:$0xff] }
 0x33e   :  { %v1176_v14 = vld [vmem:[#allocation2 + $0x1e0] sm:$0xff] }
 0x33f   :  { %2684 = vmatprep.mubr.bf16.mxu0 %v5532_v11  ;;  %2725 = vmatprep.mubr.bf16.mxu1 %v5534_v12  ;;  %v1300_v15 = vld [vmem:[#allocation2 + $0x5c0] sm:$0xff]  ;;  %v4500_v16 = vcombine.high %v1172_v13, %v1176_v14  ;;  %v4499_v18 = vcombine.low %v1172_v13, %v1176_v14 }
 0x340   :  { %v1304_v17 = vld [vmem:[#allocation2 + $0x5e0] sm:$0xff] }
 0x341   :  { %v1164_v19 = vld [vmem:[#allocation2 + $0x180] sm:$0xff]  ;;  %v4628_v25 = vcombine.high %v1300_v15, %v1304_v17  ;;  %v4627_v26 = vcombine.low %v1300_v15, %v1304_v17  ;;  %2652 = vmatprep.subr.bf16.mxu0 %v4500_v16 }
 0x342   :  { %v1168_v21 = vld [vmem:[#allocation2 + $0x1a0] sm:$0xff]  ;;  %2653 = vmatpush1.bf16.msra.mxu0 %v4499_v18 }
 0x343   :  { %v4492_v27 = vcombine.high %v1164_v19, %v1168_v21  ;;  %v1292_v30 = vld [vmem:[#allocation2 + $0x580] sm:$0xff]  ;;  %2693 = vmatprep.subr.bf16.mxu1 %v4628_v25  ;;  %v4491_v43 = vcombine.low %v1164_v19, %v1168_v21 }
 0x344   :  { %v1296_v33 = vld [vmem:[#allocation2 + $0x5a0] sm:$0xff]  ;;  %2694 = vmatpush1.bf16.msra.mxu1 %v4627_v26 }
 0x345   :  { %v1156_v34 = vld [vmem:[#allocation2 + $0x140] sm:$0xff]  ;;  %v4620_v35 = vcombine.high %v1292_v30, %v1296_v33  ;;  %2654 = vmatprep.subr.bf16.mxu0 %v4492_v27  ;;  %v4619_v44 = vcombine.low %v1292_v30, %v1296_v33 }
 0x346   :  { %v1160_v36 = vld [vmem:[#allocation2 + $0x160] sm:$0xff]  ;;  %2655 = vmatpush1.bf16.msra.mxu0 %v4491_v43 }
 0x347   :  { %v1284_v41 = vld [vmem:[#allocation2 + $0x540] sm:$0xff]  ;;  %v4484_v45 = vcombine.high %v1156_v34, %v1160_v36  ;;  %2695 = vmatprep.subr.bf16.mxu1 %v4620_v35  ;;  %v4483_v51 = vcombine.low %v1156_v34, %v1160_v36 }
 0x348   :  { %v1288_v42 = vld [vmem:[#allocation2 + $0x560] sm:$0xff]  ;;  %2696 = vmatpush1.bf16.msra.mxu1 %v4619_v44 }
 0x349   :  { %v4612_v46 = vcombine.high %v1284_v41, %v1288_v42  ;;  %v1148_v47 = vld [vmem:[#allocation2 + $0x100] sm:$0xff]  ;;  %2656 = vmatprep.subr.bf16.mxu0 %v4484_v45  ;;  %v4611_v52 = vcombine.low %v1284_v41, %v1288_v42 }
 0x34a   :  { %v1152_v48 = vld [vmem:[#allocation2 + $0x120] sm:$0xff]  ;;  %2657 = vmatpush1.bf16.msra.mxu0 %v4483_v51 }
 0x34b   :  { %v1276_v49 = vld [vmem:[#allocation2 + $0x500] sm:$0xff]  ;;  %v4476_v53 = vcombine.high %v1148_v47, %v1152_v48  ;;  %2697 = vmatprep.subr.bf16.mxu1 %v4612_v46  ;;  %v4475_v23 = vcombine.low %v1148_v47, %v1152_v48 }
 0x34c   :  { %v1280_v50 = vld [vmem:[#allocation2 + $0x520] sm:$0xff]  ;;  %2698 = vmatpush1.bf16.msra.mxu1 %v4611_v52 }
 0x34d   :  { %v4604_v54 = vcombine.high %v1276_v49, %v1280_v50  ;;  %v1140_v55 = vld [vmem:[#allocation2 + $0xc0] sm:$0xff]  ;;  %2658 = vmatprep.subr.bf16.mxu0 %v4476_v53  ;;  %v4603_v31 = vcombine.low %v1276_v49, %v1280_v50 }
 0x34e   :  { %v1144_v58 = vld [vmem:[#allocation2 + $0xe0] sm:$0xff]  ;;  %2659 = vmatpush1.bf16.msra.mxu0 %v4475_v23 }
 0x34f   :  { %v1268_v59 = vld [vmem:[#allocation2 + $0x4c0] sm:$0xff]  ;;  %v4468_v24 = vcombine.high %v1140_v55, %v1144_v58  ;;  %2699 = vmatprep.subr.bf16.mxu1 %v4604_v54  ;;  %v4467_v4 = vcombine.low %v1140_v55, %v1144_v58 }
 0x350   :  { %v1272_v60 = vld [vmem:[#allocation2 + $0x4e0] sm:$0xff]  ;;  %2700 = vmatpush1.bf16.msra.mxu1 %v4603_v31 }
 0x351   :  { %v4596_v32 = vcombine.high %v1268_v59, %v1272_v60  ;;  %v1132_v61 = vld [vmem:[#allocation2 + $0x80] sm:$0xff]  ;;  %2660 = vmatprep.subr.bf16.mxu0 %v4468_v24  ;;  %v4595_v5 = vcombine.low %v1268_v59, %v1272_v60 }
 0x352   :  { %v1136_v62 = vld [vmem:[#allocation2 + $0xa0] sm:$0xff]  ;;  %2661 = vmatpush1.bf16.msra.mxu0 %v4467_v4 }
 0x353   :  { %v1260_v63 = vld [vmem:[#allocation2 + $0x480] sm:$0xff]  ;;  %v4460_v6 = vcombine.high %v1132_v61, %v1136_v62  ;;  %2701 = vmatprep.subr.bf16.mxu1 %v4596_v32  ;;  %v4459_v10 = vcombine.low %v1132_v61, %v1136_v62 }
 0x354   :  { %v1264_v0 = vld [vmem:[#allocation2 + $0x4a0] sm:$0xff]  ;;  %2702 = vmatpush1.bf16.msra.mxu1 %v4595_v5 }
 0x355   :  { %v4588_v37 = vcombine.high %v1260_v63, %v1264_v0  ;;  %v1124_v39 = vld [vmem:[#allocation2 + $0x40] sm:$0xff]  ;;  %2662 = vmatprep.subr.bf16.mxu0 %v4460_v6  ;;  %v4587_v13 = vcombine.low %v1260_v63, %v1264_v0 }
 0x356   :  { %v1128_v56 = vld [vmem:[#allocation2 + $0x60] sm:$0xff]  ;;  %2663 = vmatpush1.bf16.msra.mxu0 %v4459_v10 }
 0x357   :  { %v1252_v57 = vld [vmem:[#allocation2 + $0x440] sm:$0xff]  ;;  %v4452_v14 = vcombine.high %v1124_v39, %v1128_v56  ;;  %2703 = vmatprep.subr.bf16.mxu1 %v4588_v37  ;;  %v4451_v21 = vcombine.low %v1124_v39, %v1128_v56 }
 0x358   :  { %v1256_v8 = vld [vmem:[#allocation2 + $0x460] sm:$0xff]  ;;  %2704 = vmatpush1.bf16.msra.mxu1 %v4587_v13 }
 0x359   :  { %v4580_v15 = vcombine.high %v1252_v57, %v1256_v8  ;;  %v1116_v16 = vld [vmem:[#allocation2] sm:$0xff]  ;;  %2664 = vmatprep.subr.bf16.mxu0 %v4452_v14  ;;  %v4579_v25 = vcombine.low %v1252_v57, %v1256_v8 }
 0x35a   :  { %v1120_v17 = vld [vmem:[#allocation2 + $0x20] sm:$0xff]  ;;  %2665 = vmatpush1.bf16.msra.mxu0 %v4451_v21 }
 0x35b   :  { %v1244_v18 = vld [vmem:[#allocation2 + $0x400] sm:$0xff]  ;;  %v4444_v26 = vcombine.high %v1116_v16, %v1120_v17  ;;  %2705 = vmatprep.subr.bf16.mxu1 %v4580_v15  ;;  %v4443_v36 = vcombine.low %v1116_v16, %v1120_v17 }
 0x35c   :  { %v1248_v19 = vld [vmem:[#allocation2 + $0x420] sm:$0xff]  ;;  %2706 = vmatpush1.bf16.msra.mxu1 %v4579_v25 }
 0x35d   :  { %v4572_v27 = vcombine.high %v1244_v18, %v1248_v19  ;;  %v1236_v30 = vld [vmem:[#allocation2 + $0x3c0] sm:$0xff]  ;;  %2666 = vmatprep.subr.bf16.mxu0 %v4444_v26  ;;  %v4571_v41 = vcombine.low %v1244_v18, %v1248_v19 }
 0x35e   :  { %v1240_v33 = vld [vmem:[#allocation2 + $0x3e0] sm:$0xff]  ;;  %2667 = vmatpush1.bf16.msra.mxu0 %v4443_v36 }
 0x35f   :  { %v1364_v34 = vld [vmem:[#allocation2 + $0x7c0] sm:$0xff]  ;;  %v4564_v42 = vcombine.high %v1236_v30, %v1240_v33  ;;  %2707 = vmatprep.subr.bf16.mxu1 %v4572_v27  ;;  %v4563_v48 = vcombine.low %v1236_v30, %v1240_v33 }
 0x360   :  { %v1368_v35 = vld [vmem:[#allocation2 + $0x7e0] sm:$0xff]  ;;  %2708 = vmatpush1.bf16.msra.mxu1 %v4571_v41 }
 0x361   :  { %v4692_v43 = vcombine.high %v1364_v34, %v1368_v35  ;;  %v1228_v44 = vld [vmem:[#allocation2 + $0x380] sm:$0xff]  ;;  %2668 = vmatprep.subr.bf16.mxu0 %v4564_v42  ;;  %v4691_v49 = vcombine.low %v1364_v34, %v1368_v35 }
 0x362   :  { %v1232_v45 = vld [vmem:[#allocation2 + $0x3a0] sm:$0xff]  ;;  %2669 = vmatpush2.bf16.msra.mxu0 %v4563_v48 }
 0x363   :  { %v1356_v46 = vld [vmem:[#allocation2 + $0x780] sm:$0xff]  ;;  %v4556_v50 = vcombine.high %v1228_v44, %v1232_v45  ;;  %2709 = vmatprep.subr.bf16.mxu1 %v4692_v43  ;;  %v4555_v58 = vcombine.low %v1228_v44, %v1232_v45 }
 0x364   :  { %v1360_v47 = vld [vmem:[#allocation2 + $0x7a0] sm:$0xff]  ;;  %2710 = vmatpush2.bf16.msra.mxu1 %v4691_v49  ;;  %v1173_v49 = vld [vmem:[#allocation2 + $0x1c8] sm:$0xff] }
 0x365   :  { %v4684_v51 = vcombine.high %v1356_v46, %v1360_v47  ;;  %v1220_v52 = vld [vmem:[#allocation2 + $0x340] sm:$0xff]  ;;  %2670 = vmatprep.subr.bf16.mxu0 %v4556_v50  ;;  %v4683_v59 = vcombine.low %v1356_v46, %v1360_v47  ;;  %v1177_v50 = vld [vmem:[#allocation2 + $0x1e8] sm:$0xff] }
 0x366   :  { %v1224_v53 = vld [vmem:[#allocation2 + $0x360] sm:$0xff]  ;;  %2671 = vmatpush2.bf16.msra.mxu0 %v4555_v58 }
 0x367   :  { %v1348_v54 = vld [vmem:[#allocation2 + $0x740] sm:$0xff]  ;;  %v4548_v60 = vcombine.high %v1220_v52, %v1224_v53  ;;  %2711 = vmatprep.subr.bf16.mxu1 %v4684_v51  ;;  %v4547_v62 = vcombine.low %v1220_v52, %v1224_v53  ;;  %v1301_v51 = vld [vmem:[#allocation2 + $0x5c8] sm:$0xff] }
 0x368   :  { %v1352_v55 = vld [vmem:[#allocation2 + $0x760] sm:$0xff]  ;;  %2712 = vmatpush2.bf16.msra.mxu1 %v4683_v59  ;;  %v1305_v52 = vld [vmem:[#allocation2 + $0x5e8] sm:$0xff] }
 0x369   :  { %v4676_v23 = vcombine.high %v1348_v54, %v1352_v55  ;;  %v1212_v31 = vld [vmem:[#allocation2 + $0x300] sm:$0xff]  ;;  %2672 = vmatprep.subr.bf16.mxu0 %v4548_v60  ;;  %v4675_v63 = vcombine.low %v1348_v54, %v1352_v55  ;;  %v4502_v55 = vcombine.high %v1173_v49, %v1177_v50  ;;  %v4630_v58 = vcombine.high %v1301_v51, %v1305_v52  ;;  %v1165_v59 = vld [vmem:[#allocation2 + $0x188] sm:$0xff] }
 0x36a   :  { %v1216_v24 = vld [vmem:[#allocation2 + $0x320] sm:$0xff]  ;;  %2673 = vmatpush2.bf16.msra.mxu0 %v4547_v62  ;;  %v1169_v60 = vld [vmem:[#allocation2 + $0x1a8] sm:$0xff]  ;;  %v4629_v62 = vcombine.low %v1301_v51, %v1305_v52 }
 0x36b   :  { %v1340_v32 = vld [vmem:[#allocation2 + $0x700] sm:$0xff]  ;;  %v4540_v0 = vcombine.high %v1212_v31, %v1216_v24  ;;  %2713 = vmatprep.subr.bf16.mxu1 %v4676_v23  ;;  %v4539_v56 = vcombine.low %v1212_v31, %v1216_v24  ;;  %v5540_v23 = vpack.c.bf16 %v5528_v7, %v5528_v7  ;;  %v1293_v31 = vld [vmem:[#allocation2 + $0x588] sm:$0xff] }
 0x36c   :  { %v1344_v61 = vld [vmem:[#allocation2 + $0x720] sm:$0xff]  ;;  %2714 = vmatpush2.bf16.msra.mxu1 %v4675_v63  ;;  %v1297_v24 = vld [vmem:[#allocation2 + $0x5a8] sm:$0xff]  ;;  %v4494_v63 = vcombine.high %v1165_v59, %v1169_v60 }
 0x36d   :  { %v4668_v4 = vcombine.high %v1340_v32, %v1344_v61  ;;  %v1204_v5 = vld [vmem:[#allocation2 + $0x2c0] sm:$0xff]  ;;  %2674 = vmatprep.subr.bf16.mxu0 %v4540_v0  ;;  %v4667_v57 = vcombine.low %v1340_v32, %v1344_v61  ;;  %v5544_v32 = vpack.c.bf16 %v5530_v9, %v5530_v9  ;;  %v4501_v61 = vcombine.low %v1173_v49, %v1177_v50  ;;  %v1285_v7 = vld [vmem:[#allocation2 + $0x548] sm:$0xff] }
 0x36e   :  { %v1208_v6 = vld [vmem:[#allocation2 + $0x2e0] sm:$0xff]  ;;  %2675 = vmatpush2.bf16.msra.mxu0 %v4539_v56  ;;  %v4622_v0 = vcombine.high %v1293_v31, %v1297_v24  ;;  %v4621_v9 = vcombine.low %v1293_v31, %v1297_v24  ;;  %v1257_v49 = vld [vmem:[#allocation2 + $0x468] sm:$0xff] }
 0x36f   :  { %v1332_v37 = vld [vmem:[#allocation2 + $0x6c0] sm:$0xff]  ;;  %v4532_v8 = vcombine.high %v1204_v5, %v1208_v6  ;;  %2715 = vmatprep.subr.bf16.mxu1 %v4668_v4  ;;  %v4531_v17 = vcombine.low %v1204_v5, %v1208_v6  ;;  %v1157_v4 = vld [vmem:[#allocation2 + $0x148] sm:$0xff] }
 0x370   :  { %v1336_v39 = vld [vmem:[#allocation2 + $0x6e0] sm:$0xff]  ;;  %2716 = vmatpush2.bf16.msra.mxu1 %v4667_v57  ;;  %v1161_v5 = vld [vmem:[#allocation2 + $0x168] sm:$0xff] }
 0x371   :  { %v4660_v10 = vcombine.high %v1332_v37, %v1336_v39  ;;  %v1196_v13 = vld [vmem:[#allocation2 + $0x280] sm:$0xff]  ;;  %2676 = vmatprep.subr.bf16.mxu0 %v4532_v8  ;;  %v4659_v18 = vcombine.low %v1332_v37, %v1336_v39  ;;  %v1289_v6 = vld [vmem:[#allocation2 + $0x568] sm:$0xff]  ;;  %v4493_v37 = vcombine.low %v1165_v59, %v1169_v60  ;;  %v4486_v39 = vcombine.high %v1157_v4, %v1161_v5 }
 0x372   :  { %v1200_v14 = vld [vmem:[#allocation2 + $0x2a0] sm:$0xff]  ;;  %2677 = vmatpush2.bf16.msra.mxu0 %v4531_v17  ;;  %v4614_v56 = vcombine.high %v1285_v7, %v1289_v6  ;;  %v1149_v57 = vld [vmem:[#allocation2 + $0x108] sm:$0xff] }
 0x373   :  { %v1324_v15 = vld [vmem:[#allocation2 + $0x680] sm:$0xff]  ;;  %v4524_v19 = vcombine.high %v1196_v13, %v1200_v14  ;;  %2717 = vmatprep.subr.bf16.mxu1 %v4660_v10  ;;  %v4523_v33 = vcombine.low %v1196_v13, %v1200_v14  ;;  %v1153_v8 = vld [vmem:[#allocation2 + $0x128] sm:$0xff]  ;;  %v4485_v14 = vcombine.low %v1157_v4, %v1161_v5 }
 0x374   :  { %v1328_v16 = vld [vmem:[#allocation2 + $0x6a0] sm:$0xff]  ;;  %2718 = vmatpush2.bf16.msra.mxu1 %v4659_v18  ;;  %v1277_v10 = vld [vmem:[#allocation2 + $0x508] sm:$0xff] }
 0x375   :  { %v4652_v21 = vcombine.high %v1324_v15, %v1328_v16  ;;  %v1188_v25 = vld [vmem:[#allocation2 + $0x240] sm:$0xff]  ;;  %2678 = vmatprep.subr.bf16.mxu0 %v4524_v19  ;;  %v4651_v34 = vcombine.low %v1324_v15, %v1328_v16  ;;  %v1281_v13 = vld [vmem:[#allocation2 + $0x528] sm:$0xff]  ;;  %v4613_v15 = vcombine.low %v1285_v7, %v1289_v6  ;;  %v4478_v16 = vcombine.high %v1149_v57, %v1153_v8 }
 0x376   :  { %v1192_v26 = vld [vmem:[#allocation2 + $0x260] sm:$0xff]  ;;  %2679 = vmatpush2.bf16.msra.mxu0 %v4523_v33  ;;  %v4606_v17 = vcombine.high %v1277_v10, %v1281_v13  ;;  %v1141_v18 = vld [vmem:[#allocation2 + $0xc8] sm:$0xff] }
 0x377   :  { %v1316_v27 = vld [vmem:[#allocation2 + $0x640] sm:$0xff]  ;;  %v4516_v35 = vcombine.high %v1188_v25, %v1192_v26  ;;  %2719 = vmatprep.subr.bf16.mxu1 %v4652_v21  ;;  %v4515_v45 = vcombine.low %v1188_v25, %v1192_v26  ;;  %v1145_v19 = vld [vmem:[#allocation2 + $0xe8] sm:$0xff]  ;;  %v4477_v26 = vcombine.low %v1149_v57, %v1153_v8 }
 0x378   :  { %v1320_v30 = vld [vmem:[#allocation2 + $0x660] sm:$0xff]  ;;  %2720 = vmatpush2.bf16.msra.mxu1 %v4651_v34  ;;  %v1269_v21 = vld [vmem:[#allocation2 + $0x4c8] sm:$0xff] }
 0x379   :  { %v4644_v36 = vcombine.high %v1316_v27, %v1320_v30  ;;  %v1180_v41 = vld [vmem:[#allocation2 + $0x200] sm:$0xff]  ;;  %2680 = vmatprep.subr.bf16.mxu0 %v4516_v35  ;;  %v4643_v46 = vcombine.low %v1316_v27, %v1320_v30  ;;  %v1273_v25 = vld [vmem:[#allocation2 + $0x4e8] sm:$0xff]  ;;  %v4605_v27 = vcombine.low %v1277_v10, %v1281_v13  ;;  %v4470_v30 = vcombine.high %v1141_v18, %v1145_v19 }
 0x37a   :  { %v1184_v42 = vld [vmem:[#allocation2 + $0x220] sm:$0xff]  ;;  %2681 = vmatpush2.bf16.msra.mxu0 %v4515_v45  ;;  %v4598_v33 = vcombine.high %v1269_v21, %v1273_v25  ;;  %v1133_v34 = vld [vmem:[#allocation2 + $0x88] sm:$0xff] }
 0x37b   :  { %v1308_v43 = vld [vmem:[#allocation2 + $0x600] sm:$0xff]  ;;  %v4508_v47 = vcombine.high %v1180_v41, %v1184_v42  ;;  %2721 = vmatprep.subr.bf16.mxu1 %v4644_v36  ;;  %v4507_v53 = vcombine.low %v1180_v41, %v1184_v42  ;;  %v1137_v35 = vld [vmem:[#allocation2 + $0xa8] sm:$0xff]  ;;  %v4469_v42 = vcombine.low %v1141_v18, %v1145_v19 }
 0x37c   :  { %v1312_v44 = vld [vmem:[#allocation2 + $0x620] sm:$0xff]  ;;  %2722 = vmatpush2.bf16.msra.mxu1 %v4643_v46  ;;  %v1261_v36 = vld [vmem:[#allocation2 + $0x488] sm:$0xff]  ;;  %v4461_v50 = vcombine.low %v1133_v34, %v1137_v35 }
 0x37d   :  { %v4636_v48 = vcombine.high %v1308_v43, %v1312_v44  ;;  %2682 = vmatprep.subr.bf16.mxu0 %v4508_v47  ;;  %v4635_v54 = vcombine.low %v1308_v43, %v1312_v44  ;;  %v1265_v41 = vld [vmem:[#allocation2 + $0x4a8] sm:$0xff]  ;;  %v4597_v43 = vcombine.low %v1269_v21, %v1273_v25  ;;  %v4462_v44 = vcombine.high %v1133_v34, %v1137_v35 }
 0x37e   :  { %2683 = vmatpush2.bf16.msra.mxu0 %v4507_v53  ;;  %v4590_v45 = vcombine.high %v1261_v36, %v1265_v41  ;;  %v1125_v46 = vld [vmem:[#allocation2 + $0x48] sm:$0xff]  ;;  %v4589_v51 = vcombine.low %v1261_v36, %v1265_v41 }
 0x37f   :  { %2723 = vmatprep.subr.bf16.mxu1 %v4636_v48  ;;  %2734 = vmatprep.subr.bf16.mxu0 %v4502_v55  ;;  %v1129_v47 = vld [vmem:[#allocation2 + $0x68] sm:$0xff] }
 0x380   :  { %2724 = vmatpush2.bf16.msra.mxu1 %v4635_v54  ;;  %v1253_v48 = vld [vmem:[#allocation2 + $0x448] sm:$0xff]  ;;  %v4454_v52 = vcombine.high %v1125_v46, %v1129_v47  ;;  %v4453_v60 = vcombine.low %v1125_v46, %v1129_v47 }
 0x381   :  { %2775 = vmatprep.subr.bf16.mxu1 %v4630_v58  ;;  %2685 = vmatmul.mubr.bf16.vlgmr.msra.gmra.mxu0 %v5540_v23  ;;  %v4582_v53 = vcombine.high %v1253_v48, %v1257_v49  ;;  %v1117_v54 = vld [vmem:[#allocation2 + $0x8] sm:$0xff]  ;;  %v4581_v31 = vcombine.low %v1253_v48, %v1257_v49 }
 0x382   :  { %2735 = vmatpush1.bf16.msra.mxu0 %v4501_v61  ;;  %2766 = vmatprep.mubr.bf16.mxu0 %v5532_v11  ;;  %v1121_v55 = vld [vmem:[#allocation2 + $0x28] sm:$0xff] }
 0x383   :  { %2726 = vmatmul.mubr.bf16.vlgmr.msra.gmra.mxu1 %v5544_v32  ;;  %2736 = vmatprep.subr.bf16.mxu0 %v4494_v63  ;;  %v1245_v58 = vld [vmem:[#allocation2 + $0x408] sm:$0xff]  ;;  %v4446_v24 = vcombine.high %v1117_v54, %v1121_v55  ;;  %v4445_v5 = vcombine.low %v1117_v54, %v1121_v55 }
 0x384   :  { %2776 = vmatpush1.bf16.msra.mxu1 %v4629_v62  ;;  %2807 = vmatprep.mubr.bf16.mxu1 %v5534_v12  ;;  %v1249_v59 = vld [vmem:[#allocation2 + $0x428] sm:$0xff] }
 0x385   :  { %2777 = vmatprep.subr.bf16.mxu1 %v4622_v0  ;;  %v4574_v61 = vcombine.high %v1245_v58, %v1249_v59  ;;  %v1237_v62 = vld [vmem:[#allocation2 + $0x3c8] sm:$0xff]  ;;  %v4573_v7 = vcombine.low %v1245_v58, %v1249_v59 }
 0x386   :  { %2737 = vmatpush1.bf16.msra.mxu0 %v4493_v37  ;;  %v1241_v63 = vld [vmem:[#allocation2 + $0x3e8] sm:$0xff] }
 0x387   :  { %2738 = vmatprep.subr.bf16.mxu0 %v4486_v39  ;;  %v1365_v0 = vld [vmem:[#allocation2 + $0x7c8] sm:$0xff]  ;;  %v4566_v6 = vcombine.high %v1237_v62, %v1241_v63  ;;  %v4565_v8 = vcombine.low %v1237_v62, %v1241_v63 }
 0x388   :  { %2778 = vmatpush1.bf16.msra.mxu1 %v4621_v9  ;;  %v1369_v4 = vld [vmem:[#allocation2 + $0x7e8] sm:$0xff] }
 0x389   :  { %2779 = vmatprep.subr.bf16.mxu1 %v4614_v56  ;;  %v4694_v37 = vcombine.high %v1365_v0, %v1369_v4  ;;  %v1229_v9 = vld [vmem:[#allocation2 + $0x388] sm:$0xff]  ;;  %v4693_v10 = vcombine.low %v1365_v0, %v1369_v4 }
 0x38a   :  { %2739 = vmatpush1.bf16.msra.mxu0 %v4485_v14  ;;  %v1233_v39 = vld [vmem:[#allocation2 + $0x3a8] sm:$0xff] }
 0x38b   :  { %2740 = vmatprep.subr.bf16.mxu0 %v4478_v16  ;;  %v1357_v56 = vld [vmem:[#allocation2 + $0x788] sm:$0xff]  ;;  %v4558_v13 = vcombine.high %v1229_v9, %v1233_v39  ;;  %v4557_v19 = vcombine.low %v1229_v9, %v1233_v39 }
 0x38c   :  { %2780 = vmatpush1.bf16.msra.mxu1 %v4613_v15  ;;  %v1361_v57 = vld [vmem:[#allocation2 + $0x7a8] sm:$0xff] }
 0x38d   :  { %2781 = vmatprep.subr.bf16.mxu1 %v4606_v17  ;;  %v4686_v14 = vcombine.high %v1357_v56, %v1361_v57  ;;  %v1221_v15 = vld [vmem:[#allocation2 + $0x348] sm:$0xff]  ;;  %v4685_v21 = vcombine.low %v1357_v56, %v1361_v57 }
 0x38e   :  { %2741 = vmatpush1.bf16.msra.mxu0 %v4477_v26  ;;  %v1225_v16 = vld [vmem:[#allocation2 + $0x368] sm:$0xff] }
 0x38f   :  { %2742 = vmatprep.subr.bf16.mxu0 %v4470_v30  ;;  %v1349_v17 = vld [vmem:[#allocation2 + $0x748] sm:$0xff]  ;;  %v4550_v25 = vcombine.high %v1221_v15, %v1225_v16  ;;  %v4549_v35 = vcombine.low %v1221_v15, %v1225_v16  ;;  %v1306_v15 = vld [vmem:[#allocation2 + $0x5f0] sm:$0xff] }
 0x390   :  { %2782 = vmatpush1.bf16.msra.mxu1 %v4605_v27  ;;  %v1353_v18 = vld [vmem:[#allocation2 + $0x768] sm:$0xff] }
 0x391   :  { %2783 = vmatprep.subr.bf16.mxu1 %v4598_v33  ;;  %v4678_v26 = vcombine.high %v1349_v17, %v1353_v18  ;;  %v1213_v27 = vld [vmem:[#allocation2 + $0x308] sm:$0xff]  ;;  %v4677_v36 = vcombine.low %v1349_v17, %v1353_v18 }
 0x392   :  { %2743 = vmatpush1.bf16.msra.mxu0 %v4469_v42  ;;  %v1217_v30 = vld [vmem:[#allocation2 + $0x328] sm:$0xff] }
 0x393   :  { %2744 = vmatprep.subr.bf16.mxu0 %v4462_v44  ;;  %v1341_v33 = vld [vmem:[#allocation2 + $0x708] sm:$0xff]  ;;  %v4542_v41 = vcombine.high %v1213_v27, %v1217_v30  ;;  %v4541_v47 = vcombine.low %v1213_v27, %v1217_v30  ;;  %v1298_v27 = vld [vmem:[#allocation2 + $0x5b0] sm:$0xff] }
 0x394   :  { %2784 = vmatpush1.bf16.msra.mxu1 %v4597_v43  ;;  %v1345_v34 = vld [vmem:[#allocation2 + $0x728] sm:$0xff] }
 0x395   :  { %2785 = vmatprep.subr.bf16.mxu1 %v4590_v45  ;;  %v4670_v42 = vcombine.high %v1341_v33, %v1345_v34  ;;  %v1205_v43 = vld [vmem:[#allocation2 + $0x2c8] sm:$0xff]  ;;  %v4669_v48 = vcombine.low %v1341_v33, %v1345_v34 }
 0x396   :  { %2745 = vmatpush1.bf16.msra.mxu0 %v4461_v50  ;;  %v1209_v44 = vld [vmem:[#allocation2 + $0x2e8] sm:$0xff] }
 0x397   :  { %2746 = vmatprep.subr.bf16.mxu0 %v4454_v52  ;;  %v1333_v45 = vld [vmem:[#allocation2 + $0x6c8] sm:$0xff]  ;;  %v4534_v49 = vcombine.high %v1205_v43, %v1209_v44  ;;  %v4533_v55 = vcombine.low %v1205_v43, %v1209_v44  ;;  %v1290_v43 = vld [vmem:[#allocation2 + $0x570] sm:$0xff] }
 0x398   :  { %2786 = vmatpush1.bf16.msra.mxu1 %v4589_v51  ;;  %v1337_v46 = vld [vmem:[#allocation2 + $0x6e8] sm:$0xff] }
 0x399   :  { %2787 = vmatprep.subr.bf16.mxu1 %v4582_v53  ;;  %v4662_v50 = vcombine.high %v1333_v45, %v1337_v46  ;;  %v1197_v51 = vld [vmem:[#allocation2 + $0x288] sm:$0xff]  ;;  %v4661_v58 = vcombine.low %v1333_v45, %v1337_v46 }
 0x39a   :  { %2747 = vmatpush1.bf16.msra.mxu0 %v4453_v60  ;;  %v1201_v52 = vld [vmem:[#allocation2 + $0x2a8] sm:$0xff] }
 0x39b   :  { %2748 = vmatprep.subr.bf16.mxu0 %v4446_v24  ;;  %v1325_v53 = vld [vmem:[#allocation2 + $0x688] sm:$0xff]  ;;  %v4526_v59 = vcombine.high %v1197_v51, %v1201_v52  ;;  %v4525_v63 = vcombine.low %v1197_v51, %v1201_v52  ;;  %v1282_v51 = vld [vmem:[#allocation2 + $0x530] sm:$0xff] }
 0x39c   :  { %2788 = vmatpush1.bf16.msra.mxu1 %v4581_v31  ;;  %v1329_v54 = vld [vmem:[#allocation2 + $0x6a8] sm:$0xff] }
 0x39d   :  { %2789 = vmatprep.subr.bf16.mxu1 %v4574_v61  ;;  %v4654_v60 = vcombine.high %v1325_v53, %v1329_v54  ;;  %v1189_v31 = vld [vmem:[#allocation2 + $0x248] sm:$0xff]  ;;  %v4653_v0 = vcombine.low %v1325_v53, %v1329_v54 }
 0x39e   :  { %2749 = vmatpush1.bf16.msra.mxu0 %v4445_v5  ;;  %v1193_v24 = vld [vmem:[#allocation2 + $0x268] sm:$0xff] }
 0x39f   :  { %2750 = vmatprep.subr.bf16.mxu0 %v4566_v6  ;;  %v1317_v61 = vld [vmem:[#allocation2 + $0x648] sm:$0xff]  ;;  %v4518_v4 = vcombine.high %v1189_v31, %v1193_v24  ;;  %v4517_v39 = vcombine.low %v1189_v31, %v1193_v24  ;;  %v1274_v31 = vld [vmem:[#allocation2 + $0x4f0] sm:$0xff] }
 0x3a0   :  { %2790 = vmatpush1.bf16.msra.mxu1 %v4573_v7  ;;  %v1321_v62 = vld [vmem:[#allocation2 + $0x668] sm:$0xff] }
 0x3a1   :  { %2791 = vmatprep.subr.bf16.mxu1 %v4694_v37  ;;  %v4646_v5 = vcombine.high %v1317_v61, %v1321_v62  ;;  %v1181_v7 = vld [vmem:[#allocation2 + $0x208] sm:$0xff]  ;;  %v4645_v56 = vcombine.low %v1317_v61, %v1321_v62 }
 0x3a2   :  { %2751 = vmatpush2.bf16.msra.mxu0 %v4565_v8  ;;  %v1185_v6 = vld [vmem:[#allocation2 + $0x228] sm:$0xff] }
 0x3a3   :  { %2752 = vmatprep.subr.bf16.mxu0 %v4558_v13  ;;  %v1309_v37 = vld [vmem:[#allocation2 + $0x608] sm:$0xff]  ;;  %v4510_v57 = vcombine.high %v1181_v7, %v1185_v6  ;;  %v1178_v13 = vld [vmem:[#allocation2 + $0x1f0] sm:$0xff]  ;;  %v4509_v16 = vcombine.low %v1181_v7, %v1185_v6 }
 0x3a4   :  { %2792 = vmatpush2.bf16.msra.mxu1 %v4693_v10  ;;  %v1313_v9 = vld [vmem:[#allocation2 + $0x628] sm:$0xff]  ;;  %v1174_v10 = vld [vmem:[#allocation2 + $0x1d0] sm:$0xff] }
 0x3a5   :  { %2793 = vmatprep.subr.bf16.mxu1 %v4686_v14  ;;  %v4638_v8 = vcombine.high %v1309_v37, %v1313_v9  ;;  %v1302_v14 = vld [vmem:[#allocation2 + $0x5d0] sm:$0xff]  ;;  %v4637_v17 = vcombine.low %v1309_v37, %v1313_v9  ;;  %v4504_v18 = vcombine.high %v1174_v10, %v1178_v13  ;;  %v4503_v30 = vcombine.low %v1174_v10, %v1178_v13 }
 0x3a6   :  { %2753 = vmatpush2.bf16.msra.mxu0 %v4557_v19  ;;  %v4632_v19 = vcombine.high %v1302_v14, %v1306_v15  ;;  %v4631_v33 = vcombine.low %v1302_v14, %v1306_v15  ;;  %v1266_v7 = vld [vmem:[#allocation2 + $0x4b0] sm:$0xff] }
 0x3a7   :  { %2754 = vmatprep.subr.bf16.mxu0 %v4550_v25  ;;  %v1170_v25 = vld [vmem:[#allocation2 + $0x1b0] sm:$0xff] }
 0x3a8   :  { %2794 = vmatpush2.bf16.msra.mxu1 %v4685_v21  ;;  %v1166_v21 = vld [vmem:[#allocation2 + $0x190] sm:$0xff] }
 0x3a9   :  { %2795 = vmatprep.subr.bf16.mxu1 %v4678_v26  ;;  %v1294_v26 = vld [vmem:[#allocation2 + $0x590] sm:$0xff]  ;;  %v4496_v34 = vcombine.high %v1166_v21, %v1170_v25  ;;  %v4495_v44 = vcombine.low %v1166_v21, %v1170_v25 }
 0x3aa   :  { %2755 = vmatpush2.bf16.msra.mxu0 %v4549_v35  ;;  %v4624_v35 = vcombine.high %v1294_v26, %v1298_v27  ;;  %v4623_v45 = vcombine.low %v1294_v26, %v1298_v27  ;;  %v1258_v10 = vld [vmem:[#allocation2 + $0x470] sm:$0xff] }
 0x3ab   :  { %2756 = vmatprep.subr.bf16.mxu0 %v4542_v41  ;;  %v1162_v41 = vld [vmem:[#allocation2 + $0x170] sm:$0xff] }
 0x3ac   :  { %2796 = vmatpush2.bf16.msra.mxu1 %v4677_v36  ;;  %v1158_v36 = vld [vmem:[#allocation2 + $0x150] sm:$0xff] }
 0x3ad   :  { %2797 = vmatprep.subr.bf16.mxu1 %v4670_v42  ;;  %v1286_v42 = vld [vmem:[#allocation2 + $0x550] sm:$0xff]  ;;  %v4488_v46 = vcombine.high %v1158_v36, %v1162_v41  ;;  %v4487_v52 = vcombine.low %v1158_v36, %v1162_v41 }
 0x3ae   :  { %2757 = vmatpush2.bf16.msra.mxu0 %v4541_v47  ;;  %v4616_v47 = vcombine.high %v1286_v42, %v1290_v43  ;;  %v4615_v53 = vcombine.low %v1286_v42, %v1290_v43  ;;  %v1250_v21 = vld [vmem:[#allocation2 + $0x430] sm:$0xff] }
 0x3af   :  { %2758 = vmatprep.subr.bf16.mxu0 %v4534_v49  ;;  %v1154_v49 = vld [vmem:[#allocation2 + $0x130] sm:$0xff] }
 0x3b0   :  { %2798 = vmatpush2.bf16.msra.mxu1 %v4669_v48  ;;  %v1150_v48 = vld [vmem:[#allocation2 + $0x110] sm:$0xff] }
 0x3b1   :  { %2799 = vmatprep.subr.bf16.mxu1 %v4662_v50  ;;  %v1278_v50 = vld [vmem:[#allocation2 + $0x510] sm:$0xff]  ;;  %v4480_v54 = vcombine.high %v1150_v48, %v1154_v49  ;;  %v4479_v24 = vcombine.low %v1150_v48, %v1154_v49 }
 0x3b2   :  { %2759 = vmatpush2.bf16.msra.mxu0 %v4533_v55  ;;  %v4608_v55 = vcombine.high %v1278_v50, %v1282_v51  ;;  %v4607_v61 = vcombine.low %v1278_v50, %v1282_v51  ;;  %v1370_v36 = vld [vmem:[#allocation2 + $0x7f0] sm:$0xff] }
 0x3b3   :  { %2760 = vmatprep.subr.bf16.mxu0 %v4526_v59  ;;  %v1146_v59 = vld [vmem:[#allocation2 + $0xf0] sm:$0xff] }
 0x3b4   :  { %2800 = vmatpush2.bf16.msra.mxu1 %v4661_v58  ;;  %v1142_v58 = vld [vmem:[#allocation2 + $0xd0] sm:$0xff] }
 0x3b5   :  { %2801 = vmatprep.subr.bf16.mxu1 %v4654_v60  ;;  %v1270_v60 = vld [vmem:[#allocation2 + $0x4d0] sm:$0xff]  ;;  %v4472_v62 = vcombine.high %v1142_v58, %v1146_v59  ;;  %v4471_v6 = vcombine.low %v1142_v58, %v1146_v59 }
 0x3b6   :  { %2761 = vmatpush2.bf16.msra.mxu0 %v4525_v63  ;;  %v4600_v63 = vcombine.high %v1270_v60, %v1274_v31  ;;  %v4599_v37 = vcombine.low %v1270_v60, %v1274_v31  ;;  %v1362_v48 = vld [vmem:[#allocation2 + $0x7b0] sm:$0xff] }
 0x3b7   :  { %2762 = vmatprep.subr.bf16.mxu0 %v4518_v4  ;;  %v1138_v4 = vld [vmem:[#allocation2 + $0xb0] sm:$0xff] }
 0x3b8   :  { %2802 = vmatpush2.bf16.msra.mxu1 %v4653_v0  ;;  %v1134_v0 = vld [vmem:[#allocation2 + $0x90] sm:$0xff] }
 0x3b9   :  { %2803 = vmatprep.subr.bf16.mxu1 %v4646_v5  ;;  %v1262_v5 = vld [vmem:[#allocation2 + $0x490] sm:$0xff]  ;;  %v4464_v9 = vcombine.high %v1134_v0, %v1138_v4  ;;  %v4463_v13 = vcombine.low %v1134_v0, %v1138_v4 }
 0x3ba   :  { %2763 = vmatpush2.bf16.msra.mxu0 %v4517_v39  ;;  %v4592_v39 = vcombine.high %v1262_v5, %v1266_v7  ;;  %v4591_v14 = vcombine.low %v1262_v5, %v1266_v7  ;;  %v1354_v58 = vld [vmem:[#allocation2 + $0x770] sm:$0xff] }
 0x3bb   :  { %2764 = vmatprep.subr.bf16.mxu0 %v4510_v57  ;;  %v1130_v57 = vld [vmem:[#allocation2 + $0x70] sm:$0xff] }
 0x3bc   :  { %2804 = vmatpush2.bf16.msra.mxu1 %v4645_v56  ;;  %v1126_v56 = vld [vmem:[#allocation2 + $0x50] sm:$0xff] }
 0x3bd   :  { %2805 = vmatprep.subr.bf16.mxu1 %v4638_v8  ;;  %v1254_v8 = vld [vmem:[#allocation2 + $0x450] sm:$0xff]  ;;  %v4456_v15 = vcombine.high %v1126_v56, %v1130_v57  ;;  %v4455_v25 = vcombine.low %v1126_v56, %v1130_v57 }
 0x3be   :  { %2765 = vmatpush2.bf16.msra.mxu0 %v4509_v16  ;;  %v4584_v16 = vcombine.high %v1254_v8, %v1258_v10  ;;  %v4583_v26 = vcombine.low %v1254_v8, %v1258_v10  ;;  %v1346_v0 = vld [vmem:[#allocation2 + $0x730] sm:$0xff] }
 0x3bf   :  { %2816 = vmatprep.subr.bf16.mxu0 %v4504_v18  ;;  %v1122_v18 = vld [vmem:[#allocation2 + $0x30] sm:$0xff] }
 0x3c0   :  { %2806 = vmatpush2.bf16.msra.mxu1 %v4637_v17  ;;  %v1118_v17 = vld [vmem:[#allocation2 + $0x10] sm:$0xff] }
 0x3c1   :  { %2857 = vmatprep.subr.bf16.mxu1 %v4632_v19  ;;  %2767 = vmatmul.mubr.bf16.vlgmr.msra.gmra.mxu0 %v5540_v23  ;;  %v1246_v19 = vld [vmem:[#allocation2 + $0x410] sm:$0xff]  ;;  %v4448_v27 = vcombine.high %v1118_v17, %v1122_v18  ;;  %v4447_v41 = vcombine.low %v1118_v17, %v1122_v18 }
 0x3c2   :  { %2817 = vmatpush1.bf16.msra.mxu0 %v4503_v30  ;;  %2848 = vmatprep.mubr.bf16.mxu0 %v5532_v11  ;;  %v4576_v30 = vcombine.high %v1246_v19, %v1250_v21  ;;  %v4575_v42 = vcombine.low %v1246_v19, %v1250_v21  ;;  %v1338_v56 = vld [vmem:[#allocation2 + $0x6f0] sm:$0xff] }
 0x3c3   :  { %2808 = vmatmul.mubr.bf16.vlgmr.msra.gmra.mxu1 %v5544_v32  ;;  %2818 = vmatprep.subr.bf16.mxu0 %v4496_v34  ;;  %v1242_v34 = vld [vmem:[#allocation2 + $0x3f0] sm:$0xff] }
 0x3c4   :  { %2858 = vmatpush1.bf16.msra.mxu1 %v4631_v33  ;;  %2889 = vmatprep.mubr.bf16.mxu1 %v5534_v12  ;;  %v1238_v33 = vld [vmem:[#allocation2 + $0x3d0] sm:$0xff] }
 0x3c5   :  { %2859 = vmatprep.subr.bf16.mxu1 %v4624_v35  ;;  %v1366_v35 = vld [vmem:[#allocation2 + $0x7d0] sm:$0xff]  ;;  %v4568_v43 = vcombine.high %v1238_v33, %v1242_v34  ;;  %v4567_v49 = vcombine.low %v1238_v33, %v1242_v34 }
 0x3c6   :  { %2819 = vmatpush1.bf16.msra.mxu0 %v4495_v44  ;;  %v4696_v44 = vcombine.high %v1366_v35, %v1370_v36  ;;  %v4695_v50 = vcombine.low %v1366_v35, %v1370_v36  ;;  %v1330_v17 = vld [vmem:[#allocation2 + $0x6b0] sm:$0xff] }
 0x3c7   :  { %2820 = vmatprep.subr.bf16.mxu0 %v4488_v46  ;;  %v1234_v46 = vld [vmem:[#allocation2 + $0x3b0] sm:$0xff] }
 0x3c8   :  { %2860 = vmatpush1.bf16.msra.mxu1 %v4623_v45  ;;  %v1230_v45 = vld [vmem:[#allocation2 + $0x390] sm:$0xff] }
 0x3c9   :  { %2861 = vmatprep.subr.bf16.mxu1 %v4616_v47  ;;  %v1358_v47 = vld [vmem:[#allocation2 + $0x790] sm:$0xff]  ;;  %v4560_v51 = vcombine.high %v1230_v45, %v1234_v46  ;;  %v4559_v59 = vcombine.low %v1230_v45, %v1234_v46 }
 0x3ca   :  { %2821 = vmatpush1.bf16.msra.mxu0 %v4487_v52  ;;  %v4688_v52 = vcombine.high %v1358_v47, %v1362_v48  ;;  %v4687_v60 = vcombine.low %v1358_v47, %v1362_v48  ;;  %v1322_v33 = vld [vmem:[#allocation2 + $0x670] sm:$0xff] }
 0x3cb   :  { %2822 = vmatprep.subr.bf16.mxu0 %v4480_v54  ;;  %v1226_v54 = vld [vmem:[#allocation2 + $0x370] sm:$0xff] }
 0x3cc   :  { %2862 = vmatpush1.bf16.msra.mxu1 %v4615_v53  ;;  %v1222_v53 = vld [vmem:[#allocation2 + $0x350] sm:$0xff] }
 0x3cd   :  { %2863 = vmatprep.subr.bf16.mxu1 %v4608_v55  ;;  %v1350_v55 = vld [vmem:[#allocation2 + $0x750] sm:$0xff]  ;;  %v4552_v31 = vcombine.high %v1222_v53, %v1226_v54  ;;  %v4551_v4 = vcombine.low %v1222_v53, %v1226_v54  ;;  %v1307_v53 = vld [vmem:[#allocation2 + $0x5f8] sm:$0xff] }
 0x3ce   :  { %2823 = vmatpush1.bf16.msra.mxu0 %v4479_v24  ;;  %v4680_v24 = vcombine.high %v1350_v55, %v1354_v58  ;;  %v4679_v5 = vcombine.low %v1350_v55, %v1354_v58  ;;  %v1314_v45 = vld [vmem:[#allocation2 + $0x630] sm:$0xff] }
 0x3cf   :  { %2824 = vmatprep.subr.bf16.mxu0 %v4472_v62  ;;  %v1218_v62 = vld [vmem:[#allocation2 + $0x330] sm:$0xff] }
 0x3d0   :  { %2864 = vmatpush1.bf16.msra.mxu1 %v4607_v61  ;;  %v1214_v61 = vld [vmem:[#allocation2 + $0x310] sm:$0xff] }
 0x3d1   :  { %2865 = vmatprep.subr.bf16.mxu1 %v4600_v63  ;;  %v1342_v63 = vld [vmem:[#allocation2 + $0x710] sm:$0xff]  ;;  %v4544_v7 = vcombine.high %v1214_v61, %v1218_v62  ;;  %v4543_v57 = vcombine.low %v1214_v61, %v1218_v62  ;;  %v1299_v61 = vld [vmem:[#allocation2 + $0x5b8] sm:$0xff] }
 0x3d2   :  { %2825 = vmatpush1.bf16.msra.mxu0 %v4471_v6  ;;  %v4672_v6 = vcombine.high %v1342_v63, %v1346_v0  ;;  %v4671_v8 = vcombine.low %v1342_v63, %v1346_v0 }
 0x3d3   :  { %2826 = vmatprep.subr.bf16.mxu0 %v4464_v9  ;;  %v1210_v9 = vld [vmem:[#allocation2 + $0x2f0] sm:$0xff] }
 0x3d4   :  { %2866 = vmatpush1.bf16.msra.mxu1 %v4599_v37  ;;  %v1206_v37 = vld [vmem:[#allocation2 + $0x2d0] sm:$0xff] }
 0x3d5   :  { %2867 = vmatprep.subr.bf16.mxu1 %v4592_v39  ;;  %v1334_v39 = vld [vmem:[#allocation2 + $0x6d0] sm:$0xff]  ;;  %v4536_v10 = vcombine.high %v1206_v37, %v1210_v9  ;;  %v4535_v18 = vcombine.low %v1206_v37, %v1210_v9  ;;  %v1291_v37 = vld [vmem:[#allocation2 + $0x578] sm:$0xff] }
 0x3d6   :  { %2827 = vmatpush1.bf16.msra.mxu0 %v4463_v13  ;;  %v4664_v13 = vcombine.high %v1334_v39, %v1338_v56  ;;  %v4663_v19 = vcombine.low %v1334_v39, %v1338_v56 }
 0x3d7   :  { %2828 = vmatprep.subr.bf16.mxu0 %v4456_v15  ;;  %v1202_v15 = vld [vmem:[#allocation2 + $0x2b0] sm:$0xff] }
 0x3d8   :  { %2868 = vmatpush1.bf16.msra.mxu1 %v4591_v14  ;;  %v1198_v14 = vld [vmem:[#allocation2 + $0x290] sm:$0xff] }
 0x3d9   :  { %2869 = vmatprep.subr.bf16.mxu1 %v4584_v16  ;;  %v1326_v16 = vld [vmem:[#allocation2 + $0x690] sm:$0xff]  ;;  %v4528_v21 = vcombine.high %v1198_v14, %v1202_v15  ;;  %v4527_v34 = vcombine.low %v1198_v14, %v1202_v15  ;;  %v1283_v14 = vld [vmem:[#allocation2 + $0x538] sm:$0xff] }
 0x3da   :  { %2829 = vmatpush1.bf16.msra.mxu0 %v4455_v25  ;;  %v4656_v25 = vcombine.high %v1326_v16, %v1330_v17  ;;  %v4655_v35 = vcombine.low %v1326_v16, %v1330_v17 }
 0x3db   :  { %2830 = vmatprep.subr.bf16.mxu0 %v4448_v27  ;;  %v1194_v27 = vld [vmem:[#allocation2 + $0x270] sm:$0xff] }
 0x3dc   :  { %2870 = vmatpush1.bf16.msra.mxu1 %v4583_v26  ;;  %v1190_v26 = vld [vmem:[#allocation2 + $0x250] sm:$0xff] }
 0x3dd   :  { %2871 = vmatprep.subr.bf16.mxu1 %v4576_v30  ;;  %v1318_v30 = vld [vmem:[#allocation2 + $0x650] sm:$0xff]  ;;  %v4520_v36 = vcombine.high %v1190_v26, %v1194_v27  ;;  %v4519_v46 = vcombine.low %v1190_v26, %v1194_v27  ;;  %v1275_v26 = vld [vmem:[#allocation2 + $0x4f8] sm:$0xff] }
 0x3de   :  { %2831 = vmatpush1.bf16.msra.mxu0 %v4447_v41  ;;  %v4648_v41 = vcombine.high %v1318_v30, %v1322_v33  ;;  %v4647_v47 = vcombine.low %v1318_v30, %v1322_v33  ;;  %v1135_v33 = vld [vmem:[#allocation2 + $0x98] sm:$0xff] }
 0x3df   :  { %2832 = vmatprep.subr.bf16.mxu0 %v4568_v43  ;;  %v1186_v43 = vld [vmem:[#allocation2 + $0x230] sm:$0xff] }
 0x3e0   :  { %2872 = vmatpush1.bf16.msra.mxu1 %v4575_v42  ;;  %v1182_v42 = vld [vmem:[#allocation2 + $0x210] sm:$0xff] }
 0x3e1   :  { %2873 = vmatprep.subr.bf16.mxu1 %v4696_v44  ;;  %v1310_v44 = vld [vmem:[#allocation2 + $0x610] sm:$0xff]  ;;  %v4512_v48 = vcombine.high %v1182_v42, %v1186_v43  ;;  %v4511_v54 = vcombine.low %v1182_v42, %v1186_v43 }
 0x3e2   :  { %2833 = vmatpush2.bf16.msra.mxu0 %v4567_v49  ;;  %v4640_v49 = vcombine.high %v1310_v44, %v1314_v45  ;;  %v4639_v55 = vcombine.low %v1310_v44, %v1314_v45  ;;  %v1127_v45 = vld [vmem:[#allocation2 + $0x58] sm:$0xff] }
 0x3e3   :  { %2834 = vmatprep.subr.bf16.mxu0 %v4560_v51  ;;  %v1179_v51 = vld [vmem:[#allocation2 + $0x1f8] sm:$0xff] }
 0x3e4   :  { %2874 = vmatpush2.bf16.msra.mxu1 %v4695_v50  ;;  %v1175_v50 = vld [vmem:[#allocation2 + $0x1d8] sm:$0xff] }
 0x3e5   :  { %2875 = vmatprep.subr.bf16.mxu1 %v4688_v52  ;;  %v1303_v52 = vld [vmem:[#allocation2 + $0x5d8] sm:$0xff]  ;;  %v4506_v58 = vcombine.high %v1175_v50, %v1179_v51  ;;  %v4505_v62 = vcombine.low %v1175_v50, %v1179_v51 }
 0x3e6   :  { %2835 = vmatpush2.bf16.msra.mxu0 %v4559_v59  ;;  %v4634_v59 = vcombine.high %v1303_v52, %v1307_v53  ;;  %v4633_v63 = vcombine.low %v1303_v52, %v1307_v53  ;;  %v1119_v53 = vld [vmem:[#allocation2 + $0x18] sm:$0xff] }
 0x3e7   :  { %2836 = vmatprep.subr.bf16.mxu0 %v4552_v31  ;;  %v1171_v31 = vld [vmem:[#allocation2 + $0x1b8] sm:$0xff] }
 0x3e8   :  { %2876 = vmatpush2.bf16.msra.mxu1 %v4687_v60  ;;  %v1167_v60 = vld [vmem:[#allocation2 + $0x198] sm:$0xff] }
 0x3e9   :  { %2877 = vmatprep.subr.bf16.mxu1 %v4680_v24  ;;  %v1295_v24 = vld [vmem:[#allocation2 + $0x598] sm:$0xff]  ;;  %v4498_v0 = vcombine.high %v1167_v60, %v1171_v31  ;;  %v4497_v9 = vcombine.low %v1167_v60, %v1171_v31 }
 0x3ea   :  { %2837 = vmatpush2.bf16.msra.mxu0 %v4551_v4  ;;  %v4626_v4 = vcombine.high %v1295_v24, %v1299_v61  ;;  %v4625_v39 = vcombine.low %v1295_v24, %v1299_v61  ;;  %v1239_v61 = vld [vmem:[#allocation2 + $0x3d8] sm:$0xff] }
 0x3eb   :  { %2838 = vmatprep.subr.bf16.mxu0 %v4544_v7  ;;  %v1163_v7 = vld [vmem:[#allocation2 + $0x178] sm:$0xff] }
 0x3ec   :  { %2878 = vmatpush2.bf16.msra.mxu1 %v4679_v5  ;;  %v1159_v5 = vld [vmem:[#allocation2 + $0x158] sm:$0xff] }
 0x3ed   :  { %2879 = vmatprep.subr.bf16.mxu1 %v4672_v6  ;;  %v1287_v6 = vld [vmem:[#allocation2 + $0x558] sm:$0xff]  ;;  %v4490_v56 = vcombine.high %v1159_v5, %v1163_v7  ;;  %v4489_v15 = vcombine.low %v1159_v5, %v1163_v7 }
 0x3ee   :  { %2839 = vmatpush2.bf16.msra.mxu0 %v4543_v57  ;;  %v4618_v57 = vcombine.high %v1287_v6, %v1291_v37  ;;  %v4617_v16 = vcombine.low %v1287_v6, %v1291_v37  ;;  %v1231_v37 = vld [vmem:[#allocation2 + $0x398] sm:$0xff] }
 0x3ef   :  { %2840 = vmatprep.subr.bf16.mxu0 %v4536_v10  ;;  %v1155_v10 = vld [vmem:[#allocation2 + $0x138] sm:$0xff] }
 0x3f0   :  { %2880 = vmatpush2.bf16.msra.mxu1 %v4671_v8  ;;  %v1151_v8 = vld [vmem:[#allocation2 + $0x118] sm:$0xff] }
 0x3f1   :  { %2881 = vmatprep.subr.bf16.mxu1 %v4664_v13  ;;  %v1279_v13 = vld [vmem:[#allocation2 + $0x518] sm:$0xff]  ;;  %v4482_v17 = vcombine.high %v1151_v8, %v1155_v10  ;;  %v4481_v27 = vcombine.low %v1151_v8, %v1155_v10 }
 0x3f2   :  { %2841 = vmatpush2.bf16.msra.mxu0 %v4535_v18  ;;  %v4610_v18 = vcombine.high %v1279_v13, %v1283_v14 }
 0x3f3   :  { %2842 = vmatprep.subr.bf16.mxu0 %v4528_v21  ;;  %v1147_v21 = vld [vmem:[#allocation2 + $0xf8] sm:$0xff] }
 0x3f4   :  { %2882 = vmatpush2.bf16.msra.mxu1 %v4663_v19  ;;  %v1143_v19 = vld [vmem:[#allocation2 + $0xd8] sm:$0xff] }
 0x3f5   :  { %2883 = vmatprep.subr.bf16.mxu1 %v4656_v25  ;;  %v1271_v25 = vld [vmem:[#allocation2 + $0x4d8] sm:$0xff]  ;;  %v4474_v30 = vcombine.high %v1143_v19, %v1147_v21 }
 0x3f6   :  { %2843 = vmatpush2.bf16.msra.mxu0 %v4527_v34  ;;  %v1139_v34 = vld [vmem:[#allocation2 + $0xb8] sm:$0xff]  ;;  %v4601_v42 = vcombine.low %v1271_v25, %v1275_v26 }
 0x3f7   :  { %2844 = vmatprep.subr.bf16.mxu0 %v4520_v36  ;;  %v1267_v36 = vld [vmem:[#allocation2 + $0x4b8] sm:$0xff]  ;;  %v4466_v43 = vcombine.high %v1135_v33, %v1139_v34 }
 0x3f8   :  { %2884 = vmatpush2.bf16.msra.mxu1 %v4655_v35  ;;  %v1263_v35 = vld [vmem:[#allocation2 + $0x498] sm:$0xff] }
 0x3f9   :  { %2885 = vmatprep.subr.bf16.mxu1 %v4648_v41  ;;  %v4473_v41 = vcombine.low %v1143_v19, %v1147_v21  ;;  %v4594_v44 = vcombine.high %v1263_v35, %v1267_v36  ;;  %v4593_v50 = vcombine.low %v1263_v35, %v1267_v36  ;;  %v1207_v36 = vld [vmem:[#allocation2 + $0x2d8] sm:$0xff] }
 0x3fa   :  { %2845 = vmatpush2.bf16.msra.mxu0 %v4519_v46  ;;  %v1131_v46 = vld [vmem:[#allocation2 + $0x78] sm:$0xff] }
 0x3fb   :  { %2846 = vmatprep.subr.bf16.mxu0 %v4512_v48  ;;  %v1259_v48 = vld [vmem:[#allocation2 + $0x478] sm:$0xff]  ;;  %v4458_v51 = vcombine.high %v1127_v45, %v1131_v46 }
 0x3fc   :  { %2886 = vmatpush2.bf16.msra.mxu1 %v4647_v47  ;;  %v1255_v47 = vld [vmem:[#allocation2 + $0x458] sm:$0xff] }
 0x3fd   :  { %2887 = vmatprep.subr.bf16.mxu1 %v4640_v49  ;;  %v4465_v49 = vcombine.low %v1135_v33, %v1139_v34  ;;  %v4586_v52 = vcombine.high %v1255_v47, %v1259_v48  ;;  %v4585_v60 = vcombine.low %v1255_v47, %v1259_v48  ;;  %v1199_v48 = vld [vmem:[#allocation2 + $0x298] sm:$0xff] }
 0x3fe   :  { %2847 = vmatpush2.bf16.msra.mxu0 %v4511_v54  ;;  %v1123_v54 = vld [vmem:[#allocation2 + $0x38] sm:$0xff] }
 0x3ff   :  { %2898 = vmatprep.subr.bf16.mxu0 %v4506_v58  ;;  %v1251_v58 = vld [vmem:[#allocation2 + $0x438] sm:$0xff]  ;;  %v4450_v31 = vcombine.high %v1119_v53, %v1123_v54 }
 0x400   :  { %2888 = vmatpush2.bf16.msra.mxu1 %v4639_v55  ;;  %v1247_v55 = vld [vmem:[#allocation2 + $0x418] sm:$0xff] }
 0x401   :  { %2939 = vmatprep.subr.bf16.mxu1 %v4634_v59  ;;  %2849 = vmatmul.mubr.bf16.vlgmr.msra.gmra.mxu0 %v5540_v23  ;;  %v4457_v59 = vcombine.low %v1127_v45, %v1131_v46  ;;  %v4578_v24 = vcombine.high %v1247_v55, %v1251_v58  ;;  %v4577_v5 = vcombine.low %v1247_v55, %v1251_v58  ;;  %v1191_v58 = vld [vmem:[#allocation2 + $0x258] sm:$0xff] }
 0x402   :  { %2899 = vmatpush1.bf16.msra.mxu0 %v4505_v62  ;;  %2930 = vmatprep.mubr.bf16.mxu0 %v5532_v11  ;;  %v4609_v11 = vcombine.low %v1279_v13, %v1283_v14  ;;  %v1243_v62 = vld [vmem:[#allocation2 + $0x3f8] sm:$0xff] }
 0x403   :  { %2890 = vmatmul.mubr.bf16.vlgmr.msra.gmra.mxu1 %v5544_v32  ;;  %2900 = vmatprep.subr.bf16.mxu0 %v4498_v0  ;;  %v1371_v0 = vld [vmem:[#allocation2 + $0x7f8] sm:$0xff]  ;;  %v4570_v7 = vcombine.high %v1239_v61, %v1243_v62 }
 0x404   :  { %2940 = vmatpush1.bf16.msra.mxu1 %v4633_v63  ;;  %2971 = vmatprep.mubr.bf16.mxu1 %v5534_v12  ;;  %v4602_v12 = vcombine.high %v1271_v25, %v1275_v26  ;;  %v1367_v63 = vld [vmem:[#allocation2 + $0x7d8] sm:$0xff] }
 0x405   :  { %2941 = vmatprep.subr.bf16.mxu1 %v4626_v4  ;;  %v4449_v4 = vcombine.low %v1119_v53, %v1123_v54  ;;  %v4698_v6 = vcombine.high %v1367_v63, %v1371_v0  ;;  %v4697_v8 = vcombine.low %v1367_v63, %v1371_v0  ;;  %v1223_v14 = vld [vmem:[#allocation2 + $0x358] sm:$0xff] }
 0x406   :  { %2901 = vmatpush1.bf16.msra.mxu0 %v4497_v9  ;;  %v1235_v9 = vld [vmem:[#allocation2 + $0x3b8] sm:$0xff] }
 0x407   :  { %2902 = vmatprep.subr.bf16.mxu0 %v4490_v56  ;;  %v1363_v56 = vld [vmem:[#allocation2 + $0x7b8] sm:$0xff]  ;;  %v4562_v10 = vcombine.high %v1231_v37, %v1235_v9 }
 0x408   :  { %2942 = vmatpush1.bf16.msra.mxu1 %v4625_v39  ;;  %v1359_v39 = vld [vmem:[#allocation2 + $0x798] sm:$0xff] }
 0x409   :  { %2943 = vmatprep.subr.bf16.mxu1 %v4618_v57  ;;  %v4569_v57 = vcombine.low %v1239_v61, %v1243_v62  ;;  %v4690_v13 = vcombine.high %v1359_v39, %v1363_v56  ;;  %v4689_v19 = vcombine.low %v1359_v39, %v1363_v56  ;;  %v1215_v26 = vld [vmem:[#allocation2 + $0x318] sm:$0xff] }
 0x40a   :  { %2903 = vmatpush1.bf16.msra.mxu0 %v4489_v15  ;;  %v1227_v15 = vld [vmem:[#allocation2 + $0x378] sm:$0xff] }
 0x40b   :  { %2904 = vmatprep.subr.bf16.mxu0 %v4482_v17  ;;  %v1355_v17 = vld [vmem:[#allocation2 + $0x778] sm:$0xff]  ;;  %v4554_v21 = vcombine.high %v1223_v14, %v1227_v15 }
 0x40c   :  { %2944 = vmatpush1.bf16.msra.mxu1 %v4617_v16  ;;  %v1351_v16 = vld [vmem:[#allocation2 + $0x758] sm:$0xff] }
 0x40d   :  { %2945 = vmatprep.subr.bf16.mxu1 %v4610_v18  ;;  %v4561_v18 = vcombine.low %v1231_v37, %v1235_v9  ;;  %v4682_v25 = vcombine.high %v1351_v16, %v1355_v17  ;;  %v4681_v33 = vcombine.low %v1351_v16, %v1355_v17  ;;  %v1183_v0 = vld [vmem:[#allocation2 + $0x218] sm:$0xff] }
 0x40e   :  { %2905 = vmatpush1.bf16.msra.mxu0 %v4481_v27  ;;  %v1219_v27 = vld [vmem:[#allocation2 + $0x338] sm:$0xff] }
 0x40f   :  { %2906 = vmatprep.subr.bf16.mxu0 %v4474_v30  ;;  %v1347_v30 = vld [vmem:[#allocation2 + $0x738] sm:$0xff]  ;;  %v4546_v34 = vcombine.high %v1215_v26, %v1219_v27 }
 0x410   :  { %2946 = vmatpush1.bf16.msra.mxu1 %v4609_v11  ;;  %v1343_v11 = vld [vmem:[#allocation2 + $0x718] sm:$0xff] }
 0x411   :  { %2947 = vmatprep.subr.bf16.mxu1 %v4602_v12  ;;  %v4553_v12 = vcombine.low %v1223_v14, %v1227_v15  ;;  %v4674_v35 = vcombine.high %v1343_v11, %v1347_v30  ;;  %v4673_v45 = vcombine.low %v1343_v11, %v1347_v30 }
 0x412   :  { %2907 = vmatpush1.bf16.msra.mxu0 %v4473_v41  ;;  %v1211_v41 = vld [vmem:[#allocation2 + $0x2f8] sm:$0xff] }
 0x413   :  { %2908 = vmatprep.subr.bf16.mxu0 %v4466_v43  ;;  %v1339_v43 = vld [vmem:[#allocation2 + $0x6f8] sm:$0xff]  ;;  %v4538_v46 = vcombine.high %v1207_v36, %v1211_v41 }
 0x414   :  { %2948 = vmatpush1.bf16.msra.mxu1 %v4601_v42  ;;  %v1335_v42 = vld [vmem:[#allocation2 + $0x6d8] sm:$0xff] }
 0x415   :  { %2949 = vmatprep.subr.bf16.mxu1 %v4594_v44  ;;  %v4545_v44 = vcombine.low %v1215_v26, %v1219_v27  ;;  %v4666_v47 = vcombine.high %v1335_v42, %v1339_v43  ;;  %v4665_v53 = vcombine.low %v1335_v42, %v1339_v43 }
 0x416   :  { %2909 = vmatpush1.bf16.msra.mxu0 %v4465_v49  ;;  %v1203_v49 = vld [vmem:[#allocation2 + $0x2b8] sm:$0xff] }
 0x417   :  { %2910 = vmatprep.subr.bf16.mxu0 %v4458_v51  ;;  %v1331_v51 = vld [vmem:[#allocation2 + $0x6b8] sm:$0xff]  ;;  %v4530_v54 = vcombine.high %v1199_v48, %v1203_v49 }
 0x418   :  { %2950 = vmatpush1.bf16.msra.mxu1 %v4593_v50  ;;  %v1327_v50 = vld [vmem:[#allocation2 + $0x698] sm:$0xff] }
 0x419   :  { %2951 = vmatprep.subr.bf16.mxu1 %v4586_v52  ;;  %v4537_v52 = vcombine.low %v1207_v36, %v1211_v41  ;;  %v4658_v55 = vcombine.high %v1327_v50, %v1331_v51  ;;  %v4657_v61 = vcombine.low %v1327_v50, %v1331_v51 }
 0x41a   :  { %2911 = vmatpush1.bf16.msra.mxu0 %v4457_v59  ;;  %v1195_v59 = vld [vmem:[#allocation2 + $0x278] sm:$0xff] }
 0x41b   :  { %2912 = vmatprep.subr.bf16.mxu0 %v4450_v31  ;;  %v1323_v31 = vld [vmem:[#allocation2 + $0x678] sm:$0xff]  ;;  %v4522_v62 = vcombine.high %v1191_v58, %v1195_v59 }
 0x41c   :  { %2952 = vmatpush1.bf16.msra.mxu1 %v4585_v60  ;;  %v1319_v60 = vld [vmem:[#allocation2 + $0x658] sm:$0xff] }
 0x41d   :  { %2953 = vmatprep.subr.bf16.mxu1 %v4578_v24  ;;  %v4529_v24 = vcombine.low %v1199_v48, %v1203_v49  ;;  %v4650_v63 = vcombine.high %v1319_v60, %v1323_v31  ;;  %v4649_v37 = vcombine.low %v1319_v60, %v1323_v31 }
 0x41e   :  { %2913 = vmatpush1.bf16.msra.mxu0 %v4449_v4  ;;  %v1187_v4 = vld [vmem:[#allocation2 + $0x238] sm:$0xff] }
 0x41f   :  { %2914 = vmatprep.subr.bf16.mxu0 %v4570_v7  ;;  %v1315_v7 = vld [vmem:[#allocation2 + $0x638] sm:$0xff]  ;;  %v4514_v9 = vcombine.high %v1183_v0, %v1187_v4  ;;  %v4513_v56 = vcombine.low %v1183_v0, %v1187_v4 }
 0x420   :  { %2954 = vmatpush1.bf16.msra.mxu1 %v4577_v5  ;;  %v1311_v5 = vld [vmem:[#allocation2 + $0x618] sm:$0xff] }
 0x421   :  { %2955 = vmatprep.subr.bf16.mxu1 %v4698_v6  ;;  %v4521_v6 = vcombine.low %v1191_v58, %v1195_v59  ;;  %v4642_v39 = vcombine.high %v1311_v5, %v1315_v7 }
 0x422   :  { %2915 = vmatpush2.bf16.msra.mxu0 %v4569_v57  ;;  %v4641_v57 = vcombine.low %v1311_v5, %v1315_v7 }
 0x423   :  { %2916 = vmatprep.subr.bf16.mxu0 %v4562_v10 }
 0x424   :  { %2956 = vmatpush2.bf16.msra.mxu1 %v4697_v8 }
 0x425   :  { %2957 = vmatprep.subr.bf16.mxu1 %v4690_v13 }
 0x426   :  { %2917 = vmatpush2.bf16.msra.mxu0 %v4561_v18 }
 0x427   :  { %2918 = vmatprep.subr.bf16.mxu0 %v4554_v21 }
 0x428   :  { %2958 = vmatpush2.bf16.msra.mxu1 %v4689_v19 }
 0x429   :  { %2959 = vmatprep.subr.bf16.mxu1 %v4682_v25 }
 0x42a   :  { %2919 = vmatpush2.bf16.msra.mxu0 %v4553_v12 }
 0x42b   :  { %2920 = vmatprep.subr.bf16.mxu0 %v4546_v34 }
 0x42c   :  { %2960 = vmatpush2.bf16.msra.mxu1 %v4681_v33 }
 0x42d   :  { %2961 = vmatprep.subr.bf16.mxu1 %v4674_v35 }
 0x42e   :  { %2921 = vmatpush2.bf16.msra.mxu0 %v4545_v44 }
 0x42f   :  { %2922 = vmatprep.subr.bf16.mxu0 %v4538_v46 }
 0x430   :  { %2962 = vmatpush2.bf16.msra.mxu1 %v4673_v45 }
 0x431   :  { %2963 = vmatprep.subr.bf16.mxu1 %v4666_v47 }
 0x432   :  { %2923 = vmatpush2.bf16.msra.mxu0 %v4537_v52 }
 0x433   :  { %2924 = vmatprep.subr.bf16.mxu0 %v4530_v54 }
 0x434   :  { %2964 = vmatpush2.bf16.msra.mxu1 %v4665_v53 }
 0x435   :  { %2965 = vmatprep.subr.bf16.mxu1 %v4658_v55 }
 0x436   :  { %2925 = vmatpush2.bf16.msra.mxu0 %v4529_v24 }
 0x437   :  { %2926 = vmatprep.subr.bf16.mxu0 %v4522_v62 }
 0x438   :  { %2966 = vmatpush2.bf16.msra.mxu1 %v4657_v61 }
 0x439   :  { %2967 = vmatprep.subr.bf16.mxu1 %v4650_v63 }
 0x43a   :  { %2927 = vmatpush2.bf16.msra.mxu0 %v4521_v6 }
 0x43b   :  { %2928 = vmatprep.subr.bf16.mxu0 %v4514_v9 }
 0x43c   :  { %2968 = vmatpush2.bf16.msra.mxu1 %v4649_v37 }
 0x43d   :  { %2969 = vmatprep.subr.bf16.mxu1 %v4642_v39 }
 0x43e   :  { %2929 = vmatpush2.bf16.msra.mxu0 %v4513_v56 }
 0x440   :  { %2970 = vmatpush2.bf16.msra.mxu1 %v4641_v57 }
 0x441   :  { %v2686_v8 = vpop.f32.mrf.mxu0  ;;  %2931 = vmatmul.mubr.bf16.vlgmr.msra.gmra.mxu0 %v5540_v23 }
 0x443   :  { %v2727_v10 = vpop.f32.mrf.mxu1  ;;  %2972 = vmatmul.mubr.bf16.vlgmr.msra.gmra.mxu1 %v5544_v32  ;;  %v2688_v14 = vpop.f32.mrf.mxu0 }
 0x444   :  { %v5560_v13 = vadd.f32 %v2727_v10, %v2686_v8 }
 0x445   :  { %v2729_v15 = vpop.f32.mrf.mxu1  ;;  %v2690_v17 = vpop.f32.mrf.mxu0 }
 0x446   :  { %v5562_v16 = vadd.f32 %v2729_v15, %v2688_v14  ;;  %v2980_v52 = vrot.slane %v5560_v13, 4 }
 0x447   :  { %v2731_v18 = vpop.f32.mrf.mxu1  ;;  %v2691_v19 = vpop.f32.mrf.mxu0 }
 0x448   :  { %v2986_v50 = vrot.slane %v5562_v16, 4  ;;  %v2981_v60 = vadd.f32 %v2980_v52, %v5560_v13 }
 0x449   :  { %v2732_v21 = vpop.f32.mrf.mxu1 }
 0x44a   :  { %v2987_v55 = vadd.f32 %v2986_v50, %v5562_v16  ;;  %v2982_v0 = vrot.slane %v2981_v60, 2 }
 0x44c   :  { %v2988_v61 = vrot.slane %v2987_v55, 2  ;;  %v2983_v9 = vadd.f32 %v2982_v0, %v2981_v60 }
 0x44e   :  { %v2989_v7 = vadd.f32 %v2988_v61, %v2987_v55  ;;  %v2984_v14 = vrot.slane %v2983_v9, 1 }
 0x450   :  { %v2990_v57 = vrot.slane %v2989_v7, 1 }
 0x452   :  { %v2991_v18 = vadd.f32 %v2990_v57, %v2989_v7 }
 0x481   :  { %v2768_v25 = vpop.f32.mrf.mxu0 }
 0x483   :  { %v2809_v26 = vpop.f32.mrf.mxu1  ;;  %v2770_v11 = vpop.f32.mrf.mxu0 }
 0x484   :  { %v5564_v27 = vadd.f32 %v2809_v26, %v2768_v25  ;;  %v2985_v25 = vadd.f32 %v2984_v14, %v2983_v9 }
 0x485   :  { %v2811_v30 = vpop.f32.mrf.mxu1  ;;  %v2772_v12 = vpop.f32.mrf.mxu0 }
 0x486   :  { %v5566_v23 = vadd.f32 %v2811_v30, %v2770_v11  ;;  %v2992_v51 = vrot.slane %v5564_v27, 4  ;;  %v5586_v30 = vmul.f32 0.125, %v2991_v18 }
 0x487   :  { %v2813_v32 = vpop.f32.mrf.mxu1  ;;  %v2773_v33 = vpop.f32.mrf.mxu0 }
 0x488   :  { %v2998_v49 = vrot.slane %v5566_v23, 4  ;;  %v2993_v58 = vadd.f32 %v2992_v51, %v5564_v27  ;;  %v5590_v33 = vmul.f32 0.125, %v2985_v25 }
 0x489   :  { %v2814_v34 = vpop.f32.mrf.mxu1 }
 0x48a   :  { %v2999_v53 = vadd.f32 %v2998_v49, %v5566_v23  ;;  %v2994_v62 = vrot.slane %v2993_v58, 2 }
 0x48c   :  { %v3000_v31 = vrot.slane %v2999_v53, 2  ;;  %v2995_v6 = vadd.f32 %v2994_v62, %v2993_v58 }
 0x48e   :  { %v3001_v4 = vadd.f32 %v3000_v31, %v2999_v53  ;;  %v2996_v8 = vrot.slane %v2995_v6, 1 }
 0x490   :  { %v3002_v39 = vrot.slane %v3001_v4, 1  ;;  %v2997_v19 = vadd.f32 %v2996_v8, %v2995_v6 }
 0x492   :  { %v3003_v15 = vadd.f32 %v3002_v39, %v3001_v4  ;;  %v5588_v12 = vmul.f32 0.125, %v2997_v19 }
 0x494   :  { %v5584_v26 = vmul.f32 0.125, %v3003_v15 }
 0x496   :  { %v3039_v34 = vsub.f32 %v5566_v23, %v5584_v26 }
 0x4c1   :  { %v2850_v35 = vpop.f32.mrf.mxu0 }
 0x4c3   :  { %v2891_v36 = vpop.f32.mrf.mxu1  ;;  %v2852_v42 = vpop.f32.mrf.mxu0 }
 0x4c4   :  { %v5568_v41 = vadd.f32 %v2891_v36, %v2850_v35  ;;  %v3037_v36 = vsub.f32 %v5562_v16, %v5586_v30 }
 0x4c5   :  { %v2893_v43 = vpop.f32.mrf.mxu1  ;;  %v2854_v45 = vpop.f32.mrf.mxu0 }
 0x4c6   :  { %v5570_v44 = vadd.f32 %v2893_v43, %v2852_v42  ;;  %v3004_v59 = vrot.slane %v5568_v41, 4  ;;  %v3038_v42 = vsub.f32 %v5564_v27, %v5588_v12  ;;  %v3036_v45 = vsub.f32 %v5560_v13, %v5590_v33 }
 0x4c7   :  { %v2895_v46 = vpop.f32.mrf.mxu1  ;;  %v2855_v47 = vpop.f32.mrf.mxu0 }
 0x4c8   :  { %v3010_v54 = vrot.slane %v5570_v44, 4  ;;  %v3005_v63 = vadd.f32 %v3004_v59, %v5568_v41  ;;  %v3047_v46 = vmul.f32 %v3039_v34, %v3039_v34  ;;  %v3046_v49 = vmul.f32 %v3038_v42, %v3038_v42 }
 0x4c9   :  { %v2896_v48 = vpop.f32.mrf.mxu1  ;;  %v3044_v51 = vmul.f32 %v3036_v45, %v3036_v45 }
 0x4ca   :  { %v3011_v24 = vadd.f32 %v3010_v54, %v5570_v44  ;;  %v3006_v37 = vrot.slane %v3005_v63, 2  ;;  %v3045_v48 = vmul.f32 %v3037_v36, %v3037_v36  ;;  %v3070_v52 = vrot.slane %v3047_v46, 4 }
 0x4cb   :  { %v3064_v55 = vrot.slane %v3046_v49, 4  ;;  %v3052_v60 = vrot.slane %v3044_v51, 4 }
 0x4cc   :  { %v3012_v5 = vrot.slane %v3011_v24, 2  ;;  %v3007_v10 = vadd.f32 %v3006_v37, %v3005_v63  ;;  %v3058_v54 = vrot.slane %v3045_v48, 4 }
 0x4cd   :  { %v3053_v39 = vadd.f32 %v3052_v60, %v3044_v51 }
 0x4ce   :  { %v3013_v56 = vadd.f32 %v3012_v5, %v3011_v24  ;;  %v3008_v21 = vrot.slane %v3007_v10, 1  ;;  %v3071_v24 = vadd.f32 %v3070_v52, %v3047_v46  ;;  %v3059_v0 = vadd.f32 %v3058_v54, %v3045_v48 }
 0x4cf   :  { %v3065_v5 = vadd.f32 %v3064_v55, %v3046_v49 }
 0x4d0   :  { %v3014_v17 = vrot.slane %v3013_v56, 1  ;;  %v3009_v32 = vadd.f32 %v3008_v21, %v3007_v10  ;;  %v3072_v57 = vrot.slane %v3071_v24, 2 }
 0x4d1   :  { %v3066_v19 = vrot.slane %v3065_v5, 2 }
 0x4d2   :  { %v3015_v11 = vadd.f32 %v3014_v17, %v3013_v56  ;;  %v5600_v43 = vmul.f32 0.125, %v3009_v32  ;;  %v3060_v17 = vrot.slane %v3059_v0, 2  ;;  %v3054_v32 = vrot.slane %v3053_v39, 2 }
 0x4d3   :  { %v3073_v34 = vadd.f32 %v3072_v57, %v3071_v24 }
 0x4d4   :  { %v5594_v35 = vmul.f32 0.125, %v3015_v11  ;;  %v3040_v50 = vsub.f32 %v5568_v41, %v5600_v43  ;;  %v3061_v46 = vadd.f32 %v3060_v17, %v3059_v0  ;;  %v3055_v51 = vadd.f32 %v3054_v32, %v3053_v39 }
 0x4d5   :  { %v3074_v52 = vrot.slane %v3073_v34, 1 }
 0x4d6   :  { %v3041_v47 = vsub.f32 %v5570_v44, %v5594_v35  ;;  %v3048_v58 = vmul.f32 %v3040_v50, %v3040_v50  ;;  %v3056_v24 = vrot.slane %v3055_v51, 1 }
 0x4d8   :  { %v3049_v53 = vmul.f32 %v3041_v47, %v3041_v47  ;;  %v3076_v7 = vrot.slane %v3048_v58, 4  ;;  %v3067_v47 = vadd.f32 %v3066_v19, %v3065_v5  ;;  %v3057_v57 = vadd.f32 %v3056_v24, %v3055_v51 }
 0x4da   :  { %v3082_v61 = vrot.slane %v3049_v53, 4  ;;  %v3077_v21 = vadd.f32 %v3076_v7, %v3048_v58  ;;  %v3068_v58 = vrot.slane %v3067_v47, 1 }
 0x4dc   :  { %v3083_v8 = vadd.f32 %v3082_v61, %v3049_v53  ;;  %v3078_v48 = vrot.slane %v3077_v21, 2 }
 0x4de   :  { %v3084_v36 = vrot.slane %v3083_v8, 2  ;;  %v3079_v60 = vadd.f32 %v3078_v48, %v3077_v21 }
 0x4e0   :  { %v3085_v53 = vadd.f32 %v3084_v36, %v3083_v8 }
 0x501   :  { %v2932_v59 = vpop.f32.mrf.mxu0 }
 0x503   :  { %v2973_v31 = vpop.f32.mrf.mxu1  ;;  %v2934_v63 = vpop.f32.mrf.mxu0 }
 0x504   :  { %v5608_v62 = vadd.f32 %v2973_v31, %v2932_v59  ;;  %v3062_v59 = vrot.slane %v3061_v46, 1 }
 0x505   :  { %v2975_v4 = vpop.f32.mrf.mxu1  ;;  %v2936_v9 = vpop.f32.mrf.mxu0 }
 0x506   :  { %v3016_v6 = vrot.slane %v5608_v62, 4  ;;  %v5611_v37 = vadd.f32 %v2975_v4, %v2934_v63  ;;  %v3075_v63 = vadd.f32 %v3074_v52, %v3073_v34  ;;  %v3086_v4 = vrot.slane %v3085_v53, 1 }
 0x507   :  { %v2977_v56 = vpop.f32.mrf.mxu1  ;;  %v2937_v15 = vpop.f32.mrf.mxu0  ;;  %v3063_v7 = vadd.f32 %v3062_v59, %v3061_v46  ;;  %v3080_v9 = vrot.slane %v3079_v60, 1 }
 0x508   :  { %v3017_v10 = vadd.f32 %v3016_v6, %v5608_v62  ;;  %v3022_v14 = vrot.slane %v5611_v37, 4  ;;  %v3069_v6 = vadd.f32 %v3068_v58, %v3067_v47  ;;  %v3103_v8 = vmul.f32 0.125, %v3075_v63 }
 0x509   :  { %v2978_v18 = vpop.f32.mrf.mxu1  ;;  %v3101_v17 = vmul.f32 0.125, %v3063_v7  ;;  %v3081_v19 = vadd.f32 %v3080_v9, %v3079_v60 }
 0x50a   :  { %v3018_v25 = vrot.slane %v3017_v10, 2  ;;  %v3023_v11 = vadd.f32 %v3022_v14, %v5611_v37  ;;  %v3102_v18 = vmul.f32 0.125, %v3069_v6  ;;  %v3111_v32 = vmax.f32 %v3103_v8, 0.0 }
 0x50b   :  { %v3104_v47 = vmul.f32 0.125, %v3081_v19 }
 0x50c   :  { %v3019_v42 = vadd.f32 %v3018_v25, %v3017_v10  ;;  %v3024_v45 = vrot.slane %v3023_v11, 2  ;;  %v3087_v10 = vadd.f32 %v3086_v4, %v3085_v53  ;;  %v3110_v46 = vmax.f32 %v3102_v18, 0.0 }
 0x50d   :  { %v3119_v51 = vadd.f32 0.8, %v3111_v32  ;;  %v3112_v58 = vmax.f32 %v3104_v47, 0.0 }
 0x50e   :  { %v3020_v49 = vrot.slane %v3019_v42, 1  ;;  %v3025_v50 = vadd.f32 %v3024_v45, %v3023_v11  ;;  %v3100_v11 = vmul.f32 0.125, %v3057_v57  ;;  %v3105_v34 = vmul.f32 0.125, %v3087_v10 }
 0x50f   :  { %v3109_v45 = vmax.f32 %v3101_v17, 0.0  ;;  %v3118_v59 = vadd.f32 0.8, %v3110_v46  ;;  %4991 = vrsqrt.f32 %v3119_v51  ;;  %v3120_v7 = vadd.f32 0.8, %v3112_v58 }
 0x510   :  { %v3021_v54 = vadd.f32 %v3020_v49, %v3019_v42  ;;  %v3026_v55 = vrot.slane %v3025_v50, 1  ;;  %v3113_v52 = vmax.f32 %v3105_v34, 0.0 }
 0x512   :  { %v5616_v31 = vmul.f32 0.125, %v3021_v54  ;;  %v3027_v61 = vadd.f32 %v3026_v55, %v3025_v50  ;;  %v3108_v50 = vmax.f32 %v3100_v11, 0.0  ;;  %v3117_v55 = vadd.f32 0.8, %v3109_v45 }
 0x513   :  { %v3121_v63 = vadd.f32 0.8, %v3113_v52  ;;  %v3210_v52 = vsub.s32 4, %v5441_v20 }
 0x514   :  { %v3042_v0 = vsub.f32 %v5608_v62, %v5616_v31  ;;  %v5620_v5 = vmul.f32 0.125, %v3027_v61  ;;  %v3116_v24 = vadd.f32 0.8, %v3108_v50  ;;  %4993 = vrsqrt.f32 %v3117_v55 }
 0x515   :  { %4995 = vrsqrt.f32 %v3118_v59  ;;  %v3222_v55 = vsub.s32 7, %v5441_v20 }
 0x516   :  { %v3050_v39 = vmul.f32 %v3042_v0, %v3042_v0  ;;  %v3043_v56 = vsub.f32 %v5611_v37, %v5620_v5  ;;  %4997 = vrsqrt.f32 %v3116_v24 }
 0x517   :  { %4999 = vrsqrt.f32 %v3121_v63 }
 0x518   :  { %v3088_v14 = vrot.slane %v3050_v39, 4  ;;  %v3051_v15 = vmul.f32 %v3043_v56, %v3043_v56  ;;  %5001 = vrsqrt.f32 %v3120_v7 }
 0x51a   :  { %v3089_v21 = vadd.f32 %v3088_v14, %v3050_v39  ;;  %v3094_v25 = vrot.slane %v3051_v15, 4 }
 0x51c   :  { %v3090_v36 = vrot.slane %v3089_v21, 2  ;;  %v3095_v42 = vadd.f32 %v3094_v25, %v3051_v15  ;;  %v4992_v8 = vpop.eup %4991 }
 0x51e   :  { %v3091_v48 = vadd.f32 %v3090_v36, %v3089_v21  ;;  %v3096_v49 = vrot.slane %v3095_v42, 2 }
 0x520   :  { %v3092_v53 = vrot.slane %v3091_v48, 1  ;;  %v3097_v54 = vadd.f32 %v3096_v49, %v3095_v42 }
 0x521   :  { %v4994_v10 = vpop.eup %4993 }
 0x522   :  { %v3093_v60 = vadd.f32 %v3092_v53, %v3091_v48  ;;  %v3098_v61 = vrot.slane %v3097_v54, 1  ;;  %v4996_v14 = vpop.eup %4995  ;;  %v3214_v53 = vsub.s32 5, %v5441_v20 }
 0x523   :  { %v4998_v15 = vpop.eup %4997  ;;  %v3141_v17 = vcombine.low %v4996_v14, %v4992_v8 }
 0x524   :  { %v3106_v4 = vmul.f32 0.125, %v3093_v60  ;;  %v3099_v0 = vadd.f32 %v3098_v61, %v3097_v54  ;;  %v5000_v18 = vpop.eup %4999  ;;  %v3140_v19 = vcombine.low %v4998_v15, %v4994_v10  ;;  %v3218_v54 = vsub.s32 6, %v5441_v20 }
 0x525   :  { %v5002_v21 = vpop.eup %5001  ;;  %v3157_v11 = vrot.slane %v3141_v17, %v5444_v22 }
 0x526   :  { %v3114_v6 = vmax.f32 %v3106_v4, 0.0  ;;  %v3107_v9 = vmul.f32 0.125, %v3099_v0  ;;  %v3142_v32 = vcombine.low %v5002_v21, %v5000_v18  ;;  %v3150_v36 = vrot.slane %v3140_v19, %v5444_v22 }
 0x528   :  { %v3122_v39 = vadd.f32 0.8, %v3114_v6  ;;  %v3115_v56 = vmax.f32 %v3107_v9, 0.0  ;;  %v3172_v45 = vcombine.low %v3150_v36, %v3157_v11  ;;  %v3164_v46 = vrot.slane %v3142_v32, %v5444_v22 }
 0x52a   :  { %v3123_v57 = vadd.f32 0.8, %v3115_v56  ;;  %5003 = vrsqrt.f32 %v3122_v39  ;;  %v3180_v49 = vrot.slane %v3172_v45, %v5444_v22 }
 0x52c   :  { %5005 = vrsqrt.f32 %v3123_v57 }
 0x537   :  { %v5004_v25 = vpop.eup %5003 }
 0x539   :  { %v5006_v34 = vpop.eup %5005 }
 0x53a   :  { %v3143_v42 = vcombine.low %v5004_v25, %v5006_v34 }
 0x53c   :  { %v3171_v47 = vrot.slane %v3143_v42, %v5444_v22 }
 0x53e   :  { %v3173_v48 = vcombine.low %v3164_v46, %v3171_v47 }
 0x540   :  { %v3187_v50 = vrot.slane %v3173_v48, %v5444_v22 }
 0x542   :  { %v3188_v51 = vcombine.low %v3180_v49, %v3187_v50 }
 0x544   :  { %v3190_v59 = vmul.f32 %v3188_v51, %v5425_v1 }
 0x546   :  { %v3195_v58 = vrot.slane %v3190_v59, %v5449_v28  ;;  %v3199_v60 = vrot.slane %v3190_v59, %v5452_v29  ;;  %v3203_v61 = vrot.slane %v3190_v59, %v5504_v38  ;;  %v3207_v24 = vrot.slane %v3190_v59, %v5507_v40 }
 0x547   :  { %v3211_v63 = vrot.slane %v3190_v59, %v3210_v52  ;;  %v3215_v4 = vrot.slane %v3190_v59, %v3214_v53  ;;  %v3219_v0 = vrot.slane %v3190_v59, %v3218_v54  ;;  %v3223_v7 = vrot.slane %v3190_v59, %v3222_v55 }
 0x548   :  { %v3232_v6 = vmul.f32 %v3195_v58, %v5590_v33  ;;  %v3233_v9 = vmul.f32 %v3199_v60, %v5586_v30  ;;  %v3234_v20 = vmul.f32 %v3203_v61, %v5588_v12  ;;  %v3235_v1 = vmul.f32 %v3207_v24, %v5584_v26 }
 0x549   :  { %v3236_v39 = vmul.f32 %v3211_v63, %v5600_v43  ;;  %v3237_v56 = vmul.f32 %v3215_v4, %v5594_v35  ;;  %v3238_v57 = vmul.f32 %v3219_v0, %v5616_v31  ;;  %v3239_v8 = vmul.f32 %v3223_v7, %v5620_v5 }
 0x54a   :  { %v3248_v10 = vcombine.low %v3232_v6, %v3233_v9  ;;  %v3249_v14 = vcombine.low %v3234_v20, %v3235_v1  ;;  %v3299_v5 = vmul.f32 %v3195_v58, %v5560_v13  ;;  %v3300_v25 = vmul.f32 %v3199_v60, %v5562_v16 }
 0x54b   :  { %v3250_v15 = vcombine.low %v3236_v39, %v3237_v56  ;;  %v3251_v17 = vcombine.low %v3238_v57, %v3239_v8  ;;  %v3301_v11 = vmul.f32 %v3203_v61, %v5564_v27  ;;  %v3302_v32 = vmul.f32 %v3207_v24, %v5566_v23 }
 0x54c   :  { %v3258_v33 = vrot.slane %v3248_v10, %v5444_v22  ;;  %v3265_v30 = vrot.slane %v3249_v14, %v5444_v22  ;;  %v3303_v34 = vmul.f32 %v3211_v63, %v5568_v41  ;;  %v3304_v36 = vmul.f32 %v3215_v4, %v5570_v44 }
 0x54d   :  { %v3272_v12 = vrot.slane %v3250_v15, %v5444_v22  ;;  %v3279_v26 = vrot.slane %v3251_v17, %v5444_v22  ;;  %v3305_v42 = vmul.f32 %v3219_v0, %v5608_v62  ;;  %v3306_v45 = vmul.f32 %v3223_v7, %v5611_v37 }
 0x54e   :  { %v3280_v18 = vcombine.low %v3258_v33, %v3265_v30 }
 0x54f   :  { %v3281_v43 = vcombine.low %v3272_v12, %v3279_v26 }
 0x550   :  { %v3288_v35 = vrot.slane %v3280_v18, %v5444_v22 }
 0x551   :  { %v3295_v31 = vrot.slane %v3281_v43, %v5444_v22 }
 0x553   :  { %v3296_v19 = vcombine.low %v3288_v35, %v3295_v31 }
 0x555   :  { %v3298_v21 = vsub.f32 %v5427_v2, %v3296_v19 }
 0x557   :  { %v3311_v22 = vrot.slane %v3298_v21, %v5449_v28  ;;  %v3315_v13 = vrot.slane %v3298_v21, %v5452_v29  ;;  %v3319_v2 = vrot.slane %v3298_v21, %v5504_v38  ;;  %v3323_v16 = vrot.slane %v3298_v21, %v5507_v40 }
 0x558   :  { %v3327_v46 = vrot.slane %v3298_v21, %v3210_v52  ;;  %v3331_v27 = vrot.slane %v3298_v21, %v3214_v53  ;;  %v3335_v47 = vrot.slane %v3298_v21, %v3218_v54  ;;  %v3339_v23 = vrot.slane %v3298_v21, %v3222_v55 }
 0x559   :  { %v3348_v48 = vadd.f32 %v3311_v22, %v3299_v5  ;;  %v3349_v41 = vadd.f32 %v3315_v13, %v3300_v25  ;;  %v3350_v49 = vadd.f32 %v3319_v2, %v3301_v11  ;;  %v3351_v44 = vadd.f32 %v3323_v16, %v3302_v32 }
 0x55a   :  { %v3352_v50 = vadd.f32 %v3327_v46, %v3303_v34  ;;  %v3353_v62 = vadd.f32 %v3331_v27, %v3304_v36  ;;  %v3354_v51 = vadd.f32 %v3335_v47, %v3305_v42  ;;  %v3355_v37 = vadd.f32 %v3339_v23, %v3306_v45 }
 0x55b   :  { %vm3356_vm9 = vcmp.gt.f32.partialorder %v3348_v48, 0.0  ;;  %vm3357_vm10 = vcmp.gt.f32.partialorder %v3349_v41, 0.0  ;;  %vm3358_vm11 = vcmp.gt.f32.partialorder %v3350_v49, 0.0  ;;  %vm3359_vm12 = vcmp.gt.f32.partialorder %v3351_v44, 0.0 }
 0x55c   :  { %vm3360_vm13 = vcmp.gt.f32.partialorder %v3352_v50, 0.0  ;;  %vm3361_vm14 = vcmp.gt.f32.partialorder %v3353_v62, 0.0  ;;  %vm3362_vm15 = vcmp.gt.f32.partialorder %v3354_v51, 0.0  ;;  %vm3363_vm0 = vcmp.gt.f32.partialorder %v3355_v37, 0.0 }
 0x55d   :  { %v3364_v38 = vmul.f32 0.2, %v3348_v48  ;;  %v3365_v40 = vmul.f32 0.2, %v3349_v41  ;;  %v3366_v52 = vmul.f32 0.2, %v3350_v49 }
 0x55e   :  { %v3367_v53 = vmul.f32 0.2, %v3351_v44  ;;  %v3368_v54 = vmul.f32 0.2, %v3352_v50  ;;  %v3369_v55 = vmul.f32 0.2, %v3353_v62 }
 0x55f   :  { %v3370_v59 = vmul.f32 0.2, %v3354_v51  ;;  %v3371_v58 = vmul.f32 0.2, %v3355_v37  ;;  %v5667_v60 = vsel %vm3356_vm9, %v3348_v48, %v3364_v38  ;;  %v3373_v61 = vsel %vm3357_vm10, %v3349_v41, %v3365_v40 }
 0x560   :  { %v5671_v24 = vsel %vm3358_vm11, %v3350_v49, %v3366_v52  ;;  %v3375_v63 = vsel %vm3359_vm12, %v3351_v44, %v3367_v53  ;;  %v5675_v4 = vsel %vm3360_vm13, %v3352_v50, %v3368_v54  ;;  %v5678_v0 = vsel %vm3361_vm14, %v3353_v62, %v3369_v55 }
 0x561   :  { %v5681_v7 = vsel %vm3362_vm15, %v3354_v51, %v3370_v59  ;;  %v5684_v6 = vsel %vm3363_vm0, %v3355_v37, %v3371_v58 }
 0x562   :  { %5351 = dma.done.wait [#allocation4 + $0x1], 16384 }
 0x563   :  { %5352 = vsyncadd [#allocation4 + $0x1], 4294950912  ;;  %v3385_v9 = vpack.c.bf16 %v3373_v61, %v3373_v61  ;;  %v3387_v20 = vpack.c.bf16 %v3375_v63, %v3375_v63  ;;  %v5007_v1 = vld [vmem:[#allocation3 + $0x74] ss:$8 sps:$4 sm:$0xff]   ;;  %v5011_v56 = vld [vmem:[#allocation3 + $0x70] ss:$8 sps:$4 sm:$0xff]  }
 0x564   :  { %v5009_v39 = vld [vmem:[#allocation3 + $0x174] ss:$8 sps:$4 sm:$0xff]   ;;  %4171 = vmatprep.subr.bf16.mxu0 %v5007_v1  ;;  %v5012_v57 = vld [vmem:[#allocation3 + $0x170] ss:$8 sps:$4 sm:$0xff]   ;;  %v5013_v8 = vld [vmem:[#allocation3 + $0x64] ss:$8 sps:$4 sm:$0xff]  }
 0x565   :  { %4203 = vmatprep.mubr.bf16.mxu0 %v3385_v9  ;;  %4244 = vmatprep.mubr.bf16.mxu1 %v3387_v20  ;;  %v5015_v10 = vld [vmem:[#allocation3 + $0x164] ss:$8 sps:$4 sm:$0xff]   ;;  %v5017_v14 = vld [vmem:[#allocation3 + $0x60] ss:$8 sps:$4 sm:$0xff]   ;;  %v5019_v17 = vld [vmem:[#allocation3 + $0x54] ss:$8 sps:$4 sm:$0xff]  }
 0x566   :  { %4212 = vmatprep.subr.bf16.mxu1 %v5009_v39  ;;  %4172 = vmatpush1.bf16.msra.mxu0 %v5011_v56  ;;  %v5018_v15 = vld [vmem:[#allocation3 + $0x160] ss:$8 sps:$4 sm:$0xff]   ;;  %v5021_v33 = vld [vmem:[#allocation3 + $0x154] ss:$8 sps:$4 sm:$0xff]   ;;  %v5023_v30 = vld [vmem:[#allocation3 + $0x50] ss:$8 sps:$4 sm:$0xff]  }
 0x567   :  { %4213 = vmatpush1.bf16.msra.mxu1 %v5012_v57  ;;  %4173 = vmatprep.subr.bf16.mxu0 %v5013_v8  ;;  %v5024_v12 = vld [vmem:[#allocation3 + $0x150] ss:$8 sps:$4 sm:$0xff]   ;;  %v5025_v26 = vld [vmem:[#allocation3 + $0x44] ss:$8 sps:$4 sm:$0xff]   ;;  %v5029_v43 = vld [vmem:[#allocation3 + $0x40] ss:$8 sps:$4 sm:$0xff]  }
 0x568   :  { %4214 = vmatprep.subr.bf16.mxu1 %v5015_v10  ;;  %v5027_v18 = vld [vmem:[#allocation3 + $0x144] ss:$8 sps:$4 sm:$0xff]   ;;  %v5030_v35 = vld [vmem:[#allocation3 + $0x140] ss:$8 sps:$4 sm:$0xff]   ;;  %v5031_v31 = vld [vmem:[#allocation3 + $0x34] ss:$8 sps:$4 sm:$0xff]  }
 0x569   :  { %v5033_v19 = vld [vmem:[#allocation3 + $0x134] ss:$8 sps:$4 sm:$0xff]   ;;  %v5035_v5 = vld [vmem:[#allocation3 + $0x30] ss:$8 sps:$4 sm:$0xff]   ;;  %v5037_v25 = vld [vmem:[#allocation3 + $0x24] ss:$8 sps:$4 sm:$0xff]  }
 0x56a   :  { %4174 = vmatpush1.bf16.msra.mxu0 %v5017_v14  ;;  %v5036_v21 = vld [vmem:[#allocation3 + $0x130] ss:$8 sps:$4 sm:$0xff]   ;;  %v5039_v11 = vld [vmem:[#allocation3 + $0x124] ss:$8 sps:$4 sm:$0xff]   ;;  %v5041_v32 = vld [vmem:[#allocation3 + $0x20] ss:$8 sps:$4 sm:$0xff]  }
 0x56b   :  { %4215 = vmatpush1.bf16.msra.mxu1 %v5018_v15  ;;  %4175 = vmatprep.subr.bf16.mxu0 %v5019_v17  ;;  %v5042_v34 = vld [vmem:[#allocation3 + $0x120] ss:$8 sps:$4 sm:$0xff]   ;;  %v5043_v36 = vld [vmem:[#allocation3 + $0x14] ss:$8 sps:$4 sm:$0xff]   ;;  %v5047_v45 = vld [vmem:[#allocation3 + $0x10] ss:$8 sps:$4 sm:$0xff]  }
 0x56c   :  { %4216 = vmatprep.subr.bf16.mxu1 %v5021_v33  ;;  %v5045_v42 = vld [vmem:[#allocation3 + $0x114] ss:$8 sps:$4 sm:$0xff]   ;;  %v5048_v22 = vld [vmem:[#allocation3 + $0x110] ss:$8 sps:$4 sm:$0xff]   ;;  %v5049_v13 = vld [vmem:[#allocation3 + $0x4] ss:$8 sps:$4 sm:$0xff]  }
 0x56d   :  { %v5051_v2 = vld [vmem:[#allocation3 + $0x104] ss:$8 sps:$4 sm:$0xff]   ;;  %v5053_v16 = vld [vmem:[#allocation3] ss:$8 sps:$4 sm:$0xff]   ;;  %v5055_v27 = vld [vmem:[#allocation3 + $0xf4] ss:$8 sps:$4 sm:$0xff]  }
 0x56e   :  { %4176 = vmatpush1.bf16.msra.mxu0 %v5023_v30  ;;  %v5054_v46 = vld [vmem:[#allocation3 + $0x100] ss:$8 sps:$4 sm:$0xff]   ;;  %v5057_v47 = vld [vmem:[#allocation3 + $0x1f4] ss:$8 sps:$4 sm:$0xff]   ;;  %v5059_v23 = vld [vmem:[#allocation3 + $0xf0] ss:$8 sps:$4 sm:$0xff]  }
 0x56f   :  { %4217 = vmatpush1.bf16.msra.mxu1 %v5024_v12  ;;  %4177 = vmatprep.subr.bf16.mxu0 %v5025_v26  ;;  %v5060_v48 = vld [vmem:[#allocation3 + $0x1f0] ss:$8 sps:$4 sm:$0xff]   ;;  %v5061_v41 = vld [vmem:[#allocation3 + $0xe4] ss:$8 sps:$4 sm:$0xff]   ;;  %v5065_v44 = vld [vmem:[#allocation3 + $0xe0] ss:$8 sps:$4 sm:$0xff]   ;;  %v3384_v12 = vpack.c.bf16 %v5667_v60, %v5667_v60  ;;  %v3386_v26 = vpack.c.bf16 %v5671_v24, %v5671_v24 }
 0x570   :  { %4218 = vmatprep.subr.bf16.mxu1 %v5027_v18  ;;  %v5063_v49 = vld [vmem:[#allocation3 + $0x1e4] ss:$8 sps:$4 sm:$0xff]   ;;  %v5066_v50 = vld [vmem:[#allocation3 + $0x1e0] ss:$8 sps:$4 sm:$0xff]   ;;  %v5067_v62 = vld [vmem:[#allocation3 + $0xd4] ss:$8 sps:$4 sm:$0xff]  }
 0x571   :  { %v5069_v51 = vld [vmem:[#allocation3 + $0x1d4] ss:$8 sps:$4 sm:$0xff]   ;;  %v5071_v37 = vld [vmem:[#allocation3 + $0xd0] ss:$8 sps:$4 sm:$0xff]   ;;  %v5073_v40 = vld [vmem:[#allocation3 + $0xc4] ss:$8 sps:$4 sm:$0xff]  }
 0x572   :  { %4178 = vmatpush1.bf16.msra.mxu0 %v5029_v43  ;;  %v5072_v38 = vld [vmem:[#allocation3 + $0x1d0] ss:$8 sps:$4 sm:$0xff]   ;;  %v5075_v52 = vld [vmem:[#allocation3 + $0x1c4] ss:$8 sps:$4 sm:$0xff]   ;;  %v5077_v53 = vld [vmem:[#allocation3 + $0xc0] ss:$8 sps:$4 sm:$0xff]  }
 0x573   :  { %4219 = vmatpush1.bf16.msra.mxu1 %v5030_v35  ;;  %4179 = vmatprep.subr.bf16.mxu0 %v5031_v31  ;;  %v5078_v54 = vld [vmem:[#allocation3 + $0x1c0] ss:$8 sps:$4 sm:$0xff]   ;;  %v5079_v55 = vld [vmem:[#allocation3 + $0xb4] ss:$8 sps:$4 sm:$0xff]   ;;  %v5083_v58 = vld [vmem:[#allocation3 + $0xb0] ss:$8 sps:$4 sm:$0xff]  }
 0x574   :  { %4220 = vmatprep.subr.bf16.mxu1 %v5033_v19  ;;  %v5081_v59 = vld [vmem:[#allocation3 + $0x1b4] ss:$8 sps:$4 sm:$0xff]   ;;  %v5084_v61 = vld [vmem:[#allocation3 + $0x1b0] ss:$8 sps:$4 sm:$0xff]   ;;  %v5085_v63 = vld [vmem:[#allocation3 + $0xa4] ss:$8 sps:$4 sm:$0xff]   ;;  %v3389_v19 = vpack.c.bf16 %v5678_v0, %v5678_v0 }
 0x575   :  { %v5087_v9 = vld [vmem:[#allocation3 + $0x1a4] ss:$8 sps:$4 sm:$0xff]   ;;  %v5089_v20 = vld [vmem:[#allocation3 + $0xa0] ss:$8 sps:$4 sm:$0xff]   ;;  %v5091_v39 = vld [vmem:[#allocation3 + $0x94] ss:$8 sps:$4 sm:$0xff]  }
 0x576   :  { %4180 = vmatpush1.bf16.msra.mxu0 %v5035_v5  ;;  %v5090_v1 = vld [vmem:[#allocation3 + $0x1a0] ss:$8 sps:$4 sm:$0xff]   ;;  %v5093_v56 = vld [vmem:[#allocation3 + $0x194] ss:$8 sps:$4 sm:$0xff]   ;;  %v5095_v57 = vld [vmem:[#allocation3 + $0x90] ss:$8 sps:$4 sm:$0xff]   ;;  %v3391_v5 = vpack.c.bf16 %v5684_v6, %v5684_v6 }
 0x577   :  { %4221 = vmatpush1.bf16.msra.mxu1 %v5036_v21  ;;  %4181 = vmatprep.subr.bf16.mxu0 %v5037_v25  ;;  %v5096_v8 = vld [vmem:[#allocation3 + $0x190] ss:$8 sps:$4 sm:$0xff]   ;;  %v5097_v10 = vld [vmem:[#allocation3 + $0x84] ss:$8 sps:$4 sm:$0xff]   ;;  %v5101_v15 = vld [vmem:[#allocation3 + $0x80] ss:$8 sps:$4 sm:$0xff]  }
 0x578   :  { %4222 = vmatprep.subr.bf16.mxu1 %v5039_v11  ;;  %v5099_v14 = vld [vmem:[#allocation3 + $0x184] ss:$8 sps:$4 sm:$0xff]   ;;  %v5102_v17 = vld [vmem:[#allocation3 + $0x180] ss:$8 sps:$4 sm:$0xff]   ;;  %v5105_v33 = vld [vmem:[#allocation3 + $0x274] ss:$8 sps:$4 sm:$0xff]  }
 0x579   :  { %v5108_v30 = vld [vmem:[#allocation3 + $0x374] ss:$8 sps:$4 sm:$0xff]   ;;  %v5103_v18 = vld [vmem:[#allocation3 + $0x270] ss:$8 sps:$4 sm:$0xff]   ;;  %v5111_v35 = vld [vmem:[#allocation3 + $0x264] ss:$8 sps:$4 sm:$0xff]  }
 0x57a   :  { %4182 = vmatpush1.bf16.msra.mxu0 %v5041_v32  ;;  %v5106_v43 = vld [vmem:[#allocation3 + $0x370] ss:$8 sps:$4 sm:$0xff]   ;;  %v5114_v31 = vld [vmem:[#allocation3 + $0x364] ss:$8 sps:$4 sm:$0xff]   ;;  %v5109_v60 = vld [vmem:[#allocation3 + $0x260] ss:$8 sps:$4 sm:$0xff]  }
 0x57b   :  { %4223 = vmatpush1.bf16.msra.mxu1 %v5042_v34  ;;  %4183 = vmatprep.subr.bf16.mxu0 %v5043_v36  ;;  %v5112_v21 = vld [vmem:[#allocation3 + $0x360] ss:$8 sps:$4 sm:$0xff]   ;;  %v5117_v24 = vld [vmem:[#allocation3 + $0x254] ss:$8 sps:$4 sm:$0xff]   ;;  %v5115_v11 = vld [vmem:[#allocation3 + $0x250] ss:$8 sps:$4 sm:$0xff]  }
 0x57c   :  { %4224 = vmatprep.subr.bf16.mxu1 %v5045_v42  ;;  %v5120_v25 = vld [vmem:[#allocation3 + $0x354] ss:$8 sps:$4 sm:$0xff]   ;;  %v5118_v32 = vld [vmem:[#allocation3 + $0x350] ss:$8 sps:$4 sm:$0xff]   ;;  %v5123_v0 = vld [vmem:[#allocation3 + $0x244] ss:$8 sps:$4 sm:$0xff]  }
 0x57d   :  { %v5126_v6 = vld [vmem:[#allocation3 + $0x344] ss:$8 sps:$4 sm:$0xff]   ;;  %v5121_v34 = vld [vmem:[#allocation3 + $0x240] ss:$8 sps:$4 sm:$0xff]   ;;  %v5129_v42 = vld [vmem:[#allocation3 + $0x234] ss:$8 sps:$4 sm:$0xff]  }
 0x57e   :  { %4184 = vmatpush1.bf16.msra.mxu0 %v5047_v45  ;;  %v5124_v36 = vld [vmem:[#allocation3 + $0x340] ss:$8 sps:$4 sm:$0xff]   ;;  %v5132_v45 = vld [vmem:[#allocation3 + $0x334] ss:$8 sps:$4 sm:$0xff]  }
 0x57f   :  { %4225 = vmatpush1.bf16.msra.mxu1 %v5048_v22  ;;  %4185 = vmatprep.subr.bf16.mxu0 %v5049_v13  ;;  %v5127_v22 = vld [vmem:[#allocation3 + $0x230] ss:$8 sps:$4 sm:$0xff]  }
 0x580   :  { %4226 = vmatprep.subr.bf16.mxu1 %v5051_v2  ;;  %v5130_v13 = vld [vmem:[#allocation3 + $0x330] ss:$8 sps:$4 sm:$0xff]   ;;  %v5135_v2 = vld [vmem:[#allocation3 + $0x224] ss:$8 sps:$4 sm:$0xff]  }
 0x582   :  { %4186 = vmatpush1.bf16.msra.mxu0 %v5053_v16  ;;  %v5138_v16 = vld [vmem:[#allocation3 + $0x324] ss:$8 sps:$4 sm:$0xff]  }
 0x583   :  { %4227 = vmatpush1.bf16.msra.mxu1 %v5054_v46  ;;  %4187 = vmatprep.subr.bf16.mxu0 %v5055_v27  ;;  %v5133_v46 = vld [vmem:[#allocation3 + $0x220] ss:$8 sps:$4 sm:$0xff]  }
 0x584   :  { %4228 = vmatprep.subr.bf16.mxu1 %v5057_v47  ;;  %v5136_v27 = vld [vmem:[#allocation3 + $0x320] ss:$8 sps:$4 sm:$0xff]   ;;  %v5141_v47 = vld [vmem:[#allocation3 + $0x214] ss:$8 sps:$4 sm:$0xff]  }
 0x586   :  { %4188 = vmatpush2.bf16.msra.mxu0 %v5059_v23  ;;  %v5144_v23 = vld [vmem:[#allocation3 + $0x314] ss:$8 sps:$4 sm:$0xff]  }
 0x587   :  { %4229 = vmatpush2.bf16.msra.mxu1 %v5060_v48  ;;  %4189 = vmatprep.subr.bf16.mxu0 %v5061_v41  ;;  %v5139_v48 = vld [vmem:[#allocation3 + $0x210] ss:$8 sps:$4 sm:$0xff]  }
 0x588   :  { %4230 = vmatprep.subr.bf16.mxu1 %v5063_v49  ;;  %v5142_v41 = vld [vmem:[#allocation3 + $0x310] ss:$8 sps:$4 sm:$0xff]   ;;  %v5147_v49 = vld [vmem:[#allocation3 + $0x204] ss:$8 sps:$4 sm:$0xff]  }
 0x58a   :  { %4190 = vmatpush2.bf16.msra.mxu0 %v5065_v44  ;;  %v5150_v44 = vld [vmem:[#allocation3 + $0x304] ss:$8 sps:$4 sm:$0xff]  }
 0x58b   :  { %4231 = vmatpush2.bf16.msra.mxu1 %v5066_v50  ;;  %4191 = vmatprep.subr.bf16.mxu0 %v5067_v62  ;;  %v5145_v50 = vld [vmem:[#allocation3 + $0x200] ss:$8 sps:$4 sm:$0xff]  }
 0x58c   :  { %4232 = vmatprep.subr.bf16.mxu1 %v5069_v51  ;;  %v5148_v62 = vld [vmem:[#allocation3 + $0x300] ss:$8 sps:$4 sm:$0xff]   ;;  %v5153_v51 = vld [vmem:[#allocation3 + $0x2f4] ss:$8 sps:$4 sm:$0xff]  }
 0x58e   :  { %4192 = vmatpush2.bf16.msra.mxu0 %v5071_v37  ;;  %v5156_v37 = vld [vmem:[#allocation3 + $0x3f4] ss:$8 sps:$4 sm:$0xff]  }
 0x58f   :  { %4233 = vmatpush2.bf16.msra.mxu1 %v5072_v38  ;;  %4193 = vmatprep.subr.bf16.mxu0 %v5073_v40  ;;  %v5151_v38 = vld [vmem:[#allocation3 + $0x2f0] ss:$8 sps:$4 sm:$0xff]  }
 0x590   :  { %4234 = vmatprep.subr.bf16.mxu1 %v5075_v52  ;;  %v5154_v40 = vld [vmem:[#allocation3 + $0x3f0] ss:$8 sps:$4 sm:$0xff]   ;;  %v5159_v52 = vld [vmem:[#allocation3 + $0x2e4] ss:$8 sps:$4 sm:$0xff]  }
 0x592   :  { %4194 = vmatpush2.bf16.msra.mxu0 %v5077_v53  ;;  %v5162_v53 = vld [vmem:[#allocation3 + $0x3e4] ss:$8 sps:$4 sm:$0xff]  }
 0x593   :  { %4235 = vmatpush2.bf16.msra.mxu1 %v5078_v54  ;;  %4195 = vmatprep.subr.bf16.mxu0 %v5079_v55  ;;  %v5157_v54 = vld [vmem:[#allocation3 + $0x2e0] ss:$8 sps:$4 sm:$0xff]  }
 0x594   :  { %4236 = vmatprep.subr.bf16.mxu1 %v5081_v59  ;;  %v5160_v55 = vld [vmem:[#allocation3 + $0x3e0] ss:$8 sps:$4 sm:$0xff]   ;;  %v5165_v59 = vld [vmem:[#allocation3 + $0x2d4] ss:$8 sps:$4 sm:$0xff]  }
 0x596   :  { %4196 = vmatpush2.bf16.msra.mxu0 %v5083_v58  ;;  %v5168_v58 = vld [vmem:[#allocation3 + $0x3d4] ss:$8 sps:$4 sm:$0xff]  }
 0x597   :  { %4237 = vmatpush2.bf16.msra.mxu1 %v5084_v61  ;;  %4197 = vmatprep.subr.bf16.mxu0 %v5085_v63  ;;  %v5163_v61 = vld [vmem:[#allocation3 + $0x2d0] ss:$8 sps:$4 sm:$0xff]  }
 0x598   :  { %4238 = vmatprep.subr.bf16.mxu1 %v5087_v9  ;;  %v5166_v63 = vld [vmem:[#allocation3 + $0x3d0] ss:$8 sps:$4 sm:$0xff]   ;;  %v5171_v9 = vld [vmem:[#allocation3 + $0x2c4] ss:$8 sps:$4 sm:$0xff]  }
 0x59a   :  { %4198 = vmatpush2.bf16.msra.mxu0 %v5089_v20  ;;  %v5174_v20 = vld [vmem:[#allocation3 + $0x3c4] ss:$8 sps:$4 sm:$0xff]  }
 0x59b   :  { %4239 = vmatpush2.bf16.msra.mxu1 %v5090_v1  ;;  %4199 = vmatprep.subr.bf16.mxu0 %v5091_v39  ;;  %v5169_v1 = vld [vmem:[#allocation3 + $0x2c0] ss:$8 sps:$4 sm:$0xff]  }
 0x59c   :  { %4240 = vmatprep.subr.bf16.mxu1 %v5093_v56  ;;  %v5172_v39 = vld [vmem:[#allocation3 + $0x3c0] ss:$8 sps:$4 sm:$0xff]   ;;  %v5177_v56 = vld [vmem:[#allocation3 + $0x2b4] ss:$8 sps:$4 sm:$0xff]  }
 0x59e   :  { %4200 = vmatpush2.bf16.msra.mxu0 %v5095_v57  ;;  %v5180_v57 = vld [vmem:[#allocation3 + $0x3b4] ss:$8 sps:$4 sm:$0xff]  }
 0x59f   :  { %4241 = vmatpush2.bf16.msra.mxu1 %v5096_v8  ;;  %4201 = vmatprep.subr.bf16.mxu0 %v5097_v10  ;;  %v5175_v8 = vld [vmem:[#allocation3 + $0x2b0] ss:$8 sps:$4 sm:$0xff]  }
 0x5a0   :  { %4242 = vmatprep.subr.bf16.mxu1 %v5099_v14  ;;  %v5178_v10 = vld [vmem:[#allocation3 + $0x3b0] ss:$8 sps:$4 sm:$0xff]   ;;  %v5183_v14 = vld [vmem:[#allocation3 + $0x2a4] ss:$8 sps:$4 sm:$0xff]  }
 0x5a2   :  { %4202 = vmatpush2.bf16.msra.mxu0 %v5101_v15  ;;  %v5186_v15 = vld [vmem:[#allocation3 + $0x3a4] ss:$8 sps:$4 sm:$0xff]  }
 0x5a3   :  { %4243 = vmatpush2.bf16.msra.mxu1 %v5102_v17  ;;  %4253 = vmatprep.subr.bf16.mxu0 %v5105_v33  ;;  %v5181_v17 = vld [vmem:[#allocation3 + $0x2a0] ss:$8 sps:$4 sm:$0xff]  }
 0x5a4   :  { %4294 = vmatprep.subr.bf16.mxu1 %v5108_v30  ;;  %v5184_v33 = vld [vmem:[#allocation3 + $0x3a0] ss:$8 sps:$4 sm:$0xff]   ;;  %v5189_v30 = vld [vmem:[#allocation3 + $0x294] ss:$8 sps:$4 sm:$0xff]  }
 0x5a5   :  { %4204 = vmatmul.mubr.bf16.vlgmr.msra.gmra.mxu0 %v3384_v12  ;;  %v5192_v12 = vld [vmem:[#allocation3 + $0x394] ss:$8 sps:$4 sm:$0xff]  }
 0x5a6   :  { %4245 = vmatmul.mubr.bf16.vlgmr.msra.gmra.mxu1 %v3386_v26  ;;  %4254 = vmatpush1.bf16.msra.mxu0 %v5103_v18  ;;  %v5187_v26 = vld [vmem:[#allocation3 + $0x290] ss:$8 sps:$4 sm:$0xff]  }
 0x5a7   :  { %4295 = vmatpush1.bf16.msra.mxu1 %v5106_v43  ;;  %4255 = vmatprep.subr.bf16.mxu0 %v5111_v35  ;;  %v5190_v18 = vld [vmem:[#allocation3 + $0x390] ss:$8 sps:$4 sm:$0xff]   ;;  %v5195_v43 = vld [vmem:[#allocation3 + $0x284] ss:$8 sps:$4 sm:$0xff]  }
 0x5a8   :  { %4296 = vmatprep.subr.bf16.mxu1 %v5114_v31  ;;  %4285 = vmatprep.mubr.bf16.mxu0 %v3389_v19  ;;  %v5198_v35 = vld [vmem:[#allocation3 + $0x384] ss:$8 sps:$4 sm:$0xff]   ;;  %v5193_v31 = vld [vmem:[#allocation3 + $0x280] ss:$8 sps:$4 sm:$0xff]  }
 0x5a9   :  { %4326 = vmatprep.mubr.bf16.mxu1 %v3391_v5  ;;  %v5196_v19 = vld [vmem:[#allocation3 + $0x380] ss:$8 sps:$4 sm:$0xff]   ;;  %v3388_v5 = vpack.c.bf16 %v5675_v4, %v5675_v4  ;;  %v3528_v4 = vrot.slane %v5429_v3, %v5452_v29 }
 0x5aa   :  { %4256 = vmatpush1.bf16.msra.mxu0 %v5109_v60  ;;  %v3390_v60 = vpack.c.bf16 %v5681_v7, %v5681_v7 }
 0x5ab   :  { %4297 = vmatpush1.bf16.msra.mxu1 %v5112_v21  ;;  %4257 = vmatprep.subr.bf16.mxu0 %v5117_v24 }
 0x5ac   :  { %4298 = vmatprep.subr.bf16.mxu1 %v5120_v25 }
 0x5ae   :  { %4258 = vmatpush1.bf16.msra.mxu0 %v5115_v11 }
 0x5af   :  { %4299 = vmatpush1.bf16.msra.mxu1 %v5118_v32  ;;  %4259 = vmatprep.subr.bf16.mxu0 %v5123_v0 }
 0x5b0   :  { %4300 = vmatprep.subr.bf16.mxu1 %v5126_v6 }
 0x5b2   :  { %4260 = vmatpush1.bf16.msra.mxu0 %v5121_v34 }
 0x5b3   :  { %4301 = vmatpush1.bf16.msra.mxu1 %v5124_v36  ;;  %4261 = vmatprep.subr.bf16.mxu0 %v5129_v42  ;;  %v3524_v36 = vrot.slane %v5429_v3, %v5449_v28 }
 0x5b4   :  { %4302 = vmatprep.subr.bf16.mxu1 %v5132_v45 }
 0x5b6   :  { %4262 = vmatpush1.bf16.msra.mxu0 %v5127_v22 }
 0x5b7   :  { %4303 = vmatpush1.bf16.msra.mxu1 %v5130_v13  ;;  %4263 = vmatprep.subr.bf16.mxu0 %v5135_v2 }
 0x5b8   :  { %4304 = vmatprep.subr.bf16.mxu1 %v5138_v16 }
 0x5ba   :  { %4264 = vmatpush1.bf16.msra.mxu0 %v5133_v46 }
 0x5bb   :  { %4305 = vmatpush1.bf16.msra.mxu1 %v5136_v27  ;;  %4265 = vmatprep.subr.bf16.mxu0 %v5141_v47 }
 0x5bc   :  { %4306 = vmatprep.subr.bf16.mxu1 %v5144_v23 }
 0x5be   :  { %4266 = vmatpush1.bf16.msra.mxu0 %v5139_v48 }
 0x5bf   :  { %4307 = vmatpush1.bf16.msra.mxu1 %v5142_v41  ;;  %4267 = vmatprep.subr.bf16.mxu0 %v5147_v49 }
 0x5c0   :  { %4308 = vmatprep.subr.bf16.mxu1 %v5150_v44 }
 0x5c2   :  { %4268 = vmatpush1.bf16.msra.mxu0 %v5145_v50 }
 0x5c3   :  { %4309 = vmatpush1.bf16.msra.mxu1 %v5148_v62  ;;  %4269 = vmatprep.subr.bf16.mxu0 %v5153_v51 }
 0x5c4   :  { %4310 = vmatprep.subr.bf16.mxu1 %v5156_v37 }
 0x5c6   :  { %4270 = vmatpush2.bf16.msra.mxu0 %v5151_v38 }
 0x5c7   :  { %4311 = vmatpush2.bf16.msra.mxu1 %v5154_v40  ;;  %4271 = vmatprep.subr.bf16.mxu0 %v5159_v52 }
 0x5c8   :  { %4312 = vmatprep.subr.bf16.mxu1 %v5162_v53 }
 0x5ca   :  { %4272 = vmatpush2.bf16.msra.mxu0 %v5157_v54 }
 0x5cb   :  { %4313 = vmatpush2.bf16.msra.mxu1 %v5160_v55  ;;  %4273 = vmatprep.subr.bf16.mxu0 %v5165_v59 }
 0x5cc   :  { %4314 = vmatprep.subr.bf16.mxu1 %v5168_v58 }
 0x5ce   :  { %4274 = vmatpush2.bf16.msra.mxu0 %v5163_v61 }
 0x5cf   :  { %4315 = vmatpush2.bf16.msra.mxu1 %v5166_v63  ;;  %4275 = vmatprep.subr.bf16.mxu0 %v5171_v9 }
 0x5d0   :  { %4316 = vmatprep.subr.bf16.mxu1 %v5174_v20 }
 0x5d2   :  { %4276 = vmatpush2.bf16.msra.mxu0 %v5169_v1 }
 0x5d3   :  { %4317 = vmatpush2.bf16.msra.mxu1 %v5172_v39  ;;  %4277 = vmatprep.subr.bf16.mxu0 %v5177_v56 }
 0x5d4   :  { %4318 = vmatprep.subr.bf16.mxu1 %v5180_v57 }
 0x5d6   :  { %4278 = vmatpush2.bf16.msra.mxu0 %v5175_v8 }
 0x5d7   :  { %4319 = vmatpush2.bf16.msra.mxu1 %v5178_v10  ;;  %4279 = vmatprep.subr.bf16.mxu0 %v5183_v14 }
 0x5d8   :  { %4320 = vmatprep.subr.bf16.mxu1 %v5186_v15 }
 0x5da   :  { %4280 = vmatpush2.bf16.msra.mxu0 %v5181_v17 }
 0x5db   :  { %4321 = vmatpush2.bf16.msra.mxu1 %v5184_v33  ;;  %4281 = vmatprep.subr.bf16.mxu0 %v5189_v30 }
 0x5dc   :  { %4322 = vmatprep.subr.bf16.mxu1 %v5192_v12 }
 0x5de   :  { %4282 = vmatpush2.bf16.msra.mxu0 %v5187_v26 }
 0x5df   :  { %4323 = vmatpush2.bf16.msra.mxu1 %v5190_v18  ;;  %4283 = vmatprep.subr.bf16.mxu0 %v5195_v43 }
 0x5e0   :  { %4324 = vmatprep.subr.bf16.mxu1 %v5198_v35 }
 0x5e2   :  { %4284 = vmatpush2.bf16.msra.mxu0 %v5193_v31 }
 0x5e3   :  { %4325 = vmatpush2.bf16.msra.mxu1 %v5196_v19 }
 0x5e5   :  { %4286 = vmatmul.mubr.bf16.vlgmr.msra.gmra.mxu0 %v3388_v5 }
 0x5e6   :  { %4327 = vmatmul.mubr.bf16.vlgmr.msra.gmra.mxu1 %v3390_v60 }
 0x665   :  { %v4205_v21 = vpop.f32.mrf.mxu0 }
 0x666   :  { %v4246_v24 = vpop.f32.mrf.mxu1  ;;  %v4206_v42 = vadd.f32 %v4205_v21, %v3524_v36 }
 0x667   :  { %v4207_v25 = vpop.f32.mrf.mxu0 }
 0x668   :  { %v4248_v11 = vpop.f32.mrf.mxu1  ;;  %v4208_v7 = vadd.f32 %v4207_v25, %v3528_v4  ;;  %v4247_v45 = vadd.f32 %v4246_v24, %v4206_v42 }
 0x669   :  { %v4209_v32 = vpop.f32.mrf.mxu0 }
 0x66a   :  { %v4250_v0 = vpop.f32.mrf.mxu1  ;;  %v4249_v2 = vadd.f32 %v4248_v11, %v4208_v7 }
 0x66b   :  { %v4210_v6 = vpop.f32.mrf.mxu0 }
 0x66c   :  { %v4251_v34 = vpop.f32.mrf.mxu1 }
 0x6a5   :  { %v4287_v22 = vpop.f32.mrf.mxu0 }
 0x6a6   :  { %v4328_v13 = vpop.f32.mrf.mxu1  ;;  %v4288_v16 = vadd.f32 %v4287_v22, %v4247_v45 }
 0x6a7   :  { %v4289_v46 = vpop.f32.mrf.mxu0 }
 0x6a8   :  { %v4330_v27 = vpop.f32.mrf.mxu1  ;;  %v4329_v47 = vadd.f32 %v4328_v13, %v4288_v16  ;;  %v4290_v23 = vadd.f32 %v4289_v46, %v4249_v2 }
 0x6a9   :  { %v4291_v48 = vpop.f32.mrf.mxu0 }
 0x6aa   :  { %v4332_v41 = vpop.f32.mrf.mxu1  ;;  %5199 = vtanh.f32 %v4329_v47  ;;  %v4331_v49 = vadd.f32 %v4330_v27, %v4290_v23 }
 0x6ab   :  { %v4292_v44 = vpop.f32.mrf.mxu0 }
 0x6ac   :  { %v4333_v28 = vpop.f32.mrf.mxu1  ;;  %5201 = vtanh.f32 %v4331_v49 }
 0x6b7   :  { %v5200_v50 = vpop.eup %5199 }
 0x6b8   :  { %4337 = vst [vmem:[%s5715_s7] sm:$0xff] %v5200_v50 }
 0x6b9   :  { %v5202_v3 = vpop.eup %5201 }
 0x6ba   :  { %4338 = vst [vmem:[%s5715_s7 + $0x8] sm:$0xff] %v5202_v3 }
 0x6bb   :  { %4343 = vsyncpa [#allocation6], 1 }
 0x6bc   :  { %4344 = vsyncpa [#allocation8], 1 }
 0x6bd   :  { %4345 = vsyncpa [#allocation11], 1 }
 0x6be   :  { %4346 = vsyncmov [#allocation4] }
 0x6c1   :  { %s4347_s17 = vpop.sfrf %4346 }
 0x6c2   :  { %p4827_p7 = scmp.ne.s32.totalorder %s4347_s17, 0 }
 0x6c4   :  { %4351 = shalt.err (%p4827_p7)  }
 0x6c5   :  { %4353 = vsyncmov [#allocation4 + $0x1] }
 0x6c8   :  { %s4354_s1 = vpop.sfrf %4353 }
 0x6c9   :  { %p4828_p8 = scmp.ne.s32.totalorder %s4354_s1, 0 }
 0x6cb   :  { %4358 = shalt.err (%p4828_p8)  }

</bundles_post_ra>
